<compile_context>
chip_gen: v5e
topology: v5e:2x2
jax: 0.10.0
libtpu: 0.0.40
codegen_flags: <defaults>
</compile_context>

<pallas_src>
import numpy as np
import jax
import jax.numpy as jnp
from jax.experimental import pallas as pl
from jax.experimental.pallas import tpu as pltpu


# ---------------------------------------------------------------------------
# Constant matrices (built with numpy at trace time)
# ---------------------------------------------------------------------------

def _interp_matrix_np(in_size, out_size):
    """Row-stochastic 1-D bilinear matrix, matches F.interpolate(align_corners=False)."""
    dst = np.arange(out_size, dtype=np.float64)
    src = (dst + 0.5) * (in_size / out_size) - 0.5
    src = np.maximum(src, 0.0)                       # PyTorch clamps negative coords
    i0 = np.minimum(np.floor(src).astype(np.int64), in_size - 1)
    i1 = np.minimum(i0 + 1, in_size - 1)
    w1 = src - i0
    w0 = 1.0 - w1
    A = np.zeros((out_size, in_size), dtype=np.float64)
    A[np.arange(out_size), i0] += w0
    A[np.arange(out_size), i1] += w1
    return A


def _kron_interp_np(h, w, scale):
    """2-D bilinear upsample of a row-major flattened (h*w) spatial axis."""
    ah = _interp_matrix_np(h, h * scale)
    aw = _interp_matrix_np(w, w * scale)
    return np.kron(ah, aw)                           # (s*h*s*w, h*w)


def _avgpool_matrix_np(h, w):
    """2x2 average pool as a right-multiplication matrix for (C, h*w) features."""
    P = np.zeros((h * w, (h // 2) * (w // 2)))
    cols = w // 2
    for i in range(h):
        for j in range(w):
            P[i * w + j, (i // 2) * cols + (j // 2)] = 0.25
    return P


def _patchify(x_nchw):
    """4x4/stride-4 im2col of the input, kept channel-major: (N,3,H,W)->(N,48,HW/16)."""
    N, C, H, W = x_nchw.shape
    Hp, Wp = H // 4, W // 4
    xp = x_nchw.reshape(N, C, Hp, 4, Wp, 4).transpose(0, 1, 3, 5, 2, 4)
    return xp.reshape(N, C * 16, Hp * Wp)


# ---------------------------------------------------------------------------
# The fused kernel (stand-in backbone + FPN head), one grid step per image
# ---------------------------------------------------------------------------

def _repvit_fused_kernel(xp_ref,
                         w_stem_ref, b_stem_ref,
                         p1_ref, w_s1_ref, b_s1_ref,
                         p2_ref, w_s2_ref, b_s2_ref,
                         p3_ref, w_s3_ref, b_s3_ref,
                         w_out1_ref, w_in1_ref, b_in1_ref,
                         w_in2_ref, b_in2_ref, w_out23_ref,
                         rab_ref, rc_ref, rd_ref,
                         out3_ref, out2_ref, out1_ref):
    f32, bf16 = jnp.float32, jnp.bfloat16
    mm = lambda a, b: jnp.dot(a, b, preferred_element_type=f32)

    def conv_bias_relu(w_ref, x_bf, b_ref):
        return jnp.maximum(mm(w_ref[...], x_bf) + b_ref[...], 0.0)

    # ------------- stand-in backbone (channel-major, all VMEM-resident) -----------
    xp = xp_ref[0]                                               # (48, Ss)   bf16
    shallow = conv_bias_relu(w_stem_ref, xp, b_stem_ref)         # (64, Ss)   /4
    shallow_bf = shallow.astype(bf16)
    x = mm(shallow_bf, p1_ref[...]).astype(bf16)                 # (64, S8)   /8 pool
    x = conv_bias_relu(w_s1_ref, x, b_s1_ref).astype(bf16)       # (128, S8)
    x = mm(x, p2_ref[...]).astype(bf16)                          # (128, Si)  /16 pool
    inter_bf = conv_bias_relu(w_s2_ref, x, b_s2_ref).astype(bf16)  # (256, Si)
    x = mm(inter_bf, p3_ref[...]).astype(bf16)                   # (256, Sd)  /32 pool
    deep_bf = conv_bias_relu(w_s3_ref, x, b_s3_ref).astype(bf16)   # (512, Sd)

    # ------------- FPN head (channel-major == NCHW-flat outputs) ------------------
    n3 = out3_ref.shape[-1]                                      # 16*Sd

    # stage3 = output1(deep); one dot for [up4 | up2](stage3) via stacked matrices.
    stage3 = mm(w_out1_ref[...], deep_bf)                        # (64, Sd)
    s3_up = mm(stage3.astype(bf16), rab_ref[...])                # (64, 16*Sd + Si)
    out3_ref[0] = s3_up[:, :n3]                                  # stride-8 feature map
    up2_s3 = s3_up[:, n3:]                                       # (64, Si)

    # intra_feat_stage2 = up2(stage3) + inner1(intermediate)
    proj_inter = mm(w_in1_ref[...], inter_bf) + b_in1_ref[...]   # (64, Si)
    intra2 = (up2_s3 + proj_inter).astype(bf16)                  # (64, Si)

    # [output2; output3](intra2) share the LHS and a single shared up4
    # (output2/output3 are bias-free, so they commute with the bilinear resizes).
    w23 = w_out23_ref[...]                                       # (48, 64)
    e23 = mm(w23, intra2).astype(bf16)                           # (48, Si)
    e23_up4 = mm(e23, rc_ref[...])                               # (48, Ss)
    out2_ref[0] = e23_up4[:32, :]                                # stride-4 feature map
    t_up4 = e23_up4[32:, :]                                      # (16, Ss)

    # output_feature[1] = output3( up2(up4(intra2)) + up2(inner2(shallow)) )
    #                   = up2( up4(output3(intra2)) + output3(inner2(shallow)) )
    shallow_proj = mm(w_in2_ref[...], shallow_bf) + b_in2_ref[...]   # (64, Ss)
    u = mm(w23[32:, :], shallow_proj.astype(bf16))               # (16, Ss)
    out1_ref[0] = mm((t_up4 + u).astype(bf16), rd_ref[...])      # (16, 4*Ss) stride-2 map


# ---------------------------------------------------------------------------
# Wrapper
# ---------------------------------------------------------------------------

def repvit_net_forward(x_nchw, params):
    N, C, H, W = x_nchw.shape
    Hp, Wp = H // 4, W // 4          # /4  (shallow)
    Hq, Wq = H // 8, W // 8          # /8
    Hi, Wi = H // 16, W // 16        # /16 (intermediate)
    Hd, Wd = H // 32, W // 32        # /32 (deep)
    Ss, S8, Si, Sd = Hp * Wp, Hq * Wq, Hi * Wi, Hd * Wd

    # TODO(synk): fold this one relayout into the kernel via BlockSpec index_maps.
    xp = _patchify(x_nchw).astype(jnp.bfloat16)                  # (N, 48, Ss)

    bf = lambda a: jnp.asarray(a, jnp.bfloat16)
    col = lambda a: jnp.asarray(a, jnp.float32).reshape(-1, 1)

    # Down-sampling (stand-in backbone) and bilinear-resize matrices, transposed for
    # right-multiplication on channel-major (C, H*W) features.  Exact in bf16.
    p1 = bf(_avgpool_matrix_np(Hp, Wp))                          # (Ss, S8)
    p2 = bf(_avgpool_matrix_np(Hq, Wq))                          # (S8, Si)
    p3 = bf(_avgpool_matrix_np(Hi, Wi))                          # (Si, Sd)
    rab = bf(np.concatenate([_kron_interp_np(Hd, Wd, 4).T,       # up4  /32 -> /8
                             _kron_interp_np(Hd, Wd, 2).T],      # up2  /32 -> /16
                            axis=1))                             # (Sd, 16*Sd + Si)
    rc = bf(_kron_interp_np(Hi, Wi, 4).T)                        # (Si, Ss)    /16 -> /4
    rd = bf(_kron_interp_np(Hp, Wp, 2).T)                        # (Ss, 4*Ss)  /4  -> /2

    w_stem, b_stem = bf(params["stem_w"]), col(params["stem_b"])
    w_s1, b_s1 = bf(params["s1_w"]), col(params["s1_b"])
    w_s2, b_s2 = bf(params["s2_w"]), col(params["s2_b"])
    w_s3, b_s3 = bf(params["s3_w"]), col(params["s3_b"])
    w_out1 = bf(params["output1_w"])
    w_in1, b_in1 = bf(params["inner1_w"]), col(params["inner1_b"])
    w_in2, b_in2 = bf(params["inner2_w"]), col(params["inner2_b"])
    w_out23 = bf(jnp.concatenate([params["output2_w"], params["output3_w"]], axis=0))

    whole = lambda a: pl.BlockSpec(a.shape, lambda n: (0,) * a.ndim)
    per_img = lambda s: pl.BlockSpec((1,) + s, lambda n: (n, 0, 0))

    out3, out2, out1 = pl.pallas_call(
        _repvit_fused_kernel,
        out_shape=(
            jax.ShapeDtypeStruct((N, 64, 16 * Sd), jnp.float32),  # /8 map (NCHW-flat)
            jax.ShapeDtypeStruct((N, 32, Ss), jnp.float32),       # /4 map
            jax.ShapeDtypeStruct((N, 16, 4 * Ss), jnp.float32),   # /2 map
        ),
        grid=(N,),
        in_specs=[
            per_img((48, Ss)),
            whole(w_stem), whole(b_stem),
            whole(p1), whole(w_s1), whole(b_s1),
            whole(p2), whole(w_s2), whole(b_s2),
            whole(p3), whole(w_s3), whole(b_s3),
            whole(w_out1), whole(w_in1), whole(b_in1),
            whole(w_in2), whole(b_in2), whole(w_out23),
            whole(rab), whole(rc), whole(rd),
        ],
        out_specs=(
            per_img((64, 16 * Sd)),
            per_img((32, Ss)),
            per_img((16, 4 * Ss)),
        ),
        compiler_params=pltpu.CompilerParams(
            dimension_semantics=("parallel",),
            vmem_limit_bytes=32 * 1024 * 1024,
        ),
    )(xp, w_stem, b_stem, p1, w_s1, b_s1, p2, w_s2, b_s2, p3, w_s3, b_s3,
      w_out1, w_in1, b_in1, w_in2, b_in2, w_out23, rab, rc, rd)

    # Channel-major flat == NCHW; only reshapes, no transposes.
    return {
        3: out3.reshape(N, 64, 4 * Hd, 4 * Wd),
        2: out2.reshape(N, 32, Hp, Wp),
        1: out1.reshape(N, 16, 2 * Hp, 2 * Wp),
    }


# ---------------------------------------------------------------------------
# Pure-JAX f32 reference (PyTorch op order: resize first, conv after; no bf16)
# ---------------------------------------------------------------------------

def reference_forward(x_nchw, params):
    N, C, H, W = x_nchw.shape
    Hp, Wp, Hq, Wq = H // 4, W // 4, H // 8, W // 8
    Hi, Wi, Hd, Wd = H // 16, W // 16, H // 32, W // 32

    xp = _patchify(x_nchw).astype(jnp.float32)

    conv = lambda w, x: jnp.einsum("oc,nch->noh", w, x)
    cb = lambda w, x, b: conv(w, x) + b[None, :, None]
    relu = lambda v: jnp.maximum(v, 0.0)
    mult = lambda x, m: jnp.einsum("nch,ho->nco", x, jnp.asarray(m, jnp.float32))
    up = lambda x, r: jnp.einsum("nch,oh->nco", x, jnp.asarray(r, jnp.float32))

    shallow = relu(cb(params["stem_w"], xp, params["stem_b"]))
    x = mult(shallow, _avgpool_matrix_np(Hp, Wp))
    x = relu(cb(params["s1_w"], x, params["s1_b"]))
    x = mult(x, _avgpool_matrix_np(Hq, Wq))
    inter = relu(cb(params["s2_w"], x, params["s2_b"]))
    x = mult(inter, _avgpool_matrix_np(Hi, Wi))
    deep = relu(cb(params["s3_w"], x, params["s3_b"]))

    r_d4 = _kron_interp_np(Hd, Wd, 4)
    r_d2 = _kron_interp_np(Hd, Wd, 2)
    r_i4 = _kron_interp_np(Hi, Wi, 4)
    r_s2 = _kron_interp_np(Hp, Wp, 2)

    stage3 = conv(params["output1_w"], deep)
    out3 = up(stage3, r_d4)
    intra2 = up(stage3, r_d2) + cb(params["inner1_w"], inter, params["inner1_b"])
    intra2_up4 = up(intra2, r_i4)
    out2 = conv(params["output2_w"], intra2_up4)
    shallow_proj = cb(params["inner2_w"], shallow, params["inner2_b"])
    intra1 = up(intra2_up4, r_s2) + up(shallow_proj, r_s2)
    out1 = conv(params["output3_w"], intra1)
    return {
        3: out3.reshape(N, 64, 4 * Hd, 4 * Wd),
        2: out2.reshape(N, 32, Hp, Wp),
        1: out1.reshape(N, 16, 2 * Hp, 2 * Wp),
    }


# ---------------------------------------------------------------------------
# Parameters (deterministic, synthetic; head layout == PyTorch Conv2d (Cout, Cin))
# ---------------------------------------------------------------------------

def make_params(key):
    ks = jax.random.split(key, 16)
    w = lambda k, co, ci, s=0.05: jax.random.normal(k, (co, ci), jnp.float32) * s
    b = lambda k, co, s=0.01: jax.random.normal(k, (co,), jnp.float32) * s
    p = {}
    # stand-in backbone (shape-faithful only; see TODO(synk) at top)
    p["stem_w"] = w(ks[0], 64, 48);   p["stem_b"] = b(ks[1], 64)
    p["s1_w"] = w(ks[2], 128, 64);    p["s1_b"] = b(ks[3], 128)
    p["s2_w"] = w(ks[4], 256, 128);   p["s2_b"] = b(ks[5], 256)
    p["s3_w"] = w(ks[6], 512, 256);   p["s3_b"] = b(ks[7], 512)
    # FPN head (matches RepViTNet.__init__ exactly)
    p["output1_w"] = w(ks[8], 64, 512)                               # bias=False
    p["inner1_w"] = w(ks[9], 64, 256);  p["inner1_b"] = b(ks[10], 64)
    p["inner2_w"] = w(ks[11], 64, 64);  p["inner2_b"] = b(ks[12], 64)
    p["output2_w"] = w(ks[13], 32, 64)                               # bias=False
    p["output3_w"] = w(ks[14], 16, 64)                               # bias=False
    return p


# ---------------------------------------------------------------------------

if __name__ == "__main__":
    key = jax.random.PRNGKey(0)
    k_param, k_x = jax.random.split(key)

    params = make_params(k_param)
    x = jax.random.normal(k_x, (2, 3, 64, 64), jnp.float32)      # NCHW, like PyTorch

    fwd = jax.jit(repvit_net_forward)
    outputs = jax.block_until_ready(fwd(x, params))

    assert outputs[3].shape == (2, 64, 8, 8), outputs[3].shape
    assert outputs[2].shape == (2, 32, 16, 16), outputs[2].shape
    assert outputs[1].shape == (2, 16, 32, 32), outputs[1].shape
    assert all(bool(jnp.isfinite(v).all()) for v in outputs.values())

    # bf16-tolerance check against the pure-JAX f32 reference.
    ref = jax.jit(reference_forward)(x, params)
    for lvl in (1, 2, 3):
        err = float(jnp.max(jnp.abs(outputs[lvl] - ref[lvl])))
        scale = float(jnp.max(jnp.abs(ref[lvl]))) + 1e-6
        assert err <= 0.08 * scale, (lvl, err, scale)

    print("KERNEL_OK")
</pallas_src>

<mosaic_0001>
module attributes {stable_mosaic.version = 11 : i64} {
  func.func @_repvit_fused_kernel(%arg0: i32, %arg1: memref<1x48x256xbf16, #tpu.memory_space<vmem>>, %arg2: memref<64x48xbf16, #tpu.memory_space<vmem>>, %arg3: memref<64x1xf32, #tpu.memory_space<vmem>>, %arg4: memref<256x64xbf16, #tpu.memory_space<vmem>>, %arg5: memref<128x64xbf16, #tpu.memory_space<vmem>>, %arg6: memref<128x1xf32, #tpu.memory_space<vmem>>, %arg7: memref<64x16xbf16, #tpu.memory_space<vmem>>, %arg8: memref<256x128xbf16, #tpu.memory_space<vmem>>, %arg9: memref<256x1xf32, #tpu.memory_space<vmem>>, %arg10: memref<16x4xbf16, #tpu.memory_space<vmem>>, %arg11: memref<512x256xbf16, #tpu.memory_space<vmem>>, %arg12: memref<512x1xf32, #tpu.memory_space<vmem>>, %arg13: memref<64x512xbf16, #tpu.memory_space<vmem>>, %arg14: memref<64x256xbf16, #tpu.memory_space<vmem>>, %arg15: memref<64x1xf32, #tpu.memory_space<vmem>>, %arg16: memref<64x64xbf16, #tpu.memory_space<vmem>>, %arg17: memref<64x1xf32, #tpu.memory_space<vmem>>, %arg18: memref<48x64xbf16, #tpu.memory_space<vmem>>, %arg19: memref<4x80xbf16, #tpu.memory_space<vmem>>, %arg20: memref<16x256xbf16, #tpu.memory_space<vmem>>, %arg21: memref<256x1024xbf16, #tpu.memory_space<vmem>>, %arg22: memref<1x64x64xf32, #tpu.memory_space<vmem>>, %arg23: memref<1x32x256xf32, #tpu.memory_space<vmem>>, %arg24: memref<1x16x1024xf32, #tpu.memory_space<vmem>>) attributes {dimension_semantics = [#tpu.dimension_semantics<parallel>], iteration_bounds = array<i64: 2>, scalar_prefetch = 0 : i64, scratch_operands = 0 : i64, tpu.core_type = #tpu.core_type<tc>, window_params = [{transform_indices = @transform_0, window_bounds = array<i64: 1, 48, 256>}, {pipeline_mode = #tpu.pipeline_mode<synchronous>, transform_indices = @transform_1, window_bounds = array<i64: 64, 48>}, {pipeline_mode = #tpu.pipeline_mode<synchronous>, transform_indices = @transform_2, window_bounds = array<i64: 64, 1>}, {pipeline_mode = #tpu.pipeline_mode<synchronous>, transform_indices = @transform_3, window_bounds = array<i64: 256, 64>}, {pipeline_mode = #tpu.pipeline_mode<synchronous>, transform_indices = @transform_4, window_bounds = array<i64: 128, 64>}, {pipeline_mode = #tpu.pipeline_mode<synchronous>, transform_indices = @transform_5, window_bounds = array<i64: 128, 1>}, {pipeline_mode = #tpu.pipeline_mode<synchronous>, transform_indices = @transform_6, window_bounds = array<i64: 64, 16>}, {pipeline_mode = #tpu.pipeline_mode<synchronous>, transform_indices = @transform_7, window_bounds = array<i64: 256, 128>}, {pipeline_mode = #tpu.pipeline_mode<synchronous>, transform_indices = @transform_8, window_bounds = array<i64: 256, 1>}, {pipeline_mode = #tpu.pipeline_mode<synchronous>, transform_indices = @transform_9, window_bounds = array<i64: 16, 4>}, {pipeline_mode = #tpu.pipeline_mode<synchronous>, transform_indices = @transform_10, window_bounds = array<i64: 512, 256>}, {pipeline_mode = #tpu.pipeline_mode<synchronous>, transform_indices = @transform_11, window_bounds = array<i64: 512, 1>}, {pipeline_mode = #tpu.pipeline_mode<synchronous>, transform_indices = @transform_12, window_bounds = array<i64: 64, 512>}, {pipeline_mode = #tpu.pipeline_mode<synchronous>, transform_indices = @transform_13, window_bounds = array<i64: 64, 256>}, {pipeline_mode = #tpu.pipeline_mode<synchronous>, transform_indices = @transform_14, window_bounds = array<i64: 64, 1>}, {pipeline_mode = #tpu.pipeline_mode<synchronous>, transform_indices = @transform_15, window_bounds = array<i64: 64, 64>}, {pipeline_mode = #tpu.pipeline_mode<synchronous>, transform_indices = @transform_16, window_bounds = array<i64: 64, 1>}, {pipeline_mode = #tpu.pipeline_mode<synchronous>, transform_indices = @transform_17, window_bounds = array<i64: 48, 64>}, {pipeline_mode = #tpu.pipeline_mode<synchronous>, transform_indices = @transform_18, window_bounds = array<i64: 4, 80>}, {pipeline_mode = #tpu.pipeline_mode<synchronous>, transform_indices = @transform_19, window_bounds = array<i64: 16, 256>}, {pipeline_mode = #tpu.pipeline_mode<synchronous>, transform_indices = @transform_20, window_bounds = array<i64: 256, 1024>}, {transform_indices = @transform_21, window_bounds = array<i64: 1, 64, 64>}, {transform_indices = @transform_22, window_bounds = array<i64: 1, 32, 256>}, {transform_indices = @transform_23, window_bounds = array<i64: 1, 16, 1024>}]} {
    %c0 = arith.constant 0 : index
    %c0_0 = arith.constant 0 : index
    %c0_1 = arith.constant 0 : index
    %0 = vector.load %arg1[%c0, %c0_0, %c0_1] : memref<1x48x256xbf16, #tpu.memory_space<vmem>>, vector<1x48x256xbf16>
    %1 = vector.shape_cast %0 : vector<1x48x256xbf16> to vector<48x256xbf16>
    %c0_2 = arith.constant 0 : index
    %c0_3 = arith.constant 0 : index
    %2 = vector.load %arg2[%c0_2, %c0_3] : memref<64x48xbf16, #tpu.memory_space<vmem>>, vector<64x48xbf16>
    %cst = arith.constant dense<0.000000e+00> : vector<64x256xf32>
    %3 = tpu.matmul %2, %1, %cst {dimension_numbers = #tpu.dot_dimension_numbers<[1], [0], [0], [1], [0, 0, 1, 1], [], []>} : vector<64x48xbf16>, vector<48x256xbf16>, vector<64x256xf32> -> vector<64x256xf32>
    %c0_4 = arith.constant 0 : index
    %c0_5 = arith.constant 0 : index
    %4 = vector.load %arg3[%c0_4, %c0_5] : memref<64x1xf32, #tpu.memory_space<vmem>>, vector<64x1xf32>
    %5 = vector.broadcast %4 : vector<64x1xf32> to vector<64x256xf32>
    %6 = arith.addf %3, %5 : vector<64x256xf32>
    %cst_6 = arith.constant 0.000000e+00 : f32
    %7 = vector.broadcast %cst_6 : f32 to vector<64x256xf32>
    %8 = arith.maximumf %6, %7 : vector<64x256xf32>
    %9 = arith.truncf %8 : vector<64x256xf32> to vector<64x256xbf16>
    %c0_7 = arith.constant 0 : index
    %c0_8 = arith.constant 0 : index
    %10 = vector.load %arg4[%c0_7, %c0_8] : memref<256x64xbf16, #tpu.memory_space<vmem>>, vector<256x64xbf16>
    %cst_9 = arith.constant dense<0.000000e+00> : vector<64x64xf32>
    %11 = tpu.matmul %9, %10, %cst_9 {dimension_numbers = #tpu.dot_dimension_numbers<[1], [0], [0], [1], [0, 0, 1, 1], [], []>} : vector<64x256xbf16>, vector<256x64xbf16>, vector<64x64xf32> -> vector<64x64xf32>
    %12 = arith.truncf %11 : vector<64x64xf32> to vector<64x64xbf16>
    %c0_10 = arith.constant 0 : index
    %c0_11 = arith.constant 0 : index
    %13 = vector.load %arg5[%c0_10, %c0_11] : memref<128x64xbf16, #tpu.memory_space<vmem>>, vector<128x64xbf16>
    %cst_12 = arith.constant dense<0.000000e+00> : vector<128x64xf32>
    %14 = tpu.matmul %13, %12, %cst_12 {dimension_numbers = #tpu.dot_dimension_numbers<[1], [0], [0], [1], [0, 0, 1, 1], [], []>} : vector<128x64xbf16>, vector<64x64xbf16>, vector<128x64xf32> -> vector<128x64xf32>
    %c0_13 = arith.constant 0 : index
    %c0_14 = arith.constant 0 : index
    %15 = vector.load %arg6[%c0_13, %c0_14] : memref<128x1xf32, #tpu.memory_space<vmem>>, vector<128x1xf32>
    %16 = vector.broadcast %15 : vector<128x1xf32> to vector<128x64xf32>
    %17 = arith.addf %14, %16 : vector<128x64xf32>
    %cst_15 = arith.constant 0.000000e+00 : f32
    %18 = vector.broadcast %cst_15 : f32 to vector<128x64xf32>
    %19 = arith.maximumf %17, %18 : vector<128x64xf32>
    %20 = arith.truncf %19 : vector<128x64xf32> to vector<128x64xbf16>
    %c0_16 = arith.constant 0 : index
    %c0_17 = arith.constant 0 : index
    %21 = vector.load %arg7[%c0_16, %c0_17] : memref<64x16xbf16, #tpu.memory_space<vmem>>, vector<64x16xbf16>
    %cst_18 = arith.constant dense<0.000000e+00> : vector<128x16xf32>
    %22 = tpu.matmul %20, %21, %cst_18 {dimension_numbers = #tpu.dot_dimension_numbers<[1], [0], [0], [1], [0, 0, 1, 1], [], []>} : vector<128x64xbf16>, vector<64x16xbf16>, vector<128x16xf32> -> vector<128x16xf32>
    %23 = arith.truncf %22 : vector<128x16xf32> to vector<128x16xbf16>
    %c0_19 = arith.constant 0 : index
    %c0_20 = arith.constant 0 : index
    %24 = vector.load %arg8[%c0_19, %c0_20] : memref<256x128xbf16, #tpu.memory_space<vmem>>, vector<256x128xbf16>
    %cst_21 = arith.constant dense<0.000000e+00> : vector<256x16xf32>
    %25 = tpu.matmul %24, %23, %cst_21 {dimension_numbers = #tpu.dot_dimension_numbers<[1], [0], [0], [1], [0, 0, 1, 1], [], []>} : vector<256x128xbf16>, vector<128x16xbf16>, vector<256x16xf32> -> vector<256x16xf32>
    %c0_22 = arith.constant 0 : index
    %c0_23 = arith.constant 0 : index
    %26 = vector.load %arg9[%c0_22, %c0_23] : memref<256x1xf32, #tpu.memory_space<vmem>>, vector<256x1xf32>
    %27 = vector.broadcast %26 : vector<256x1xf32> to vector<256x16xf32>
    %28 = arith.addf %25, %27 : vector<256x16xf32>
    %cst_24 = arith.constant 0.000000e+00 : f32
    %29 = vector.broadcast %cst_24 : f32 to vector<256x16xf32>
    %30 = arith.maximumf %28, %29 : vector<256x16xf32>
    %31 = arith.truncf %30 : vector<256x16xf32> to vector<256x16xbf16>
    %c0_25 = arith.constant 0 : index
    %c0_26 = arith.constant 0 : index
    %32 = vector.load %arg10[%c0_25, %c0_26] : memref<16x4xbf16, #tpu.memory_space<vmem>>, vector<16x4xbf16>
    %cst_27 = arith.constant dense<0.000000e+00> : vector<256x4xf32>
    %33 = tpu.matmul %31, %32, %cst_27 {dimension_numbers = #tpu.dot_dimension_numbers<[1], [0], [0], [1], [0, 0, 1, 1], [], []>} : vector<256x16xbf16>, vector<16x4xbf16>, vector<256x4xf32> -> vector<256x4xf32>
    %34 = arith.truncf %33 : vector<256x4xf32> to vector<256x4xbf16>
    %c0_28 = arith.constant 0 : index
    %c0_29 = arith.constant 0 : index
    %35 = vector.load %arg11[%c0_28, %c0_29] : memref<512x256xbf16, #tpu.memory_space<vmem>>, vector<512x256xbf16>
    %cst_30 = arith.constant dense<0.000000e+00> : vector<512x4xf32>
    %36 = tpu.matmul %35, %34, %cst_30 {dimension_numbers = #tpu.dot_dimension_numbers<[1], [0], [0], [1], [0, 0, 1, 1], [], []>} : vector<512x256xbf16>, vector<256x4xbf16>, vector<512x4xf32> -> vector<512x4xf32>
    %c0_31 = arith.constant 0 : index
    %c0_32 = arith.constant 0 : index
    %37 = vector.load %arg12[%c0_31, %c0_32] : memref<512x1xf32, #tpu.memory_space<vmem>>, vector<512x1xf32>
    %38 = vector.broadcast %37 : vector<512x1xf32> to vector<512x4xf32>
    %39 = arith.addf %36, %38 : vector<512x4xf32>
    %cst_33 = arith.constant 0.000000e+00 : f32
    %40 = vector.broadcast %cst_33 : f32 to vector<512x4xf32>
    %41 = arith.maximumf %39, %40 : vector<512x4xf32>
    %42 = arith.truncf %41 : vector<512x4xf32> to vector<512x4xbf16>
    %c0_34 = arith.constant 0 : index
    %c0_35 = arith.constant 0 : index
    %43 = vector.load %arg13[%c0_34, %c0_35] : memref<64x512xbf16, #tpu.memory_space<vmem>>, vector<64x512xbf16>
    %cst_36 = arith.constant dense<0.000000e+00> : vector<64x4xf32>
    %44 = tpu.matmul %43, %42, %cst_36 {dimension_numbers = #tpu.dot_dimension_numbers<[1], [0], [0], [1], [0, 0, 1, 1], [], []>} : vector<64x512xbf16>, vector<512x4xbf16>, vector<64x4xf32> -> vector<64x4xf32>
    %45 = arith.truncf %44 : vector<64x4xf32> to vector<64x4xbf16>
    %c0_37 = arith.constant 0 : index
    %c0_38 = arith.constant 0 : index
    %46 = vector.load %arg19[%c0_37, %c0_38] : memref<4x80xbf16, #tpu.memory_space<vmem>>, vector<4x80xbf16>
    %cst_39 = arith.constant dense<0.000000e+00> : vector<64x80xf32>
    %47 = tpu.matmul %45, %46, %cst_39 {dimension_numbers = #tpu.dot_dimension_numbers<[1], [0], [0], [1], [0, 0, 1, 1], [], []>} : vector<64x4xbf16>, vector<4x80xbf16>, vector<64x80xf32> -> vector<64x80xf32>
    %48 = vector.extract_strided_slice %47 {offsets = [0, 0], sizes = [64, 64], strides = [1, 1]} : vector<64x80xf32> to vector<64x64xf32>
    %c0_40 = arith.constant 0 : index
    %c0_41 = arith.constant 0 : index
    %c0_42 = arith.constant 0 : index
    %49 = vector.load %arg22[%c0_40, %c0_41, %c0_42] : memref<1x64x64xf32, #tpu.memory_space<vmem>>, vector<1x64x64xf32>
    %50 = vector.shape_cast %49 : vector<1x64x64xf32> to vector<64x64xf32>
    %51 = vector.shape_cast %48 : vector<64x64xf32> to vector<1x64x64xf32>
    tpu.vector_store %arg22[%c0_40, %c0_41, %c0_42], %51 {strides = array<i32>} : memref<1x64x64xf32, #tpu.memory_space<vmem>>, vector<1x64x64xf32>,
    %52 = vector.extract_strided_slice %47 {offsets = [0, 64], sizes = [64, 16], strides = [1, 1]} : vector<64x80xf32> to vector<64x16xf32>
    %c0_43 = arith.constant 0 : index
    %c0_44 = arith.constant 0 : index
    %53 = vector.load %arg14[%c0_43, %c0_44] : memref<64x256xbf16, #tpu.memory_space<vmem>>, vector<64x256xbf16>
    %cst_45 = arith.constant dense<0.000000e+00> : vector<64x16xf32>
    %54 = tpu.matmul %53, %31, %cst_45 {dimension_numbers = #tpu.dot_dimension_numbers<[1], [0], [0], [1], [0, 0, 1, 1], [], []>} : vector<64x256xbf16>, vector<256x16xbf16>, vector<64x16xf32> -> vector<64x16xf32>
    %c0_46 = arith.constant 0 : index
    %c0_47 = arith.constant 0 : index
    %55 = vector.load %arg15[%c0_46, %c0_47] : memref<64x1xf32, #tpu.memory_space<vmem>>, vector<64x1xf32>
    %56 = vector.broadcast %55 : vector<64x1xf32> to vector<64x16xf32>
    %57 = arith.addf %54, %56 : vector<64x16xf32>
    %58 = arith.addf %52, %57 : vector<64x16xf32>
    %59 = arith.truncf %58 : vector<64x16xf32> to vector<64x16xbf16>
    %c0_48 = arith.constant 0 : index
    %c0_49 = arith.constant 0 : index
    %60 = vector.load %arg18[%c0_48, %c0_49] : memref<48x64xbf16, #tpu.memory_space<vmem>>, vector<48x64xbf16>
    %cst_50 = arith.constant dense<0.000000e+00> : vector<48x16xf32>
    %61 = tpu.matmul %60, %59, %cst_50 {dimension_numbers = #tpu.dot_dimension_numbers<[1], [0], [0], [1], [0, 0, 1, 1], [], []>} : vector<48x64xbf16>, vector<64x16xbf16>, vector<48x16xf32> -> vector<48x16xf32>
    %62 = arith.truncf %61 : vector<48x16xf32> to vector<48x16xbf16>
    %c0_51 = arith.constant 0 : index
    %c0_52 = arith.constant 0 : index
    %63 = vector.load %arg20[%c0_51, %c0_52] : memref<16x256xbf16, #tpu.memory_space<vmem>>, vector<16x256xbf16>
    %cst_53 = arith.constant dense<0.000000e+00> : vector<48x256xf32>
    %64 = tpu.matmul %62, %63, %cst_53 {dimension_numbers = #tpu.dot_dimension_numbers<[1], [0], [0], [1], [0, 0, 1, 1], [], []>} : vector<48x16xbf16>, vector<16x256xbf16>, vector<48x256xf32> -> vector<48x256xf32>
    %65 = vector.extract_strided_slice %64 {offsets = [0, 0], sizes = [32, 256], strides = [1, 1]} : vector<48x256xf32> to vector<32x256xf32>
    %c0_54 = arith.constant 0 : index
    %c0_55 = arith.constant 0 : index
    %c0_56 = arith.constant 0 : index
    %66 = vector.load %arg23[%c0_54, %c0_55, %c0_56] : memref<1x32x256xf32, #tpu.memory_space<vmem>>, vector<1x32x256xf32>
    %67 = vector.shape_cast %66 : vector<1x32x256xf32> to vector<32x256xf32>
    %68 = vector.shape_cast %65 : vector<32x256xf32> to vector<1x32x256xf32>
    tpu.vector_store %arg23[%c0_54, %c0_55, %c0_56], %68 {strides = array<i32>} : memref<1x32x256xf32, #tpu.memory_space<vmem>>, vector<1x32x256xf32>,
    %69 = vector.extract_strided_slice %64 {offsets = [32, 0], sizes = [16, 256], strides = [1, 1]} : vector<48x256xf32> to vector<16x256xf32>
    %c0_57 = arith.constant 0 : index
    %c0_58 = arith.constant 0 : index
    %70 = vector.load %arg16[%c0_57, %c0_58] : memref<64x64xbf16, #tpu.memory_space<vmem>>, vector<64x64xbf16>
    %cst_59 = arith.constant dense<0.000000e+00> : vector<64x256xf32>
    %71 = tpu.matmul %70, %9, %cst_59 {dimension_numbers = #tpu.dot_dimension_numbers<[1], [0], [0], [1], [0, 0, 1, 1], [], []>} : vector<64x64xbf16>, vector<64x256xbf16>, vector<64x256xf32> -> vector<64x256xf32>
    %c0_60 = arith.constant 0 : index
    %c0_61 = arith.constant 0 : index
    %72 = vector.load %arg17[%c0_60, %c0_61] : memref<64x1xf32, #tpu.memory_space<vmem>>, vector<64x1xf32>
    %73 = vector.broadcast %72 : vector<64x1xf32> to vector<64x256xf32>
    %74 = arith.addf %71, %73 : vector<64x256xf32>
    %75 = vector.extract_strided_slice %60 {offsets = [32, 0], sizes = [16, 64], strides = [1, 1]} : vector<48x64xbf16> to vector<16x64xbf16>
    %76 = arith.truncf %74 : vector<64x256xf32> to vector<64x256xbf16>
    %cst_62 = arith.constant dense<0.000000e+00> : vector<16x256xf32>
    %77 = tpu.matmul %75, %76, %cst_62 {dimension_numbers = #tpu.dot_dimension_numbers<[1], [0], [0], [1], [0, 0, 1, 1], [], []>} : vector<16x64xbf16>, vector<64x256xbf16>, vector<16x256xf32> -> vector<16x256xf32>
    %78 = arith.addf %69, %77 : vector<16x256xf32>
    %79 = arith.truncf %78 : vector<16x256xf32> to vector<16x256xbf16>
    %c0_63 = arith.constant 0 : index
    %c0_64 = arith.constant 0 : index
    %80 = vector.load %arg21[%c0_63, %c0_64] : memref<256x1024xbf16, #tpu.memory_space<vmem>>, vector<256x1024xbf16>
    %cst_65 = arith.constant dense<0.000000e+00> : vector<16x1024xf32>
    %81 = tpu.matmul %79, %80, %cst_65 {dimension_numbers = #tpu.dot_dimension_numbers<[1], [0], [0], [1], [0, 0, 1, 1], [], []>} : vector<16x256xbf16>, vector<256x1024xbf16>, vector<16x1024xf32> -> vector<16x1024xf32>
    %c0_66 = arith.constant 0 : index
    %c0_67 = arith.constant 0 : index
    %c0_68 = arith.constant 0 : index
    %82 = vector.load %arg24[%c0_66, %c0_67, %c0_68] : memref<1x16x1024xf32, #tpu.memory_space<vmem>>, vector<1x16x1024xf32>
    %83 = vector.shape_cast %82 : vector<1x16x1024xf32> to vector<16x1024xf32>
    %84 = vector.shape_cast %81 : vector<16x1024xf32> to vector<1x16x1024xf32>
    tpu.vector_store %arg24[%c0_66, %c0_67, %c0_68], %84 {strides = array<i32>} : memref<1x16x1024xf32, #tpu.memory_space<vmem>>, vector<1x16x1024xf32>,
    return
  }
  func.func @transform_0(%arg0: i32) -> (i32, i32, i32) {
    %c0_i32 = arith.constant 0 : i32
    %c0_i32_0 = arith.constant 0 : i32
    %c0_i32_1 = arith.constant 0 : i32
    return %arg0, %c0_i32, %c0_i32_0 : i32, i32, i32
  }
  func.func @transform_1(%arg0: i32) -> (i32, i32) {
    %c0_i32 = arith.constant 0 : i32
    %c0_i32_0 = arith.constant 0 : i32
    %c0_i32_1 = arith.constant 0 : i32
    return %c0_i32, %c0_i32_0 : i32, i32
  }
  func.func @transform_2(%arg0: i32) -> (i32, i32) {
    %c0_i32 = arith.constant 0 : i32
    %c0_i32_0 = arith.constant 0 : i32
    %c0_i32_1 = arith.constant 0 : i32
    return %c0_i32, %c0_i32_0 : i32, i32
  }
  func.func @transform_3(%arg0: i32) -> (i32, i32) {
    %c0_i32 = arith.constant 0 : i32
    %c0_i32_0 = arith.constant 0 : i32
    %c0_i32_1 = arith.constant 0 : i32
    return %c0_i32, %c0_i32_0 : i32, i32
  }
  func.func @transform_4(%arg0: i32) -> (i32, i32) {
    %c0_i32 = arith.constant 0 : i32
    %c0_i32_0 = arith.constant 0 : i32
    %c0_i32_1 = arith.constant 0 : i32
    return %c0_i32, %c0_i32_0 : i32, i32
  }
  func.func @transform_5(%arg0: i32) -> (i32, i32) {
    %c0_i32 = arith.constant 0 : i32
    %c0_i32_0 = arith.constant 0 : i32
    %c0_i32_1 = arith.constant 0 : i32
    return %c0_i32, %c0_i32_0 : i32, i32
  }
  func.func @transform_6(%arg0: i32) -> (i32, i32) {
    %c0_i32 = arith.constant 0 : i32
    %c0_i32_0 = arith.constant 0 : i32
    %c0_i32_1 = arith.constant 0 : i32
    return %c0_i32, %c0_i32_0 : i32, i32
  }
  func.func @transform_7(%arg0: i32) -> (i32, i32) {
    %c0_i32 = arith.constant 0 : i32
    %c0_i32_0 = arith.constant 0 : i32
    %c0_i32_1 = arith.constant 0 : i32
    return %c0_i32, %c0_i32_0 : i32, i32
  }
  func.func @transform_8(%arg0: i32) -> (i32, i32) {
    %c0_i32 = arith.constant 0 : i32
    %c0_i32_0 = arith.constant 0 : i32
    %c0_i32_1 = arith.constant 0 : i32
    return %c0_i32, %c0_i32_0 : i32, i32
  }
  func.func @transform_9(%arg0: i32) -> (i32, i32) {
    %c0_i32 = arith.constant 0 : i32
    %c0_i32_0 = arith.constant 0 : i32
    %c0_i32_1 = arith.constant 0 : i32
    return %c0_i32, %c0_i32_0 : i32, i32
  }
  func.func @transform_10(%arg0: i32) -> (i32, i32) {
    %c0_i32 = arith.constant 0 : i32
    %c0_i32_0 = arith.constant 0 : i32
    %c0_i32_1 = arith.constant 0 : i32
    return %c0_i32, %c0_i32_0 : i32, i32
  }
  func.func @transform_11(%arg0: i32) -> (i32, i32) {
    %c0_i32 = arith.constant 0 : i32
    %c0_i32_0 = arith.constant 0 : i32
    %c0_i32_1 = arith.constant 0 : i32
    return %c0_i32, %c0_i32_0 : i32, i32
  }
  func.func @transform_12(%arg0: i32) -> (i32, i32) {
    %c0_i32 = arith.constant 0 : i32
    %c0_i32_0 = arith.constant 0 : i32
    %c0_i32_1 = arith.constant 0 : i32
    return %c0_i32, %c0_i32_0 : i32, i32
  }
  func.func @transform_13(%arg0: i32) -> (i32, i32) {
    %c0_i32 = arith.constant 0 : i32
    %c0_i32_0 = arith.constant 0 : i32
    %c0_i32_1 = arith.constant 0 : i32
    return %c0_i32, %c0_i32_0 : i32, i32
  }
  func.func @transform_14(%arg0: i32) -> (i32, i32) {
    %c0_i32 = arith.constant 0 : i32
    %c0_i32_0 = arith.constant 0 : i32
    %c0_i32_1 = arith.constant 0 : i32
    return %c0_i32, %c0_i32_0 : i32, i32
  }
  func.func @transform_15(%arg0: i32) -> (i32, i32) {
    %c0_i32 = arith.constant 0 : i32
    %c0_i32_0 = arith.constant 0 : i32
    %c0_i32_1 = arith.constant 0 : i32
    return %c0_i32, %c0_i32_0 : i32, i32
  }
  func.func @transform_16(%arg0: i32) -> (i32, i32) {
    %c0_i32 = arith.constant 0 : i32
    %c0_i32_0 = arith.constant 0 : i32
    %c0_i32_1 = arith.constant 0 : i32
    return %c0_i32, %c0_i32_0 : i32, i32
  }
  func.func @transform_17(%arg0: i32) -> (i32, i32) {
    %c0_i32 = arith.constant 0 : i32
    %c0_i32_0 = arith.constant 0 : i32
    %c0_i32_1 = arith.constant 0 : i32
    return %c0_i32, %c0_i32_0 : i32, i32
  }
  func.func @transform_18(%arg0: i32) -> (i32, i32) {
    %c0_i32 = arith.constant 0 : i32
    %c0_i32_0 = arith.constant 0 : i32
    %c0_i32_1 = arith.constant 0 : i32
    return %c0_i32, %c0_i32_0 : i32, i32
  }
  func.func @transform_19(%arg0: i32) -> (i32, i32) {
    %c0_i32 = arith.constant 0 : i32
    %c0_i32_0 = arith.constant 0 : i32
    %c0_i32_1 = arith.constant 0 : i32
    return %c0_i32, %c0_i32_0 : i32, i32
  }
  func.func @transform_20(%arg0: i32) -> (i32, i32) {
    %c0_i32 = arith.constant 0 : i32
    %c0_i32_0 = arith.constant 0 : i32
    %c0_i32_1 = arith.constant 0 : i32
    return %c0_i32, %c0_i32_0 : i32, i32
  }
  func.func @transform_21(%arg0: i32) -> (i32, i32, i32) {
    %c0_i32 = arith.constant 0 : i32
    %c0_i32_0 = arith.constant 0 : i32
    %c0_i32_1 = arith.constant 0 : i32
    return %arg0, %c0_i32, %c0_i32_0 : i32, i32, i32
  }
  func.func @transform_22(%arg0: i32) -> (i32, i32, i32) {
    %c0_i32 = arith.constant 0 : i32
    %c0_i32_0 = arith.constant 0 : i32
    %c0_i32_1 = arith.constant 0 : i32
    return %arg0, %c0_i32, %c0_i32_0 : i32, i32, i32
  }
  func.func @transform_23(%arg0: i32) -> (i32, i32, i32) {
    %c0_i32 = arith.constant 0 : i32
    %c0_i32_0 = arith.constant 0 : i32
    %c0_i32_1 = arith.constant 0 : i32
    return %arg0, %c0_i32, %c0_i32_0 : i32, i32, i32
  }
}

</mosaic_0001>

<bundles_post_ra>
// kernel: repvit_net_forward.1
= control target key start
LH: loop header
LB: loop body
LE: loop exit
PB: predicated region body
PF: predicated region fallthrough
CT: control target
= control target key end

     0   :  { %s9465_s0 = inlined_call_operand.vmem [shape: bf16[2,48,256], index: 0, kind: input, shape index: {}]   ;;  %s9466_s1 = inlined_call_operand.vmem [shape: bf16[64,48], index: 1, kind: input, shape index: {}]   ;;  %s9467_s2 = inlined_call_operand.vmem [shape: f32[64,1], index: 2, kind: input, shape index: {}]   ;;  %s9468_s3 = inlined_call_operand.vmem [shape: bf16[256,64], index: 3, kind: input, shape index: {}]   ;;  %s9469_s4 = inlined_call_operand.vmem [shape: bf16[128,64], index: 4, kind: input, shape index: {}]   ;;  %s9470_s5 = inlined_call_operand.vmem [shape: f32[128,1], index: 5, kind: input, shape index: {}]   ;;  %s9471_s6 = inlined_call_operand.vmem [shape: bf16[64,16], index: 6, kind: input, shape index: {}]   ;;  %s9472_s7 = inlined_call_operand.vmem [shape: bf16[256,128], index: 7, kind: input, shape index: {}]   ;;  %s9473_s8 = inlined_call_operand.vmem [shape: f32[256,1], index: 8, kind: input, shape index: {}]   ;;  %s9474_s9 = inlined_call_operand.vmem [shape: bf16[16,4], index: 9, kind: input, shape index: {}]   ;;  %s9475_s10 = inlined_call_operand.vmem [shape: bf16[512,256], index: 10, kind: input, shape index: {}]   ;;  %s9476_s11 = inlined_call_operand.vmem [shape: f32[512,1], index: 11, kind: input, shape index: {}]   ;;  %s9477_s12 = inlined_call_operand.vmem [shape: bf16[64,512], index: 12, kind: input, shape index: {}]   ;;  %s9478_s13 = inlined_call_operand.vmem [shape: bf16[64,256], index: 13, kind: input, shape index: {}]   ;;  %s9479_s14 = inlined_call_operand.vmem [shape: f32[64,1], index: 14, kind: input, shape index: {}]   ;;  %s9480_s15 = inlined_call_operand.vmem [shape: bf16[64,64], index: 15, kind: input, shape index: {}]   ;;  %s9481_s16 = inlined_call_operand.vmem [shape: f32[64,1], index: 16, kind: input, shape index: {}]   ;;  %s9482_s17 = inlined_call_operand.vmem [shape: bf16[48,64], index: 17, kind: input, shape index: {}]   ;;  %s9483_s18 = inlined_call_operand.vmem [shape: bf16[4,80], index: 18, kind: input, shape index: {}]   ;;  %s9484_s19 = inlined_call_operand.vmem [shape: bf16[16,256], index: 19, kind: input, shape index: {}]   ;;  %s9485_s20 = inlined_call_operand.vmem [shape: bf16[256,1024], index: 20, kind: input, shape index: {}]   ;;  %s9486_s21 = inlined_call_operand.vmem [shape: f32[2,64,64], index: 21, kind: output, shape index: {0}]   ;;  %s9487_s22 = inlined_call_operand.vmem [shape: f32[2,32,256], index: 22, kind: output, shape index: {1}]   ;;  %s9488_s23 = inlined_call_operand.vmem [shape: f32[2,16,1024], index: 23, kind: output, shape index: {2}]  }
   0x1   :  { %9520 = sst [smem:[#allocation22_spill]] %s9465_s0 }
   0x2   :  { %9521 = sst [smem:[#allocation23_spill]] %s9466_s1 }
   0x3   :  { %9522 = sst [smem:[#allocation24_spill]] %s9467_s2 }
   0x4   :  { %9523 = sst [smem:[#allocation25_spill]] %s9468_s3 }
   0x5   :  { %9524 = sst [smem:[#allocation26_spill]] %s9469_s4  ;;  %s6881_s4 = smov 0  }
   0x6   :  { %9525 = sst [smem:[#allocation27_spill]] %s9470_s5 }
   0x7   :  { %9526 = sst [smem:[#allocation28_spill]] %s9471_s6 }
   0x8   :  { %9527 = sst [smem:[#allocation29_spill]] %s9472_s7 }
   0x9   :  { %9528 = sst [smem:[#allocation30_spill]] %s9473_s8 }
   0xa   :  { %9529 = sst [smem:[#allocation31_spill]] %s9474_s9 }
   0xb LB: > { %s5254_s30 = sadd.s32 4294967295, %s6757_s4   ;;  %p5258_p0 = scmp.ge.s32.totalorder %s6757_s4, 1  ;;  %s6757_s4 = sphi %s6881_s4, %s34_s4  }
   0xc   : > { %p642_p1 = scmp.lt.s32.totalorder %s6757_s4, 3 }
   0xe   : > { %p643_p2 = pnand %p5258_p0, %p642_p1 }
  0x10   : > { %646 = sbr.rel (%p643_p2) target bundleno = 3454 (0xd7e), region = 104 }
  0x15   : > { %s9530_s5 = sld [smem:[#allocation24_spill]]  ;;  %p716_p3 = scmp.lt.s32.totalorder %s5254_s30, 1  ;;  %v6759_v3 = vmov 0   ;;  %vm849_vm0 = vcmask 392192   ;;  %vm1286_vm1 = vcmask 523264   ;;  %vm1962_vm2 = vcmask 130048  }
  0x16   : > { %6750 = vset.pattern.permute.xlu2 %v6759_v3  ;;  %6749 = vset.pattern.permute.xlu1 %v6759_v3  ;;  %s9531_s0 = sld [smem:[#allocation22_spill]]  ;;  %vm3548_vm3 = vcmask 1041408   ;;  %vm3535_vm4 = vcmask 31744   ;;  %s6760_s6 = smov 64  }
  0x17   : > { %6748 = vset.pattern.permute.xlu0 %v6759_v3  ;;  %s9581_s30 = smov (!%p716_p3, %s5254_s30), 1  ;;  %s9532_s7 = sld [smem:[#allocation27_spill]] }
  0x18   : > { %s6737_s27 = smul.u32 48, %s9581_s30  ;;  %s9533_s26 = sld [smem:[#allocation23_spill]] }
  0x19   : > { %s9534_s8 = sld [smem:[#allocation30_spill]]  ;;  %s6453_s1 = sshll.u32 %s9581_s30, 7 }
  0x1a   : > { %s9546_s3 = sld [smem:[#allocation29_spill]]  ;;  %s9444_s28 = scalar_lea.vmem %s9488_s23, %s6453_s1 }
  0x1b   : > { %v755_v0 = vld [vmem:[%s9530_s5 + $0x20] sm:$0xff]  ;;  %v753_v1 = vld [vmem:[%s9530_s5 + $0x10] sm:$0xff]  ;;  %v756_v4 = vld [vmem:[%s9530_s5 + $0x28] sm:$0xff]  ;;  %s9547_s9 = sld [smem:[#allocation31_spill]] }
  0x1c   : > { %v751_v2 = vld [vmem:[%s9530_s5] sm:$0xff]  ;;  %781 = vperm.xlu2 %6750, %v755_v0   ;;  %771 = vperm.xlu1 %6749, %v753_v1   ;;  %s6907_s24 = scalar_lea.vmem %s9531_s0, %s6737_s27  ;;  %v754_v8 = vld [vmem:[%s9530_s5 + $0x18] sm:$0xff]  ;;  %v752_v9 = vld [vmem:[%s9530_s5 + $0x8] sm:$0xff]  ;;  %s9535_s27 = sld [smem:[#allocation25_spill]] }
  0x1d   : > { %761 = vperm.xlu0 %6748, %v751_v2   ;;  %v5300_v5 = vld [vmem:[%s6907_s24 + $0x20] sm:$0xf]  ;;  %v6459_v6 = vld [vmem:[%s6907_s24 + $0x24] sm:$0xf0]  ;;  %v5292_v7 = vld [vmem:[%s6907_s24 + $0x10] sm:$0xf] }
  0x1e   : > { %v5301_v10 = vor.u32 %v6459_v6, %v5300_v5  ;;  %v6457_v11 = vld [vmem:[%s6907_s24 + $0x14] sm:$0xf0]  ;;  %v5284_v13 = vld [vmem:[%s6907_s24] sm:$0xf]  ;;  %v6455_v14 = vld [vmem:[%s6907_s24 + $0x4] sm:$0xf0] }
  0x1f   : > { %v5293_v12 = vor.u32 %v6457_v11, %v5292_v7  ;;  %v5285_v15 = vor.u32 %v6455_v14, %v5284_v13  ;;  %v6458_v16 = vld [vmem:[%s6907_s24 + $0x24] sm:$0xf]  ;;  %v5302_v17 = vld [vmem:[%s6907_s24 + $0x28] sm:$0xf0]  ;;  %v758_v19 = vld [vmem:[%s9530_s5 + $0x38] sm:$0xff]  ;;  %s6451_s0 = sshll.u32 %s9581_s30, 6 }
  0x20   : > { %867 = vmatpush.bf16.msra.mxu0 %v5301_v10  ;;  %6734 = vmatpush.bf16.msra.mxu1 %v5301_v10  ;;  %v1150_v18 = vld [vmem:[%s9532_s7] sm:$0xff]  ;;  %v757_v20 = vld [vmem:[%s9530_s5 + $0x30] sm:$0xff]  ;;  %v5305_v22 = vor.u32 %v6458_v16, %v5302_v17  ;;  %v5294_v24 = vld [vmem:[%s6907_s24 + $0x18] sm:$0xf0]  ;;  %s9545_s5 = sld [smem:[#allocation28_spill]]  ;;  %s725_s2 = scalar_lea.vmem %s9486_s21, %s6451_s0 }
  0x21   : > { %v6460_v21 = vld [vmem:[%s9533_s26] sm:$0xff]  ;;  %v6456_v23 = vld [vmem:[%s6907_s24 + $0x14] sm:$0xf]  ;;  %v6940_v25 = vld [vmem:[%s9533_s26 + $0x18] sm:$0xff] }
  0x22   : > { %v5297_v26 = vor.u32 %v6456_v23, %v5294_v24  ;;  %v6454_v27 = vld [vmem:[%s6907_s24 + $0x4] sm:$0xf]  ;;  %v5286_v28 = vld [vmem:[%s6907_s24 + $0x8] sm:$0xf0]  ;;  %v1153_v29 = vld [vmem:[%s9532_s7 + $0x18] sm:$0xff]  ;;  %s9544_s24 = sld [smem:[#allocation26_spill]] }
  0x23   : > { %v1152_v30 = vld [vmem:[%s9532_s7 + $0x10] sm:$0xff]  ;;  %v1151_v31 = vld [vmem:[%s9532_s7 + $0x8] sm:$0xff]  ;;  %v5289_v32 = vor.u32 %v6454_v27, %v5286_v28  ;;  %v1154_v35 = vld [vmem:[%s9532_s7 + $0x20] sm:$0xff] }
  0x24   : > { %786 = vperm.xlu2 %6750, %v756_v4   ;;  %776 = vperm.xlu1 %6749, %v754_v8   ;;  %v1156_v33 = vld [vmem:[%s9532_s7 + $0x30] sm:$0xff]  ;;  %v1155_v34 = vld [vmem:[%s9532_s7 + $0x28] sm:$0xff]  ;;  %v1158_v38 = vld [vmem:[%s9532_s7 + $0x40] sm:$0xff] }
  0x25   : > { %766 = vperm.xlu0 %6748, %v752_v9   ;;  %868 = vmatpush.bf16.msra.mxu0 %v5293_v12  ;;  %v6461_v36 = vld [vmem:[%s9533_s26 + $0x8] sm:$0xff]  ;;  %v1157_v39 = vld [vmem:[%s9532_s7 + $0x38] sm:$0xff]  ;;  %v1162_v40 = vld [vmem:[%s9532_s7 + $0x60] sm:$0xff] }
  0x26   : > { %6735 = vmatpush.bf16.msra.mxu1 %v5293_v12  ;;  %v1159_v37 = vld [vmem:[%s9532_s7 + $0x48] sm:$0xff]  ;;  %v1161_v41 = vld [vmem:[%s9532_s7 + $0x58] sm:$0xff]  ;;  %v1160_v42 = vld [vmem:[%s9532_s7 + $0x50] sm:$0xff] }
  0x27   : > { %v6462_v43 = vld [vmem:[%s9533_s26 + $0x10] sm:$0xff]  ;;  %v1165_v44 = vld [vmem:[%s9532_s7 + $0x78] sm:$0xff]  ;;  %v1163_v46 = vld [vmem:[%s9532_s7 + $0x68] sm:$0xff] }
  0x28   : > { %v1164_v45 = vld [vmem:[%s9532_s7 + $0x70] sm:$0xff]  ;;  %v1530_v48 = vld [vmem:[%s9534_s8 + $0x8] sm:$0xff]  ;;  %v1529_v49 = vld [vmem:[%s9534_s8] sm:$0xff] }
  0x29   : > { %869 = vmatpush.bf16.msra.mxu0 %v5285_v15  ;;  %v1531_v47 = vld [vmem:[%s9534_s8 + $0x10] sm:$0xff]  ;;  %v1534_v50 = vld [vmem:[%s9534_s8 + $0x28] sm:$0xff]  ;;  %v1533_v51 = vld [vmem:[%s9534_s8 + $0x20] sm:$0xff] }
  0x2a   : > { %6736 = vmatpush.bf16.msra.mxu1 %v5285_v15  ;;  %v1532_v52 = vld [vmem:[%s9534_s8 + $0x18] sm:$0xff]  ;;  %v1537_v53 = vld [vmem:[%s9534_s8 + $0x40] sm:$0xff]  ;;  %v1535_v55 = vld [vmem:[%s9534_s8 + $0x30] sm:$0xff] }
  0x2b   : > { %v1536_v54 = vld [vmem:[%s9534_s8 + $0x38] sm:$0xff]  ;;  %v1539_v57 = vld [vmem:[%s9534_s8 + $0x50] sm:$0xff]  ;;  %v1538_v58 = vld [vmem:[%s9534_s8 + $0x48] sm:$0xff] }
  0x2c   : > { %1168 = vperm.xlu2 %6750, %v1150_v18   ;;  %796 = vperm.xlu1 %6749, %v758_v19   ;;  %v1540_v56 = vld [vmem:[%s9534_s8 + $0x58] sm:$0xff]  ;;  %v1543_v60 = vld [vmem:[%s9534_s8 + $0x70] sm:$0xff]  ;;  %v1542_v61 = vld [vmem:[%s9534_s8 + $0x68] sm:$0xff] }
  0x2d   : > { %791 = vperm.xlu0 %6748, %v757_v20   ;;  %5306 = vmatmul.msk.bf16.vlgmr.msra.gmra.mxu0 %vm849_vm0, %v6460_v21  ;;  %v6471_v59 = vld [vmem:[%s9535_s27 + $0x38] sm:$0xff]  ;;  %v1541_v62 = vld [vmem:[%s9534_s8 + $0x60] sm:$0xff]  ;;  %v6470_v63 = vld [vmem:[%s9535_s27 + $0x30] sm:$0xff] }
  0x2e   : > { %896 = vmatpush.bf16.msrb.mxu1 %v5305_v22  ;;  %1072 = vmatpush.bf16.msra.mxu2 %v6471_v59  ;;  %v1546_v0 = vld [vmem:[%s9534_s8 + $0x88] sm:$0xff]  ;;  %v1545_v1 = vld [vmem:[%s9534_s8 + $0x80] sm:$0xff]  ;;  %v1544_v2 = vld [vmem:[%s9534_s8 + $0x78] sm:$0xff] }
  0x2f   : > { %5309 = vmatmul.msk.bf16.vlgmr.msra.gmra.mxu1 %vm849_vm0, %v6940_v25  ;;  %v6469_v3 = vld [vmem:[%s9535_s27 + $0x28] sm:$0xff]  ;;  %v6468_v4 = vld [vmem:[%s9535_s27 + $0x20] sm:$0xff]  ;;  %v6479_v5 = vld [vmem:[%s9535_s27 + $0x78] sm:$0xff] }
  0x30   : > { %v1549_v6 = vld [vmem:[%s9534_s8 + $0xa0] sm:$0xff]  ;;  %1101 = vmatpush.bf16.msra.mxu3 %v6479_v5  ;;  %v1548_v7 = vld [vmem:[%s9534_s8 + $0x98] sm:$0xff]  ;;  %v1547_v8 = vld [vmem:[%s9534_s8 + $0x90] sm:$0xff] }
  0x31   : > { %v6467_v9 = vld [vmem:[%s9535_s27 + $0x18] sm:$0xff]  ;;  %v6466_v10 = vld [vmem:[%s9535_s27 + $0x10] sm:$0xff]  ;;  %v1550_v14 = vld [vmem:[%s9534_s8 + $0xa8] sm:$0xff] }
  0x32   : > { %897 = vmatpush.bf16.msrb.mxu1 %v5297_v26  ;;  %1073 = vmatpush.bf16.msra.mxu2 %v6470_v63  ;;  %v6478_v11 = vld [vmem:[%s9535_s27 + $0x70] sm:$0xff]  ;;  %v1552_v12 = vld [vmem:[%s9534_s8 + $0xb8] sm:$0xff]  ;;  %v6465_v15 = vld [vmem:[%s9535_s27 + $0x8] sm:$0xff] }
  0x33   : > { %v1551_v13 = vld [vmem:[%s9534_s8 + $0xb0] sm:$0xff]  ;;  %v6477_v16 = vld [vmem:[%s9535_s27 + $0x68] sm:$0xff]  ;;  %v6464_v17 = vld [vmem:[%s9535_s27] sm:$0xff] }
  0x34   : > { %1183 = vperm.xlu2 %6750, %v1153_v29   ;;  %1178 = vperm.xlu1 %6749, %v1152_v30   ;;  %v6476_v18 = vld [vmem:[%s9535_s27 + $0x60] sm:$0xff]  ;;  %v1555_v19 = vld [vmem:[%s9534_s8 + $0xd0] sm:$0xff]  ;;  %v1554_v20 = vld [vmem:[%s9534_s8 + $0xc8] sm:$0xff] }
  0x35   : > { %1173 = vperm.xlu0 %6748, %v1151_v31   ;;  %1102 = vmatpush.bf16.msra.mxu3 %v6478_v11  ;;  %v6475_v22 = vld [vmem:[%s9535_s27 + $0x58] sm:$0xff]  ;;  %v6474_v23 = vld [vmem:[%s9535_s27 + $0x50] sm:$0xff]  ;;  %v1558_v24 = vld [vmem:[%s9534_s8 + $0xe8] sm:$0xff] }
  0x36   : > { %898 = vmatpush.bf16.msrb.mxu1 %v5289_v32  ;;  %1074 = vmatpush.bf16.msra.mxu2 %v6469_v3  ;;  %v1556_v26 = vld [vmem:[%s9534_s8 + $0xd8] sm:$0xff]  ;;  %v6473_v27 = vld [vmem:[%s9535_s27 + $0x48] sm:$0xff]  ;;  %v6472_v28 = vld [vmem:[%s9535_s27 + $0x40] sm:$0xff] }
  0x37   : > { %v2194_v29 = vld [vmem:[%s9476_s11 + $0x70] sm:$0xff]  ;;  %v1560_v31 = vld [vmem:[%s9534_s8 + $0xf8] sm:$0xff]  ;;  %v2188_v3 = vld [vmem:[%s9476_s11 + $0x40] sm:$0xff] }
  0x38   : > { %v1559_v32 = vld [vmem:[%s9534_s8 + $0xf0] sm:$0xff]  ;;  %v2207_v5 = vld [vmem:[%s9476_s11 + $0xd8] sm:$0xff]  ;;  %v2205_v11 = vld [vmem:[%s9476_s11 + $0xc8] sm:$0xff] }
  0x39   : > { %1103 = vmatpush.bf16.msra.mxu3 %v6477_v16 }
  0x3a   : > { %1075 = vmatpush.bf16.msra.mxu2 %v6468_v4 }
  0x3c   : > { %1198 = vperm.xlu2 %6750, %v1156_v33   ;;  %1193 = vperm.xlu1 %6749, %v1155_v34  }
  0x3d   : > { %1188 = vperm.xlu0 %6748, %v1154_v35   ;;  %5307 = vmatmul.msk.bf16.gmra.mxu0 %vm849_vm0, %v6461_v36 }
  0x3e   : > { %1076 = vmatpush.bf16.msra.mxu2 %v6467_v9  ;;  %1104 = vmatpush.bf16.msra.mxu3 %v6476_v18 }
  0x3f   : > { %5310 = vmatmul.msk.bf16.vlgmr.msrb.gmra.mxu1 %vm849_vm0, %v6460_v21  ;;  %v1553_v21 = vld [vmem:[%s9534_s8 + $0xc0] sm:$0xff] }
  0x42   : > { %1077 = vmatpush.bf16.msra.mxu2 %v6466_v10  ;;  %1105 = vmatpush.bf16.msra.mxu3 %v6475_v22 }
  0x44   : > { %1213 = vperm.xlu2 %6750, %v1159_v37   ;;  %1208 = vperm.xlu1 %6749, %v1158_v38   ;;  %v2210_v37 = vld [vmem:[%s9476_s11 + $0xf0] sm:$0xff]  ;;  %v2195_v38 = vld [vmem:[%s9476_s11 + $0x78] sm:$0xff] }
  0x45   : > { %1203 = vperm.xlu0 %6748, %v1157_v39  }
  0x46   : > { %1078 = vmatpush.bf16.msra.mxu2 %v6465_v15  ;;  %1106 = vmatpush.bf16.msra.mxu3 %v6474_v23 }
  0x4a   : > { %1079 = vmatpush.bf16.msra.mxu2 %v6464_v17  ;;  %1107 = vmatpush.bf16.msra.mxu3 %v6473_v27 }
  0x4c   : > { %1228 = vperm.xlu2 %6750, %v1162_v40   ;;  %1223 = vperm.xlu1 %6749, %v1161_v41  }
  0x4d   : > { %1218 = vperm.xlu0 %6748, %v1160_v42   ;;  %5308 = vmatmul.msk.bf16.gmra.mxu0 %vm849_vm0, %v6462_v43 }
  0x4e   : > { %1108 = vmatpush.bf16.msra.mxu3 %v6472_v28  ;;  %v2186_v28 = vld [vmem:[%s9476_s11 + $0x30] sm:$0xff] }
  0x4f   : > { %5311 = vmatmul.msk.bf16.gmra.mxu1 %vm849_vm0, %v6461_v36  ;;  %v2211_v36 = vld [vmem:[%s9476_s11 + $0xf8] sm:$0xff] }
  0x54   : > { %1243 = vperm.xlu2 %6750, %v1165_v44   ;;  %1238 = vperm.xlu1 %6749, %v1164_v45  }
  0x55   : > { %1233 = vperm.xlu0 %6748, %v1163_v46   ;;  %v2208_v46 = vld [vmem:[%s9476_s11 + $0xe0] sm:$0xff] }
  0x5c   : > { %1573 = vperm.xlu2 %6750, %v1531_v47   ;;  %1568 = vperm.xlu1 %6749, %v1530_v48   ;;  %v2193_v48 = vld [vmem:[%s9476_s11 + $0x68] sm:$0xff] }
  0x5d   : > { %1563 = vperm.xlu0 %6748, %v1529_v49   ;;  %v2192_v49 = vld [vmem:[%s9476_s11 + $0x60] sm:$0xff] }
  0x5f   : > { %5312 = vmatmul.msk.bf16.gmra.mxu1 %vm849_vm0, %v6462_v43 }
  0x64   : > { %1588 = vperm.xlu2 %6750, %v1534_v50   ;;  %1583 = vperm.xlu1 %6749, %v1533_v51  }
  0x65   : > { %1578 = vperm.xlu0 %6748, %v1532_v52  }
  0x6c   : > { %1603 = vperm.xlu2 %6750, %v1537_v53   ;;  %1598 = vperm.xlu1 %6749, %v1536_v54   ;;  %v2191_v53 = vld [vmem:[%s9476_s11 + $0x58] sm:$0xff]  ;;  %v2190_v54 = vld [vmem:[%s9476_s11 + $0x50] sm:$0xff] }
  0x6d   : > { %1593 = vperm.xlu0 %6748, %v1535_v55   ;;  %v2209_v55 = vld [vmem:[%s9476_s11 + $0xe8] sm:$0xff] }
  0x6f   : > { %5313 = vmatmul.msk.bf16.gmra.mxu1 %vm849_vm0, %v6940_v25  ;;  %v1557_v25 = vld [vmem:[%s9534_s8 + $0xe0] sm:$0xff] }
  0x74   : > { %1618 = vperm.xlu2 %6750, %v1540_v56   ;;  %1613 = vperm.xlu1 %6749, %v1539_v57  }
  0x75   : > { %1608 = vperm.xlu0 %6748, %v1538_v58  }
  0x76   : > { %v782_v4 = vpop.permute.xlu2 %781 }
  0x7c   : > { %1633 = vperm.xlu2 %6750, %v1543_v60   ;;  %1628 = vperm.xlu1 %6749, %v1542_v61  }
  0x7d   : > { %1623 = vperm.xlu0 %6748, %v1541_v62  }
  0x84   : > { %1648 = vperm.xlu2 %6750, %v1546_v0   ;;  %1643 = vperm.xlu1 %6749, %v1545_v1  }
  0x85   : > { %1638 = vperm.xlu0 %6748, %v1544_v2  }
  0x8c   : > { %1663 = vperm.xlu2 %6750, %v1549_v6   ;;  %1658 = vperm.xlu1 %6749, %v1548_v7   ;;  %v2206_v7 = vld [vmem:[%s9476_s11 + $0xd0] sm:$0xff] }
  0x8d   : > { %1653 = vperm.xlu0 %6748, %v1547_v8  }
  0x8e   : > { %v772_v47 = vpop.permute.xlu1 %771 }
  0x8f   : > { %v762_v30 = vpop.permute.xlu0 %761 }
  0x94   : > { %1678 = vperm.xlu2 %6750, %v1552_v12   ;;  %1673 = vperm.xlu1 %6749, %v1551_v13   ;;  %v2204_v12 = vld [vmem:[%s9476_s11 + $0xc0] sm:$0xff]  ;;  %v2189_v13 = vld [vmem:[%s9476_s11 + $0x48] sm:$0xff] }
  0x95   : > { %1668 = vperm.xlu0 %6748, %v1550_v14   ;;  %v787_v14 = vpop.permute.xlu2 %786 }
  0x96   : > { %v777_v56 = vpop.permute.xlu1 %776 }
  0x97   : > { %v767_v39 = vpop.permute.xlu0 %766 }
  0x9c   : > { %1693 = vperm.xlu2 %6750, %v1555_v19   ;;  %1688 = vperm.xlu1 %6749, %v1554_v20  }
  0x9d   : > { %1683 = vperm.xlu0 %6748, %v1553_v21  }
  0xa4   : > { %1708 = vperm.xlu2 %6750, %v1558_v24   ;;  %1703 = vperm.xlu1 %6749, %v1557_v25   ;;  %v2202_v25 = vld [vmem:[%s9476_s11 + $0xb0] sm:$0xff] }
  0xa5   : > { %1698 = vperm.xlu0 %6748, %v1556_v26   ;;  %v2187_v26 = vld [vmem:[%s9476_s11 + $0x38] sm:$0xff] }
  0xaa   : > { %v871_v33 = vpop.f32.mrf.mxu0 }
  0xab   : > { %v872_v35 = vadd.f32 %v871_v33, %v762_v30  ;;  %v792_v33 = vpop.permute.xlu0 %791 }
  0xac   : > { %2316 = vperm.xlu2 %6750, %v2194_v29   ;;  %1718 = vperm.xlu1 %6749, %v1560_v31   ;;  %v7152_v34 = vpop.f32.mrf.mxu1 }
  0xad   : > { %1713 = vperm.xlu0 %6748, %v1559_v32   ;;  %v920_v41 = vmax.f32 %v872_v35, 0.0  ;;  %v2185_v32 = vld [vmem:[%s9476_s11 + $0x28] sm:$0xff]  ;;  %v2184_v35 = vld [vmem:[%s9476_s11 + $0x20] sm:$0xff] }
  0xb2   : > { %v873_v40 = vpop.f32.mrf.mxu0 }
  0xb3   : > { %v874_v42 = vadd.f32 %v873_v40, %v767_v39 }
  0xb4   : > { %2401 = vperm.xlu2 %6750, %v2211_v36   ;;  %2396 = vperm.xlu1 %6749, %v2210_v37   ;;  %v7163_v43 = vpop.f32.mrf.mxu1  ;;  %v887_v36 = vadd.f32 %v7152_v34, %v792_v33  ;;  %v2203_v37 = vld [vmem:[%s9476_s11 + $0xb8] sm:$0xff]  ;;  %v2182_v34 = vld [vmem:[%s9476_s11 + $0x10] sm:$0xff] }
  0xb5   : > { %2321 = vperm.xlu0 %6748, %v2195_v38   ;;  %v922_v44 = vmax.f32 %v874_v42, 0.0 }
  0xb7   : > { %v7165_v45 = vpack.c.bf16 %v922_v44, %v920_v41  ;;  %v932_v41 = vmax.f32 %v887_v36, 0.0 }
  0xb9   : > { %9536 = vst [vmem:[#allocation2_spill] sm:$0xff] %v7165_v45  ;;  %1080 = vmatmul.bf16.vlgmr.msra.gmra.mxu2 %v7165_v45 }
  0xba   : > { %v876_v50 = vpop.f32.mrf.mxu0 }
  0xbb   : > { %v877_v52 = vadd.f32 %v876_v50, %v772_v47 }
  0xbc   : > { %2386 = vperm.xlu2 %6750, %v2208_v46   ;;  %2311 = vperm.xlu1 %6749, %v2193_v48   ;;  %v900_v51 = vpop.f32.mrf.mxu1 }
  0xbd   : > { %2306 = vperm.xlu0 %6748, %v2192_v49   ;;  %v924_v58 = vmax.f32 %v877_v52, 0.0  ;;  %v901_v59 = vadd.f32 %v900_v51, %v762_v30  ;;  %v797_v30 = vpop.permute.xlu1 %796  ;;  %v2200_v49 = vld [vmem:[%s9476_s11 + $0xa0] sm:$0xff]  ;;  %v2199_v51 = vld [vmem:[%s9476_s11 + $0x98] sm:$0xff]  ;;  %v2198_v52 = vld [vmem:[%s9476_s11 + $0x90] sm:$0xff] }
  0xbe   : > { %v889_v31 = vadd.f32 %v7163_v43, %v797_v30 }
  0xbf   : > { %v921_v0 = vmax.f32 %v901_v59, 0.0  ;;  %v2196_v59 = vld [vmem:[%s9476_s11 + $0x80] sm:$0xff] }
  0xc0   : > { %v934_v38 = vmax.f32 %v889_v31, 0.0  ;;  %v2212_v31 = vld [vmem:[%s9476_s11 + $0x100] sm:$0xff] }
  0xc2   : > { %v878_v57 = vpop.f32.mrf.mxu0  ;;  %v7236_v46 = vpack.c.bf16 %v934_v38, %v932_v41  ;;  %v2229_v38 = vld [vmem:[%s9476_s11 + $0x188] sm:$0xff] }
  0xc3   : > { %v879_v60 = vadd.f32 %v878_v57, %v777_v56 }
  0xc4   : > { %2301 = vperm.xlu2 %6750, %v2191_v53   ;;  %2296 = vperm.xlu1 %6749, %v2190_v54   ;;  %v902_v61 = vpop.f32.mrf.mxu1  ;;  %9541 = vst [vmem:[#allocation7_spill] sm:$0xff] %v7236_v46  ;;  %v2183_v53 = vld [vmem:[%s9476_s11 + $0x18] sm:$0xff] }
  0xc5   : > { %2391 = vperm.xlu0 %6748, %v2209_v55   ;;  %v926_v62 = vmax.f32 %v879_v60, 0.0  ;;  %v903_v63 = vadd.f32 %v902_v61, %v767_v39  ;;  %v2181_v60 = vld [vmem:[%s9476_s11 + $0x8] sm:$0xff] }
  0xc7   : > { %v923_v1 = vmax.f32 %v903_v63, 0.0  ;;  %v7186_v2 = vpack.c.bf16 %v926_v62, %v924_v58  ;;  %v2180_v62 = vld [vmem:[%s9476_s11] sm:$0xff]  ;;  %v2227_v63 = vld [vmem:[%s9476_s11 + $0x178] sm:$0xff] }
  0xc9   : > { %9537 = vst [vmem:[#allocation3_spill] sm:$0xff] %v7186_v2  ;;  %1085 = vmatmul.bf16.gmra.mxu2 %v7186_v2  ;;  %v7195_v6 = vpack.c.bf16 %v923_v1, %v921_v0  ;;  %v2226_v0 = vld [vmem:[%s9476_s11 + $0x170] sm:$0xff]  ;;  %v2197_v1 = vld [vmem:[%s9476_s11 + $0x88] sm:$0xff] }
  0xca   : > { %v881_v8 = vpop.f32.mrf.mxu0 }
  0xcb   : > { %9538 = vst [vmem:[#allocation4_spill] sm:$0xff] %v7195_v6  ;;  %1109 = vmatmul.bf16.vlgmr.msra.gmra.mxu3 %v7195_v6  ;;  %v882_v10 = vadd.f32 %v881_v8, %v782_v4  ;;  %v2240_v8 = vld [vmem:[%s9476_s11 + $0x1e0] sm:$0xff] }
  0xcc   : > { %2286 = vperm.xlu2 %6750, %v2188_v3   ;;  %2381 = vperm.xlu1 %6749, %v2207_v5   ;;  %v905_v9 = vpop.f32.mrf.mxu1  ;;  %v2224_v3 = vld [vmem:[%s9476_s11 + $0x160] sm:$0xff]  ;;  %v2242_v5 = vld [vmem:[%s9476_s11 + $0x1f0] sm:$0xff] }
  0xcd   : > { %2376 = vperm.xlu0 %6748, %v2206_v7   ;;  %v928_v16 = vmax.f32 %v882_v10, 0.0  ;;  %v906_v17 = vadd.f32 %v905_v9, %v772_v47  ;;  %v2201_v47 = vld [vmem:[%s9476_s11 + $0xa8] sm:$0xff]  ;;  %v2238_v10 = vld [vmem:[%s9476_s11 + $0x1d0] sm:$0xff] }
  0xce   : > { %v2241_v7 = vld [vmem:[%s9476_s11 + $0x1e8] sm:$0xff] }
  0xcf   : > { %v925_v22 = vmax.f32 %v906_v17, 0.0  ;;  %v2225_v9 = vld [vmem:[%s9476_s11 + $0x168] sm:$0xff] }
  0xd0   : > { %v2237_v17 = vld [vmem:[%s9476_s11 + $0x1c8] sm:$0xff] }
  0xd2   : > { %v883_v15 = vpop.f32.mrf.mxu0 }
  0xd3   : > { %v884_v18 = vadd.f32 %v883_v15, %v787_v14  ;;  %v2239_v15 = vld [vmem:[%s9476_s11 + $0x1d8] sm:$0xff] }
  0xd4   : > { %2371 = vperm.xlu2 %6750, %v2205_v11   ;;  %2366 = vperm.xlu1 %6749, %v2204_v12   ;;  %v907_v19 = vpop.f32.mrf.mxu1  ;;  %v2223_v11 = vld [vmem:[%s9476_s11 + $0x158] sm:$0xff]  ;;  %v2222_v12 = vld [vmem:[%s9476_s11 + $0x150] sm:$0xff] }
  0xd5   : > { %2291 = vperm.xlu0 %6748, %v2189_v13   ;;  %v930_v20 = vmax.f32 %v884_v18, 0.0  ;;  %v908_v21 = vadd.f32 %v907_v19, %v777_v56  ;;  %v2221_v13 = vld [vmem:[%s9476_s11 + $0x148] sm:$0xff]  ;;  %v2236_v18 = vld [vmem:[%s9476_s11 + $0x1c0] sm:$0xff]  ;;  %v2235_v19 = vld [vmem:[%s9476_s11 + $0x1b8] sm:$0xff] }
  0xd7   : > { %v927_v23 = vmax.f32 %v908_v21, 0.0  ;;  %v7210_v24 = vpack.c.bf16 %v930_v20, %v928_v16  ;;  %v2218_v16 = vld [vmem:[%s9476_s11 + $0x130] sm:$0xff]  ;;  %v2219_v21 = vld [vmem:[%s9476_s11 + $0x138] sm:$0xff] }
  0xd8   : > { %v2234_v20 = vld [vmem:[%s9476_s11 + $0x1b0] sm:$0xff] }
  0xd9   : > { %9539 = vst [vmem:[#allocation5_spill] sm:$0xff] %v7210_v24  ;;  %1090 = vmatmul.bf16.gmra.mxu2 %v7210_v24  ;;  %v7219_v27 = vpack.c.bf16 %v927_v23, %v925_v22  ;;  %v2232_v22 = vld [vmem:[%s9476_s11 + $0x1a0] sm:$0xff]  ;;  %v2217_v23 = vld [vmem:[%s9476_s11 + $0x128] sm:$0xff] }
  0xdb   : > { %9540 = vst [vmem:[#allocation6_spill] sm:$0xff] %v7219_v27  ;;  %1114 = vmatmul.bf16.gmra.mxu3 %v7219_v27  ;;  %v5656_v27 = vld [vmem:[%s9475_s10 + $0x100] sm:$0xf] }
  0xdc   : > { %2356 = vperm.xlu2 %6750, %v2202_v25   ;;  %2281 = vperm.xlu1 %6749, %v2187_v26   ;;  %v910_v29 = vpop.f32.mrf.mxu1  ;;  %v2216_v25 = vld [vmem:[%s9476_s11 + $0x120] sm:$0xff]  ;;  %v2215_v26 = vld [vmem:[%s9476_s11 + $0x118] sm:$0xff] }
  0xdd   : > { %2276 = vperm.xlu0 %6748, %v2186_v28   ;;  %v911_v39 = vadd.f32 %v910_v29, %v782_v4  ;;  %v2243_v4 = vld [vmem:[%s9476_s11 + $0x1f8] sm:$0xff]  ;;  %v2214_v29 = vld [vmem:[%s9476_s11 + $0x110] sm:$0xff] }
  0xdf   : > { %v929_v43 = vmax.f32 %v911_v39, 0.0  ;;  %v2228_v39 = vld [vmem:[%s9476_s11 + $0x180] sm:$0xff] }
  0xe4   : > { %2271 = vperm.xlu2 %6750, %v2185_v32   ;;  %2266 = vperm.xlu1 %6749, %v2184_v35   ;;  %v912_v40 = vpop.f32.mrf.mxu1  ;;  %v2231_v32 = vld [vmem:[%s9476_s11 + $0x198] sm:$0xff] }
  0xe5   : > { %2361 = vperm.xlu0 %6748, %v2203_v37   ;;  %v913_v42 = vadd.f32 %v912_v40, %v787_v14  ;;  %v2220_v14 = vld [vmem:[%s9476_s11 + $0x140] sm:$0xff]  ;;  %v2213_v40 = vld [vmem:[%s9476_s11 + $0x108] sm:$0xff] }
  0xe7   : > { %v931_v44 = vmax.f32 %v913_v42, 0.0 }
  0xe9   : > { %1095 = vmatmul.bf16.gmra.mxu2 %v7236_v46  ;;  %v7245_v48 = vpack.c.bf16 %v931_v44, %v929_v43  ;;  %v3601_v43 = vld [vmem:[%s9479_s14 + $0x20] sm:$0xff]  ;;  %v3604_v44 = vld [vmem:[%s9479_s14 + $0x38] sm:$0xff] }
  0xeb   : > { %9542 = vst [vmem:[#allocation8_spill] sm:$0xff] %v7245_v48  ;;  %1119 = vmatmul.bf16.gmra.mxu3 %v7245_v48 }
  0xec   : > { %2256 = vperm.xlu2 %6750, %v2182_v34   ;;  %2351 = vperm.xlu1 %6749, %v2201_v47   ;;  %v915_v50 = vpop.f32.mrf.mxu1  ;;  %v3603_v34 = vld [vmem:[%s9479_s14 + $0x30] sm:$0xff] }
  0xed   : > { %2346 = vperm.xlu0 %6748, %v2200_v49   ;;  %v916_v54 = vadd.f32 %v915_v50, %v792_v33  ;;  %v2230_v33 = vld [vmem:[%s9476_s11 + $0x190] sm:$0xff]  ;;  %v3600_v50 = vld [vmem:[%s9479_s14 + $0x18] sm:$0xff] }
  0xef   : > { %v933_v57 = vmax.f32 %v916_v54, 0.0 }
  0xf4   : > { %2341 = vperm.xlu2 %6750, %v2199_v51   ;;  %2336 = vperm.xlu1 %6749, %v2198_v52   ;;  %v917_v55 = vpop.f32.mrf.mxu1  ;;  %v3599_v51 = vld [vmem:[%s9479_s14 + $0x10] sm:$0xff]  ;;  %v3602_v52 = vld [vmem:[%s9479_s14 + $0x28] sm:$0xff] }
  0xf5   : > { %2261 = vperm.xlu0 %6748, %v2183_v53   ;;  %v918_v56 = vadd.f32 %v917_v55, %v797_v30  ;;  %v2233_v30 = vld [vmem:[%s9476_s11 + $0x1a8] sm:$0xff] }
  0xf6   : > { %v3598_v55 = vld [vmem:[%s9479_s14 + $0x8] sm:$0xff] }
  0xf7   : > { %v935_v58 = vmax.f32 %v918_v56, 0.0  ;;  %v3597_v56 = vld [vmem:[%s9479_s14] sm:$0xff] }
  0xf9   : > { %v7266_v61 = vpack.c.bf16 %v935_v58, %v933_v57 }
  0xfb   : > { %9543 = vst [vmem:[#allocation9_spill] sm:$0xff] %v7266_v61  ;;  %1124 = vmatmul.bf16.gmra.mxu3 %v7266_v61 }
  0xfc   : > { %2326 = vperm.xlu2 %6750, %v2196_v59   ;;  %2251 = vperm.xlu1 %6749, %v2181_v60  }
  0xfd   : > { %2246 = vperm.xlu0 %6748, %v2180_v62  }
 0x104   : > { %2481 = vperm.xlu2 %6750, %v2227_v63   ;;  %2476 = vperm.xlu1 %6749, %v2226_v0  }
 0x105   : > { %2331 = vperm.xlu0 %6748, %v2197_v1  }
 0x10c   : > { %2466 = vperm.xlu2 %6750, %v2224_v3   ;;  %2561 = vperm.xlu1 %6749, %v2243_v4  }
 0x10d   : > { %2556 = vperm.xlu0 %6748, %v2242_v5  }
 0x114   : > { %2551 = vperm.xlu2 %6750, %v2241_v7   ;;  %2546 = vperm.xlu1 %6749, %v2240_v8  }
 0x115   : > { %2471 = vperm.xlu0 %6748, %v2225_v9  }
 0x11c   : > { %2536 = vperm.xlu2 %6750, %v2238_v10   ;;  %2461 = vperm.xlu1 %6749, %v2223_v11  }
 0x11d   : > { %2456 = vperm.xlu0 %6748, %v2222_v12  }
 0x124   : > { %2451 = vperm.xlu2 %6750, %v2221_v13   ;;  %2446 = vperm.xlu1 %6749, %v2220_v14   ;;  %v6480_v14 = vld [vmem:[%s9544_s24] sm:$0xff] }
 0x125   : > { %2541 = vperm.xlu0 %6748, %v2239_v15   ;;  %v6481_v15 = vld [vmem:[%s9544_s24 + $0x8] sm:$0xff] }
 0x12c   : > { %2436 = vperm.xlu2 %6750, %v2218_v16   ;;  %2531 = vperm.xlu1 %6749, %v2237_v17   ;;  %v6482_v16 = vld [vmem:[%s9544_s24 + $0x10] sm:$0xff]  ;;  %v6483_v17 = vld [vmem:[%s9544_s24 + $0x18] sm:$0xff] }
 0x12d   : > { %2526 = vperm.xlu0 %6748, %v2236_v18   ;;  %v6484_v18 = vld [vmem:[%s9544_s24 + $0x20] sm:$0xff] }
 0x134   : > { %2521 = vperm.xlu2 %6750, %v2235_v19   ;;  %2516 = vperm.xlu1 %6749, %v2234_v20   ;;  %v6485_v19 = vld [vmem:[%s9544_s24 + $0x28] sm:$0xff]  ;;  %v6491_v20 = vld [vmem:[%s9545_s5 + $0x18] sm:$0xff] }
 0x135   : > { %2441 = vperm.xlu0 %6748, %v2219_v21   ;;  %v6486_v21 = vld [vmem:[%s9544_s24 + $0x30] sm:$0xff]  ;;  %1444 = vmatpush.bf16.msra.mxu1 %v6491_v20 }
 0x13c   : > { %2506 = vperm.xlu2 %6750, %v2232_v22   ;;  %2431 = vperm.xlu1 %6749, %v2217_v23   ;;  %v1081_v28 = vpop.f32.mrf.mxu2  ;;  %v6490_v22 = vld [vmem:[%s9545_s5 + $0x10] sm:$0xff]  ;;  %v6489_v23 = vld [vmem:[%s9545_s5 + $0x8] sm:$0xff] }
 0x13d   : > { %2426 = vperm.xlu0 %6748, %v2216_v25   ;;  %1445 = vmatpush.bf16.msra.mxu1 %v6490_v22  ;;  %v6488_v25 = vld [vmem:[%s9545_s5] sm:$0xff]  ;;  %s730_s5 = scalar_lea.vmem %s9487_s22, %s6451_s0 }
 0x141   : > { %1446 = vmatpush.bf16.msra.mxu1 %v6489_v23 }
 0x144   : > { %2421 = vperm.xlu2 %6750, %v2215_v26   ;;  %2416 = vperm.xlu1 %6749, %v2214_v29   ;;  %v1083_v35 = vpop.f32.mrf.mxu2  ;;  %v6487_v26 = vld [vmem:[%s9544_s24 + $0x38] sm:$0xff]  ;;  %v1169_v29 = vpop.permute.xlu2 %1168 }
 0x145   : > { %2511 = vperm.xlu0 %6748, %v2233_v30   ;;  %1447 = vmatpush.bf16.msra.mxu1 %v6488_v25 }
 0x14c   : > { %2406 = vperm.xlu2 %6750, %v2212_v31   ;;  %2501 = vperm.xlu1 %6749, %v2231_v32   ;;  %v1086_v41 = vpop.f32.mrf.mxu2  ;;  %v1174_v31 = vpop.permute.xlu0 %1173 }
 0x14d   : > { %2496 = vperm.xlu0 %6748, %v2230_v33  }
 0x14e   : > { %v1110_v36 = vpop.f32.mrf.mxu3 }
 0x14f   : > { %v1111_v37 = vadd.f32 %v1110_v36, %v1081_v28 }
 0x154   : > { %2491 = vperm.xlu2 %6750, %v2229_v38   ;;  %2486 = vperm.xlu1 %6749, %v2228_v39   ;;  %v1088_v47 = vpop.f32.mrf.mxu2  ;;  %v1179_v39 = vpop.permute.xlu1 %1178 }
 0x155   : > { %2411 = vperm.xlu0 %6748, %v2213_v40  }
 0x156   : > { %v1112_v42 = vpop.f32.mrf.mxu3 }
 0x157   : > { %v1113_v11 = vadd.f32 %v1112_v42, %v1083_v35 }
 0x159   : > { %v1130_v13 = vpack.c.bf16 %v1113_v11, %v1111_v37 }
 0x15c   : > { %3627 = vperm.xlu2 %6750, %v3601_v43   ;;  %3642 = vperm.xlu1 %6749, %v3604_v44   ;;  %v1091_v54 = vpop.f32.mrf.mxu2 }
 0x15d   : > { %3637 = vperm.xlu0 %6748, %v3603_v34  }
 0x15e   : > { %v1115_v49 = vpop.f32.mrf.mxu3 }
 0x15f   : > { %v1116_v10 = vadd.f32 %v1115_v49, %v1086_v41  ;;  %v1184_v41 = vpop.permute.xlu2 %1183 }
 0x164   : > { %3622 = vperm.xlu2 %6750, %v3600_v50   ;;  %3617 = vperm.xlu1 %6749, %v3599_v51   ;;  %v1093_v58 = vpop.f32.mrf.mxu2  ;;  %v1189_v50 = vpop.permute.xlu0 %1188 }
 0x165   : > { %3632 = vperm.xlu0 %6748, %v3602_v52   ;;  %v1194_v52 = vpop.permute.xlu1 %1193 }
 0x166   : > { %v1117_v53 = vpop.f32.mrf.mxu3 }
 0x167   : > { %v1118_v8 = vadd.f32 %v1117_v53, %v1088_v47 }
 0x169   : > { %v1131_v12 = vpack.c.bf16 %v1118_v8, %v1116_v10 }
 0x16c   : > { %3612 = vperm.xlu1 %6749, %v3598_v55   ;;  %v1096_v60 = vpop.f32.mrf.mxu2 }
 0x16d   : > { %3607 = vperm.xlu0 %6748, %v3597_v56  }
 0x16e   : > { %v1120_v57 = vpop.f32.mrf.mxu3 }
 0x16f   : > { %v1121_v7 = vadd.f32 %v1120_v57, %v1091_v54 }
 0x174   : > { %v1098_v63 = vpop.f32.mrf.mxu2 }
 0x176   : > { %v1122_v59 = vpop.f32.mrf.mxu3 }
 0x177   : > { %v1123_v4 = vadd.f32 %v1122_v59, %v1093_v58  ;;  %v1199_v59 = vpop.permute.xlu2 %1198 }
 0x179   : > { %v1132_v9 = vpack.c.bf16 %v1123_v4, %v1121_v7  ;;  %v1209_v7 = vpop.permute.xlu1 %1208 }
 0x17e   : > { %v1125_v62 = vpop.f32.mrf.mxu3 }
 0x17f   : > { %v1126_v1 = vadd.f32 %v1125_v62, %v1096_v60  ;;  %v1204_v62 = vpop.permute.xlu0 %1203 }
 0x186   : > { %v1127_v0 = vpop.f32.mrf.mxu3 }
 0x187   : > { %v1128_v3 = vadd.f32 %v1127_v0, %v1098_v63 }
 0x189   : > { %v1133_v5 = vpack.c.bf16 %v1128_v3, %v1126_v1 }
 0x18b   : > { %1315 = vmatpush.bf16.msrb.mxu0 %v1133_v5 }
 0x18f   : > { %1316 = vmatpush.bf16.msrb.mxu0 %v1132_v9  ;;  %v1214_v9 = vpop.permute.xlu2 %1213 }
 0x193   : > { %1317 = vmatpush.bf16.msrb.mxu0 %v1131_v12 }
 0x197   : > { %1318 = vmatpush.bf16.msrb.mxu0 %v1130_v13 }
 0x19a   : > { %5410 = vmatmul.msk.bf16.vlgmr.msrb.gmra.mxu0 %vm1286_vm1, %v6480_v14 }
 0x1aa   : > { %5411 = vmatmul.msk.bf16.gmra.mxu0 %vm1286_vm1, %v6481_v15 }
 0x1ba   : > { %5412 = vmatmul.msk.bf16.gmra.mxu0 %vm1286_vm1, %v6482_v16  ;;  %v1219_v16 = vpop.permute.xlu0 %1218 }
 0x1ca   : > { %5413 = vmatmul.msk.bf16.gmra.mxu0 %vm1286_vm1, %v6483_v17 }
 0x1da   : > { %5414 = vmatmul.msk.bf16.gmra.mxu0 %vm1286_vm1, %v6484_v18  ;;  %v1224_v18 = vpop.permute.xlu1 %1223 }
 0x1ea   : > { %5415 = vmatmul.msk.bf16.gmra.mxu0 %vm1286_vm1, %v6485_v19 }
 0x1fa   : > { %5416 = vmatmul.msk.bf16.gmra.mxu0 %vm1286_vm1, %v6486_v21 }
 0x20a   : > { %5417 = vmatmul.msk.bf16.gmra.mxu0 %vm1286_vm1, %v6487_v26  ;;  %v1229_v26 = vpop.permute.xlu2 %1228 }
 0x217   : > { %v1320_v28 = vpop.f32.mrf.mxu0 }
 0x218   : > { %v1321_v30 = vadd.f32 %v1320_v28, %v1169_v29  ;;  %v1234_v29 = vpop.permute.xlu0 %1233 }
 0x21a   : > { %v1360_v35 = vmax.f32 %v1321_v30, 0.0 }
 0x21f   : > { %v1322_v32 = vpop.f32.mrf.mxu0 }
 0x220   : > { %v1323_v33 = vadd.f32 %v1322_v32, %v1174_v31 }
 0x222   : > { %v1361_v36 = vmax.f32 %v1323_v33, 0.0 }
 0x224   : > { %v1376_v37 = vpack.c.bf16 %v1361_v36, %v1360_v35 }
 0x226   : > { %5434 = vmatmul.msk.bf16.vlgmr.msra.gmra.mxu1 %vm1286_vm1, %v1376_v37  ;;  %v1239_v37 = vpop.permute.xlu1 %1238 }
 0x227   : > { %v1325_v38 = vpop.f32.mrf.mxu0 }
 0x228   : > { %v1326_v40 = vadd.f32 %v1325_v38, %v1179_v39  ;;  %v1244_v39 = vpop.permute.xlu2 %1243 }
 0x22a   : > { %v1362_v44 = vmax.f32 %v1326_v40, 0.0 }
 0x22f   : > { %v1327_v42 = vpop.f32.mrf.mxu0 }
 0x230   : > { %v1328_v43 = vadd.f32 %v1327_v42, %v1184_v41 }
 0x232   : > { %v1363_v34 = vmax.f32 %v1328_v43, 0.0 }
 0x234   : > { %v1377_v47 = vpack.c.bf16 %v1363_v34, %v1362_v44 }
 0x236   : > { %5435 = vmatmul.msk.bf16.gmra.mxu1 %vm1286_vm1, %v1377_v47 }
 0x237   : > { %v1330_v49 = vpop.f32.mrf.mxu0 }
 0x238   : > { %v1331_v51 = vadd.f32 %v1330_v49, %v1189_v50 }
 0x23a   : > { %v1364_v55 = vmax.f32 %v1331_v51, 0.0 }
 0x23f   : > { %v1332_v53 = vpop.f32.mrf.mxu0 }
 0x240   : > { %v1333_v54 = vadd.f32 %v1332_v53, %v1194_v52 }
 0x242   : > { %v1365_v56 = vmax.f32 %v1333_v54, 0.0 }
 0x244   : > { %v1378_v57 = vpack.c.bf16 %v1365_v56, %v1364_v55 }
 0x246   : > { %5436 = vmatmul.msk.bf16.gmra.mxu1 %vm1286_vm1, %v1378_v57 }
 0x247   : > { %v1335_v58 = vpop.f32.mrf.mxu0 }
 0x248   : > { %v1336_v60 = vadd.f32 %v1335_v58, %v1199_v59 }
 0x24a   : > { %v1366_v1 = vmax.f32 %v1336_v60, 0.0 }
 0x24f   : > { %v1337_v63 = vpop.f32.mrf.mxu0 }
 0x250   : > { %v1338_v0 = vadd.f32 %v1337_v63, %v1204_v62 }
 0x252   : > { %v1367_v3 = vmax.f32 %v1338_v0, 0.0 }
 0x254   : > { %v1379_v4 = vpack.c.bf16 %v1367_v3, %v1366_v1 }
 0x256   : > { %5437 = vmatmul.msk.bf16.gmra.mxu1 %vm1286_vm1, %v1379_v4 }
 0x257   : > { %v1340_v5 = vpop.f32.mrf.mxu0 }
 0x258   : > { %v1341_v8 = vadd.f32 %v1340_v5, %v1209_v7 }
 0x25a   : > { %v1368_v12 = vmax.f32 %v1341_v8, 0.0 }
 0x25f   : > { %v1342_v10 = vpop.f32.mrf.mxu0 }
 0x260   : > { %v1343_v11 = vadd.f32 %v1342_v10, %v1214_v9  ;;  %v6492_v10 = vld [vmem:[%s9546_s3] sm:$0xff] }
 0x262   : > { %v1369_v13 = vmax.f32 %v1343_v11, 0.0  ;;  %v6493_v11 = vld [vmem:[%s9546_s3 + $0x8] sm:$0xff] }
 0x264   : > { %v1380_v14 = vpack.c.bf16 %v1369_v13, %v1368_v12  ;;  %v6494_v12 = vld [vmem:[%s9546_s3 + $0x10] sm:$0xff]  ;;  %v6495_v13 = vld [vmem:[%s9546_s3 + $0x18] sm:$0xff] }
 0x266   : > { %5438 = vmatmul.msk.bf16.gmra.mxu1 %vm1286_vm1, %v1380_v14  ;;  %v6496_v14 = vld [vmem:[%s9546_s3 + $0x20] sm:$0xff] }
 0x267   : > { %v1345_v15 = vpop.f32.mrf.mxu0 }
 0x268   : > { %v1346_v17 = vadd.f32 %v1345_v15, %v1219_v16  ;;  %v6497_v15 = vld [vmem:[%s9546_s3 + $0x28] sm:$0xff]  ;;  %v6498_v16 = vld [vmem:[%s9546_s3 + $0x30] sm:$0xff] }
 0x26a   : > { %v1370_v21 = vmax.f32 %v1346_v17, 0.0  ;;  %v6499_v17 = vld [vmem:[%s9546_s3 + $0x38] sm:$0xff] }
 0x26f   : > { %v1347_v19 = vpop.f32.mrf.mxu0 }
 0x270   : > { %v1348_v20 = vadd.f32 %v1347_v19, %v1224_v18  ;;  %v6508_v18 = vld [vmem:[%s9547_s9] sm:$0xff] }
 0x271   : > { %2018 = vmatpush.bf16.msrb.mxu3 %v6508_v18  ;;  %v6500_v19 = vld [vmem:[%s9546_s3 + $0x40] sm:$0xff] }
 0x272   : > { %v1371_v22 = vmax.f32 %v1348_v20, 0.0 }
 0x274   : > { %v1381_v23 = vpack.c.bf16 %v1371_v22, %v1370_v21  ;;  %v1564_v21 = vpop.permute.xlu0 %1563 }
 0x276   : > { %5439 = vmatmul.msk.bf16.gmra.mxu1 %vm1286_vm1, %v1381_v23  ;;  %v1569_v23 = vpop.permute.xlu1 %1568 }
 0x277   : > { %v1350_v25 = vpop.f32.mrf.mxu0 }
 0x278   : > { %v1351_v28 = vadd.f32 %v1350_v25, %v1229_v26 }
 0x27a   : > { %v1372_v32 = vmax.f32 %v1351_v28, 0.0  ;;  %v6501_v28 = vld [vmem:[%s9546_s3 + $0x48] sm:$0xff] }
 0x27f   : > { %v1352_v30 = vpop.f32.mrf.mxu0 }
 0x280   : > { %v1353_v31 = vadd.f32 %v1352_v30, %v1234_v29 }
 0x282   : > { %v1373_v33 = vmax.f32 %v1353_v31, 0.0 }
 0x284   : > { %v1382_v35 = vpack.c.bf16 %v1373_v33, %v1372_v32  ;;  %v1574_v33 = vpop.permute.xlu2 %1573 }
 0x286   : > { %5440 = vmatmul.msk.bf16.gmra.mxu1 %vm1286_vm1, %v1382_v35 }
 0x287   : > { %v1355_v36 = vpop.f32.mrf.mxu0 }
 0x288   : > { %v1356_v38 = vadd.f32 %v1355_v36, %v1239_v37  ;;  %v1579_v36 = vpop.permute.xlu0 %1578 }
 0x28a   : > { %v1374_v42 = vmax.f32 %v1356_v38, 0.0 }
 0x28f   : > { %v1357_v40 = vpop.f32.mrf.mxu0 }
 0x290   : > { %v1358_v41 = vadd.f32 %v1357_v40, %v1244_v39  ;;  %v6502_v39 = vld [vmem:[%s9546_s3 + $0x50] sm:$0xff] }
 0x292   : > { %v1375_v43 = vmax.f32 %v1358_v41, 0.0 }
 0x294   : > { %v1383_v44 = vpack.c.bf16 %v1375_v43, %v1374_v42 }
 0x296   : > { %5441 = vmatmul.msk.bf16.gmra.mxu1 %vm1286_vm1, %v1383_v44  ;;  %v1584_v44 = vpop.permute.xlu1 %1583 }
 0x2a3   : > { %v1449_v34 = vpop.f32.mrf.mxu1 }
 0x2ab   : > { %v1451_v47 = vpop.f32.mrf.mxu1 }
 0x2ac   : > { %v1489_v9 = vpack.c.bf16 %v1451_v47, %v1449_v34  ;;  %v1589_v47 = vpop.permute.xlu2 %1588 }
 0x2b3   : > { %v1454_v49 = vpop.f32.mrf.mxu1 }
 0x2bb   : > { %v1456_v50 = vpop.f32.mrf.mxu1 }
 0x2bc   : > { %v1490_v8 = vpack.c.bf16 %v1456_v50, %v1454_v49 }
 0x2c3   : > { %v1459_v51 = vpop.f32.mrf.mxu1 }
 0x2cb   : > { %v1461_v52 = vpop.f32.mrf.mxu1 }
 0x2cc   : > { %v1491_v7 = vpack.c.bf16 %v1461_v52, %v1459_v51  ;;  %v6503_v51 = vld [vmem:[%s9546_s3 + $0x58] sm:$0xff] }
 0x2d3   : > { %v1464_v53 = vpop.f32.mrf.mxu1 }
 0x2db   : > { %v1466_v54 = vpop.f32.mrf.mxu1 }
 0x2dc   : > { %v1492_v5 = vpack.c.bf16 %v1466_v54, %v1464_v53 }
 0x2e3   : > { %v1469_v55 = vpop.f32.mrf.mxu1 }
 0x2eb   : > { %v1471_v56 = vpop.f32.mrf.mxu1 }
 0x2ec   : > { %v1493_v4 = vpack.c.bf16 %v1471_v56, %v1469_v55  ;;  %v1594_v56 = vpop.permute.xlu0 %1593 }
 0x2f3   : > { %v1474_v57 = vpop.f32.mrf.mxu1 }
 0x2fb   : > { %v1476_v58 = vpop.f32.mrf.mxu1 }
 0x2fc   : > { %v1494_v3 = vpack.c.bf16 %v1476_v58, %v1474_v57  ;;  %v1599_v58 = vpop.permute.xlu1 %1598 }
 0x303   : > { %v1479_v59 = vpop.f32.mrf.mxu1 }
 0x30b   : > { %v1481_v60 = vpop.f32.mrf.mxu1 }
 0x30c   : > { %v1495_v1 = vpack.c.bf16 %v1481_v60, %v1479_v59 }
 0x313   : > { %v1484_v62 = vpop.f32.mrf.mxu1 }
 0x31b   : > { %v1486_v63 = vpop.f32.mrf.mxu1 }
 0x31c   : > { %v1496_v0 = vpack.c.bf16 %v1486_v63, %v1484_v62  ;;  %v6504_v62 = vld [vmem:[%s9546_s3 + $0x60] sm:$0xff] }
 0x31e   : > { %1817 = vmatpush.bf16.msrb.mxu2 %v1496_v0 }
 0x322   : > { %1818 = vmatpush.bf16.msrb.mxu2 %v1495_v1 }
 0x326   : > { %1819 = vmatpush.bf16.msrb.mxu2 %v1494_v3 }
 0x32a   : > { %1820 = vmatpush.bf16.msrb.mxu2 %v1493_v4  ;;  %v1604_v4 = vpop.permute.xlu2 %1603 }
 0x32e   : > { %1821 = vmatpush.bf16.msrb.mxu2 %v1492_v5 }
 0x332   : > { %1822 = vmatpush.bf16.msrb.mxu2 %v1491_v7  ;;  %v1609_v7 = vpop.permute.xlu0 %1608 }
 0x336   : > { %1823 = vmatpush.bf16.msrb.mxu2 %v1490_v8 }
 0x33a   : > { %1824 = vmatpush.bf16.msrb.mxu2 %v1489_v9 }
 0x33d   : > { %1825 = vmatmul.bf16.vlgmr.msrb.gmra.mxu2 %v6492_v10  ;;  %v6505_v10 = vld [vmem:[%s9546_s3 + $0x68] sm:$0xff] }
 0x34d   : > { %1830 = vmatmul.bf16.gmra.mxu2 %v6493_v11 }
 0x35d   : > { %1835 = vmatmul.bf16.gmra.mxu2 %v6494_v12 }
 0x36d   : > { %1840 = vmatmul.bf16.gmra.mxu2 %v6495_v13 }
 0x37d   : > { %1845 = vmatmul.bf16.gmra.mxu2 %v6496_v14 }
 0x38d   : > { %1850 = vmatmul.bf16.gmra.mxu2 %v6497_v15  ;;  %v1614_v15 = vpop.permute.xlu1 %1613 }
 0x39d   : > { %1855 = vmatmul.bf16.gmra.mxu2 %v6498_v16 }
 0x3ad   : > { %1860 = vmatmul.bf16.gmra.mxu2 %v6499_v17  ;;  %v1619_v17 = vpop.permute.xlu2 %1618 }
 0x3bd   : > { %1865 = vmatmul.bf16.gmra.mxu2 %v6500_v19 }
 0x3c0   : > { %v1826_v20 = vpop.f32.mrf.mxu2 }
 0x3c1   : > { %v1827_v22 = vadd.f32 %v1826_v20, %v1564_v21  ;;  %v6506_v20 = vld [vmem:[%s9546_s3 + $0x70] sm:$0xff] }
 0x3c3   : > { %v1906_v29 = vmax.f32 %v1827_v22, 0.0 }
 0x3c8   : > { %v1828_v25 = vpop.f32.mrf.mxu2 }
 0x3c9   : > { %v1829_v26 = vadd.f32 %v1828_v25, %v1569_v23 }
 0x3cb   : > { %v1907_v30 = vmax.f32 %v1829_v26, 0.0  ;;  %v1624_v26 = vpop.permute.xlu0 %1623 }
 0x3cd   : > { %v7480_v31 = vpack.c.bf16 %v1907_v30, %v1906_v29  ;;  %1870 = vmatmul.bf16.gmra.mxu2 %v6501_v28  ;;  %v1629_v29 = vpop.permute.xlu1 %1628 }
 0x3cf   : > { %9548 = vst [vmem:[#allocation10_spill] sm:$0xff] %v7480_v31  ;;  %5510 = vmatmul.msk.bf16.vlgmr.msrb.gmra.mxu3 %vm1962_vm2, %v7480_v31 }
 0x3d0   : > { %v1831_v32 = vpop.f32.mrf.mxu2 }
 0x3d1   : > { %v1832_v35 = vadd.f32 %v1831_v32, %v1574_v33  ;;  %v6507_v33 = vld [vmem:[%s9546_s3 + $0x78] sm:$0xff] }
 0x3d3   : > { %v1908_v40 = vmax.f32 %v1832_v35, 0.0 }
 0x3d8   : > { %v1833_v37 = vpop.f32.mrf.mxu2 }
 0x3d9   : > { %v1834_v38 = vadd.f32 %v1833_v37, %v1579_v36 }
 0x3db   : > { %v1909_v41 = vmax.f32 %v1834_v38, 0.0 }
 0x3dd   : > { %1875 = vmatmul.bf16.gmra.mxu2 %v6502_v39  ;;  %v7487_v42 = vpack.c.bf16 %v1909_v41, %v1908_v40  ;;  %v1634_v39 = vpop.permute.xlu2 %1633  ;;  %v1639_v41 = vpop.permute.xlu0 %1638 }
 0x3df   : > { %9549 = vst [vmem:[#allocation11_spill] sm:$0xff] %v7487_v42  ;;  %5511 = vmatmul.msk.bf16.gmra.mxu3 %vm1962_vm2, %v7487_v42 }
 0x3e0   : > { %v1836_v43 = vpop.f32.mrf.mxu2 }
 0x3e1   : > { %v1837_v34 = vadd.f32 %v1836_v43, %v1584_v44 }
 0x3e3   : > { %v1910_v52 = vmax.f32 %v1837_v34, 0.0 }
 0x3e8   : > { %v1838_v49 = vpop.f32.mrf.mxu2 }
 0x3e9   : > { %v1839_v50 = vadd.f32 %v1838_v49, %v1589_v47 }
 0x3eb   : > { %v1911_v53 = vmax.f32 %v1839_v50, 0.0 }
 0x3ed   : > { %1880 = vmatmul.bf16.gmra.mxu2 %v6503_v51  ;;  %v7494_v54 = vpack.c.bf16 %v1911_v53, %v1910_v52  ;;  %v1644_v51 = vpop.permute.xlu1 %1643  ;;  %v1649_v53 = vpop.permute.xlu2 %1648 }
 0x3ef   : > { %9550 = vst [vmem:[#allocation12_spill] sm:$0xff] %v7494_v54  ;;  %5512 = vmatmul.msk.bf16.gmra.mxu3 %vm1962_vm2, %v7494_v54 }
 0x3f0   : > { %v1841_v55 = vpop.f32.mrf.mxu2 }
 0x3f1   : > { %v1842_v57 = vadd.f32 %v1841_v55, %v1594_v56 }
 0x3f3   : > { %v1912_v63 = vmax.f32 %v1842_v57, 0.0 }
 0x3f8   : > { %v1843_v59 = vpop.f32.mrf.mxu2 }
 0x3f9   : > { %v1844_v60 = vadd.f32 %v1843_v59, %v1599_v58 }
 0x3fb   : > { %v1913_v0 = vmax.f32 %v1844_v60, 0.0 }
 0x3fd   : > { %1885 = vmatmul.bf16.gmra.mxu2 %v6504_v62  ;;  %v7501_v1 = vpack.c.bf16 %v1913_v0, %v1912_v63  ;;  %v1654_v63 = vpop.permute.xlu0 %1653 }
 0x3ff   : > { %9551 = vst [vmem:[#allocation13_spill] sm:$0xff] %v7501_v1  ;;  %5513 = vmatmul.msk.bf16.gmra.mxu3 %vm1962_vm2, %v7501_v1 }
 0x400   : > { %v1846_v3 = vpop.f32.mrf.mxu2 }
 0x401   : > { %v1847_v5 = vadd.f32 %v1846_v3, %v1604_v4  ;;  %v1659_v3 = vpop.permute.xlu1 %1658 }
 0x403   : > { %v1914_v11 = vmax.f32 %v1847_v5, 0.0 }
 0x408   : > { %v1848_v8 = vpop.f32.mrf.mxu2 }
 0x409   : > { %v1849_v9 = vadd.f32 %v1848_v8, %v1609_v7 }
 0x40b   : > { %v1915_v12 = vmax.f32 %v1849_v9, 0.0 }
 0x40d   : > { %1890 = vmatmul.bf16.gmra.mxu2 %v6505_v10  ;;  %v7508_v13 = vpack.c.bf16 %v1915_v12, %v1914_v11 }
 0x40f   : > { %9552 = vst [vmem:[#allocation14_spill] sm:$0xff] %v7508_v13  ;;  %5514 = vmatmul.msk.bf16.gmra.mxu3 %vm1962_vm2, %v7508_v13 }
 0x410   : > { %v1851_v14 = vpop.f32.mrf.mxu2 }
 0x411   : > { %v1852_v16 = vadd.f32 %v1851_v14, %v1614_v15  ;;  %v1664_v15 = vpop.permute.xlu2 %1663 }
 0x413   : > { %v1916_v21 = vmax.f32 %v1852_v16, 0.0 }
 0x418   : > { %v1853_v18 = vpop.f32.mrf.mxu2 }
 0x419   : > { %v1854_v19 = vadd.f32 %v1853_v18, %v1619_v17  ;;  %v1669_v17 = vpop.permute.xlu0 %1668 }
 0x41b   : > { %v1917_v22 = vmax.f32 %v1854_v19, 0.0 }
 0x41d   : > { %1895 = vmatmul.bf16.gmra.mxu2 %v6506_v20  ;;  %v7515_v23 = vpack.c.bf16 %v1917_v22, %v1916_v21 }
 0x41f   : > { %9553 = vst [vmem:[#allocation15_spill] sm:$0xff] %v7515_v23  ;;  %5515 = vmatmul.msk.bf16.gmra.mxu3 %vm1962_vm2, %v7515_v23 }
 0x420   : > { %v1856_v25 = vpop.f32.mrf.mxu2 }
 0x421   : > { %v1857_v28 = vadd.f32 %v1856_v25, %v1624_v26 }
 0x423   : > { %v1918_v35 = vmax.f32 %v1857_v28, 0.0 }
 0x428   : > { %v1858_v30 = vpop.f32.mrf.mxu2 }
 0x429   : > { %v1859_v32 = vadd.f32 %v1858_v30, %v1629_v29  ;;  %v1674_v30 = vpop.permute.xlu1 %1673 }
 0x42b   : > { %v1919_v36 = vmax.f32 %v1859_v32, 0.0 }
 0x42d   : > { %1900 = vmatmul.bf16.gmra.mxu2 %v6507_v33  ;;  %v7522_v37 = vpack.c.bf16 %v1919_v36, %v1918_v35  ;;  %v1679_v33 = vpop.permute.xlu2 %1678 }
 0x42f   : > { %9554 = vst [vmem:[#allocation16_spill] sm:$0xff] %v7522_v37  ;;  %5516 = vmatmul.msk.bf16.gmra.mxu3 %vm1962_vm2, %v7522_v37 }
 0x430   : > { %v1861_v38 = vpop.f32.mrf.mxu2 }
 0x431   : > { %v1862_v40 = vadd.f32 %v1861_v38, %v1634_v39 }
 0x433   : > { %v1920_v34 = vmax.f32 %v1862_v40, 0.0 }
 0x438   : > { %v1863_v43 = vpop.f32.mrf.mxu2 }
 0x439   : > { %v1864_v44 = vadd.f32 %v1863_v43, %v1639_v41 }
 0x43b   : > { %v1921_v47 = vmax.f32 %v1864_v44, 0.0 }
 0x43d   : > { %v7526_v49 = vpack.c.bf16 %v1921_v47, %v1920_v34  ;;  %v1684_v47 = vpop.permute.xlu0 %1683 }
 0x43f   : > { %9555 = vst [vmem:[#allocation17_spill] sm:$0xff] %v7526_v49  ;;  %5517 = vmatmul.msk.bf16.gmra.mxu3 %vm1962_vm2, %v7526_v49 }
 0x440   : > { %v1866_v50 = vpop.f32.mrf.mxu2 }
 0x441   : > { %v1867_v52 = vadd.f32 %v1866_v50, %v1644_v51  ;;  %v1689_v51 = vpop.permute.xlu1 %1688 }
 0x443   : > { %v1922_v57 = vmax.f32 %v1867_v52, 0.0 }
 0x448   : > { %v1868_v55 = vpop.f32.mrf.mxu2 }
 0x449   : > { %v1869_v56 = vadd.f32 %v1868_v55, %v1649_v53 }
 0x44b   : > { %v1923_v58 = vmax.f32 %v1869_v56, 0.0 }
 0x44d   : > { %v7530_v59 = vpack.c.bf16 %v1923_v58, %v1922_v57 }
 0x44f   : > { %9556 = vst [vmem:[#allocation18_spill] sm:$0xff] %v7530_v59  ;;  %5518 = vmatmul.msk.bf16.gmra.mxu3 %vm1962_vm2, %v7530_v59 }
 0x450   : > { %v1871_v60 = vpop.f32.mrf.mxu2 }
 0x451   : > { %v1872_v0 = vadd.f32 %v1871_v60, %v1654_v63 }
 0x452   : > { %v7534_v62 = vpop.f32.mrf.mxu3 }
 0x453   : > { %v1924_v8 = vmax.f32 %v1872_v0, 0.0 }
 0x458   : > { %v1873_v4 = vpop.f32.mrf.mxu2 }
 0x459   : > { %v1874_v5 = vadd.f32 %v1873_v4, %v1659_v3  ;;  %v1694_v3 = vpop.permute.xlu2 %1693 }
 0x45a   : > { %v7536_v7 = vpop.f32.mrf.mxu3 }
 0x45b   : > { %v1925_v9 = vmax.f32 %v1874_v5, 0.0  ;;  %v2100_v10 = vpack.c.bf16 %v7536_v7, %v7534_v62  ;;  %v1699_v5 = vpop.permute.xlu0 %1698  ;;  %v5544_v62 = vld [vmem:[%s9475_s10 + $0x20] sm:$0xf]  ;;  %v6514_v7 = vld [vmem:[%s9475_s10 + $0x24] sm:$0xf0] }
 0x45d   : > { %v7540_v11 = vpack.c.bf16 %v1925_v9, %v1924_v8 }
 0x45f   : > { %9557 = vst [vmem:[#allocation19_spill] sm:$0xff] %v7540_v11  ;;  %5519 = vmatmul.msk.bf16.gmra.mxu3 %vm1962_vm2, %v7540_v11 }
 0x460   : > { %v1876_v12 = vpop.f32.mrf.mxu2 }
 0x461   : > { %v1877_v16 = vadd.f32 %v1876_v12, %v1664_v15 }
 0x462   : > { %v7544_v14 = vpop.f32.mrf.mxu3 }
 0x463   : > { %v1926_v21 = vmax.f32 %v1877_v16, 0.0 }
 0x468   : > { %v1878_v18 = vpop.f32.mrf.mxu2 }
 0x469   : > { %v1879_v19 = vadd.f32 %v1878_v18, %v1669_v17 }
 0x46a   : > { %v7546_v20 = vpop.f32.mrf.mxu3 }
 0x46b   : > { %v1927_v22 = vmax.f32 %v1879_v19, 0.0  ;;  %v2101_v25 = vpack.c.bf16 %v7546_v20, %v7544_v14  ;;  %v5536_v14 = vld [vmem:[%s9475_s10 + $0x10] sm:$0xf]  ;;  %v6512_v20 = vld [vmem:[%s9475_s10 + $0x14] sm:$0xf0] }
 0x46d   : > { %v7550_v26 = vpack.c.bf16 %v1927_v22, %v1926_v21  ;;  %v1704_v21 = vpop.permute.xlu1 %1703 }
 0x46f   : > { %9558 = vst [vmem:[#allocation20_spill] sm:$0xff] %v7550_v26  ;;  %5520 = vmatmul.msk.bf16.gmra.mxu3 %vm1962_vm2, %v7550_v26 }
 0x470   : > { %v1881_v28 = vpop.f32.mrf.mxu2 }
 0x471   : > { %v1882_v32 = vadd.f32 %v1881_v28, %v1674_v30  ;;  %v1709_v28 = vpop.permute.xlu2 %1708 }
 0x472   : > { %v7554_v29 = vpop.f32.mrf.mxu3 }
 0x473   : > { %v1928_v39 = vmax.f32 %v1882_v32, 0.0 }
 0x478   : > { %v1883_v35 = vpop.f32.mrf.mxu2 }
 0x479   : > { %v1884_v36 = vadd.f32 %v1883_v35, %v1679_v33 }
 0x47a   : > { %v7556_v38 = vpop.f32.mrf.mxu3 }
 0x47b   : > { %v1929_v40 = vmax.f32 %v1884_v36, 0.0  ;;  %v2102_v41 = vpack.c.bf16 %v7556_v38, %v7554_v29 }
 0x47d   : > { %v7560_v43 = vpack.c.bf16 %v1929_v40, %v1928_v39 }
 0x47f   : > { %9559 = vst [vmem:[#allocation21_spill] sm:$0xff] %v7560_v43  ;;  %5521 = vmatmul.msk.bf16.gmra.mxu3 %vm1962_vm2, %v7560_v43 }
 0x480   : > { %v1886_v44 = vpop.f32.mrf.mxu2 }
 0x481   : > { %v1887_v50 = vadd.f32 %v1886_v44, %v1684_v47 }
 0x482   : > { %v2035_v34 = vpop.f32.mrf.mxu3 }
 0x483   : > { %v1930_v56 = vmax.f32 %v1887_v50, 0.0  ;;  %v1719_v50 = vpop.permute.xlu1 %1718 }
 0x488   : > { %v1888_v52 = vpop.f32.mrf.mxu2 }
 0x489   : > { %v1889_v53 = vadd.f32 %v1888_v52, %v1689_v51 }
 0x48a   : > { %v2037_v55 = vpop.f32.mrf.mxu3 }
 0x48b   : > { %v1931_v57 = vmax.f32 %v1889_v53, 0.0  ;;  %v2103_v58 = vpack.c.bf16 %v2037_v55, %v2035_v34  ;;  %v1714_v34 = vpop.permute.xlu0 %1713 }
 0x48d   : > { %v7564_v60 = vpack.c.bf16 %v1931_v57, %v1930_v56 }
 0x48f   : > { %5522 = vmatmul.msk.bf16.gmra.mxu3 %vm1962_vm2, %v7564_v60 }
 0x490   : > { %v1891_v63 = vpop.f32.mrf.mxu2 }
 0x491   : > { %v1892_v4 = vadd.f32 %v1891_v63, %v1694_v3 }
 0x492   : > { %v2040_v0 = vpop.f32.mrf.mxu3 }
 0x493   : > { %v1932_v15 = vmax.f32 %v1892_v4, 0.0 }
 0x498   : > { %v1893_v8 = vpop.f32.mrf.mxu2 }
 0x499   : > { %v1894_v9 = vadd.f32 %v1893_v8, %v1699_v5 }
 0x49a   : > { %v2042_v12 = vpop.f32.mrf.mxu3 }
 0x49b   : > { %v1933_v16 = vmax.f32 %v1894_v9, 0.0 }
 0x49d   : > { %v7568_v17 = vpack.c.bf16 %v1933_v16, %v1932_v15  ;;  %v2104_v15 = vpack.c.bf16 %v2042_v12, %v2040_v0  ;;  %v6510_v0 = vld [vmem:[%s9475_s10 + $0x4] sm:$0xf0] }
 0x49f   : > { %5523 = vmatmul.msk.bf16.gmra.mxu3 %vm1962_vm2, %v7568_v17 }
 0x4a0   : > { %v1896_v18 = vpop.f32.mrf.mxu2 }
 0x4a1   : > { %v1897_v22 = vadd.f32 %v1896_v18, %v1704_v21  ;;  %v5528_v21 = vld [vmem:[%s9475_s10] sm:$0xf] }
 0x4a2   : > { %v2045_v19 = vpop.f32.mrf.mxu3  ;;  %v5529_v12 = vor.u32 %v6510_v0, %v5528_v21  ;;  %v5584_v21 = vld [vmem:[%s9475_s10 + $0x70] sm:$0xf]  ;;  %v6524_v0 = vld [vmem:[%s9475_s10 + $0x74] sm:$0xf0] }
 0x4a3   : > { %v1934_v35 = vmax.f32 %v1897_v22, 0.0 }
 0x4a8   : > { %v1898_v30 = vpop.f32.mrf.mxu2 }
 0x4a9   : > { %v1899_v32 = vadd.f32 %v1898_v30, %v1709_v28  ;;  %v5552_v28 = vld [vmem:[%s9475_s10 + $0x30] sm:$0xf]  ;;  %v6516_v30 = vld [vmem:[%s9475_s10 + $0x34] sm:$0xf0] }
 0x4aa   : > { %v2047_v33 = vpop.f32.mrf.mxu3 }
 0x4ab   : > { %v1935_v36 = vmax.f32 %v1899_v32, 0.0  ;;  %v2105_v9 = vpack.c.bf16 %v2047_v33, %v2045_v19  ;;  %v5553_v32 = vor.u32 %v6516_v30, %v5552_v28  ;;  %v5600_v28 = vld [vmem:[%s9475_s10 + $0x90] sm:$0xf]  ;;  %v6528_v30 = vld [vmem:[%s9475_s10 + $0x94] sm:$0xf0] }
 0x4ad   : > { %v7572_v39 = vpack.c.bf16 %v1935_v36, %v1934_v35  ;;  %v5560_v36 = vld [vmem:[%s9475_s10 + $0x40] sm:$0xf] }
 0x4af   : > { %5524 = vmatmul.msk.bf16.gmra.mxu3 %vm1962_vm2, %v7572_v39 }
 0x4b0   : > { %v1901_v40 = vpop.f32.mrf.mxu2 }
 0x4b1   : > { %v1902_v47 = vadd.f32 %v1901_v40, %v1714_v34  ;;  %v6518_v40 = vld [vmem:[%s9475_s10 + $0x44] sm:$0xf0] }
 0x4b2   : > { %v2050_v44 = vpop.f32.mrf.mxu3 }
 0x4b3   : > { %v1936_v55 = vmax.f32 %v1902_v47, 0.0 }
 0x4b8   : > { %v1903_v51 = vpop.f32.mrf.mxu2 }
 0x4b9   : > { %v1904_v52 = vadd.f32 %v1903_v51, %v1719_v50  ;;  %v5568_v50 = vld [vmem:[%s9475_s10 + $0x50] sm:$0xf]  ;;  %v6520_v51 = vld [vmem:[%s9475_s10 + $0x54] sm:$0xf0] }
 0x4ba   : > { %v2052_v53 = vpop.f32.mrf.mxu3 }
 0x4bb   : > { %v1937_v56 = vmax.f32 %v1904_v52, 0.0  ;;  %v2106_v5 = vpack.c.bf16 %v2052_v53, %v2050_v44  ;;  %v5561_v44 = vor.u32 %v6518_v40, %v5560_v36  ;;  %v5569_v52 = vor.u32 %v6520_v51, %v5568_v50  ;;  %v5608_v40 = vld [vmem:[%s9475_s10 + $0xa0] sm:$0xf] }
 0x4bd   : > { %v7576_v57 = vpack.c.bf16 %v1937_v56, %v1936_v55  ;;  %v5576_v56 = vld [vmem:[%s9475_s10 + $0x60] sm:$0xf] }
 0x4bf   : > { %5525 = vmatmul.msk.bf16.gmra.mxu3 %vm1962_vm2, %v7576_v57 }
 0x4c2   : > { %v2055_v63 = vpop.f32.mrf.mxu3 }
 0x4ca   : > { %v2057_v3 = vpop.f32.mrf.mxu3 }
 0x4cb   : > { %v2107_v4 = vpack.c.bf16 %v2057_v3, %v2055_v63  ;;  %v6522_v63 = vld [vmem:[%s9475_s10 + $0x64] sm:$0xf0] }
 0x4cc   : > { %v5577_v3 = vor.u32 %v6522_v63, %v5576_v56  ;;  %v5616_v56 = vld [vmem:[%s9475_s10 + $0xb0] sm:$0xf]  ;;  %v7696_v63 = vpop.permute.xlu1 %2396 }
 0x4cd   : > { %2884 = vmatpush.bf16.msra.mxu0 %v2107_v4 }
 0x4d1   : > { %2885 = vmatpush.bf16.msra.mxu0 %v2106_v5 }
 0x4d2   : > { %v7580_v8 = vpop.f32.mrf.mxu3 }
 0x4d5   : > { %2886 = vmatpush.bf16.msra.mxu0 %v2105_v9 }
 0x4d9   : > { %2887 = vmatpush.bf16.msra.mxu0 %v2104_v15 }
 0x4da   : > { %v7582_v16 = vpop.f32.mrf.mxu3 }
 0x4dd   : > { %2888 = vmatpush.bf16.msra.mxu0 %v2103_v58 }
 0x4e1   : > { %2889 = vmatpush.bf16.msra.mxu0 %v2102_v41 }
 0x4e2   : > { %v2065_v18 = vpop.f32.mrf.mxu3 }
 0x4e5   : > { %2890 = vmatpush.bf16.msra.mxu0 %v2101_v25  ;;  %v5537_v25 = vor.u32 %v6512_v20, %v5536_v14  ;;  %v5585_v14 = vor.u32 %v6524_v0, %v5584_v21 }
 0x4e9   : > { %2891 = vmatpush.bf16.msra.mxu0 %v2100_v10  ;;  %v5545_v10 = vor.u32 %v6514_v7, %v5544_v62  ;;  %v5592_v7 = vld [vmem:[%s9475_s10 + $0x80] sm:$0xf] }
 0x4ea   : > { %v2067_v29 = vpop.f32.mrf.mxu3 }
 0x4eb   : > { %v2109_v62 = vpack.c.bf16 %v2067_v29, %v2065_v18  ;;  %v2108_v18 = vpack.c.bf16 %v7582_v16, %v7580_v8  ;;  %v6511_v8 = vld [vmem:[%s9475_s10 + $0x14] sm:$0xf]  ;;  %v5538_v16 = vld [vmem:[%s9475_s10 + $0x18] sm:$0xf0] }
 0x4ec   : > { %2892 = vmatmul.bf16.vlgmr.msra.gmra.mxu0 %v5529_v12 }
 0x4f2   : > { %v2070_v38 = vpop.f32.mrf.mxu3 }
 0x4fa   : > { %v2072_v41 = vpop.f32.mrf.mxu3 }
 0x4fc   : > { %2897 = vmatmul.bf16.gmra.mxu0 %v5537_v25  ;;  %v2110_v25 = vpack.c.bf16 %v2072_v41, %v2070_v38 }
 0x502   : > { %v2075_v58 = vpop.f32.mrf.mxu3 }
 0x50a   : > { %v2077_v19 = vpop.f32.mrf.mxu3 }
 0x50b   : > { %v2111_v20 = vpack.c.bf16 %v2077_v19, %v2075_v58  ;;  %v5530_v58 = vld [vmem:[%s9475_s10 + $0x8] sm:$0xf0] }
 0x50c   : > { %2902 = vmatmul.bf16.gmra.mxu0 %v5545_v10  ;;  %v6526_v10 = vld [vmem:[%s9475_s10 + $0x84] sm:$0xf0] }
 0x50d   : > { %v5593_v29 = vor.u32 %v6526_v10, %v5592_v7  ;;  %v6517_v7 = vld [vmem:[%s9475_s10 + $0x44] sm:$0xf]  ;;  %v5562_v10 = vld [vmem:[%s9475_s10 + $0x48] sm:$0xf0] }
 0x512   : > { %v2080_v22 = vpop.f32.mrf.mxu3 }
 0x51a   : > { %v2082_v33 = vpop.f32.mrf.mxu3 }
 0x51b   : > { %v2112_v12 = vpack.c.bf16 %v2082_v33, %v2080_v22  ;;  %v6509_v22 = vld [vmem:[%s9475_s10 + $0x4] sm:$0xf]  ;;  %v5541_v33 = vor.u32 %v6511_v8, %v5538_v16 }
 0x51c   : > { %2907 = vmatmul.bf16.gmra.mxu0 %v5553_v32  ;;  %v5533_v38 = vor.u32 %v6509_v22, %v5530_v58  ;;  %v5601_v32 = vor.u32 %v6528_v30, %v5600_v28  ;;  %v7729_v22 = vpop.permute.xlu2 %2316 }
 0x522   : > { %v2085_v35 = vpop.f32.mrf.mxu3 }
 0x524   : > { %v7737_v30 = vpop.permute.xlu2 %2401 }
 0x52a   : > { %v2087_v34 = vpop.f32.mrf.mxu3 }
 0x52b   : > { %v2113_v15 = vpack.c.bf16 %v2087_v34, %v2085_v35  ;;  %v6513_v34 = vld [vmem:[%s9475_s10 + $0x24] sm:$0xf] }
 0x52c   : > { %2912 = vmatmul.bf16.gmra.mxu0 %v5561_v44  ;;  %v6530_v44 = vld [vmem:[%s9475_s10 + $0xa4] sm:$0xf0] }
 0x52d   : > { %v5609_v50 = vor.u32 %v6530_v44, %v5608_v40  ;;  %v6536_v40 = vld [vmem:[%s9475_s10 + $0xd4] sm:$0xf0]  ;;  %v6519_v44 = vld [vmem:[%s9475_s10 + $0x54] sm:$0xf] }
 0x532   : > { %v2090_v47 = vpop.f32.mrf.mxu3 }
 0x53a   : > { %v2092_v53 = vpop.f32.mrf.mxu3 }
 0x53b   : > { %v2114_v9 = vpack.c.bf16 %v2092_v53, %v2090_v47  ;;  %v5546_v47 = vld [vmem:[%s9475_s10 + $0x28] sm:$0xf0]  ;;  %v7689_v53 = vpop.permute.xlu0 %2321 }
 0x53c   : > { %2917 = vmatmul.bf16.gmra.mxu0 %v5569_v52  ;;  %v5549_v51 = vor.u32 %v6513_v34, %v5546_v47  ;;  %v5570_v34 = vld [vmem:[%s9475_s10 + $0x58] sm:$0xf0] }
 0x542   : > { %v2095_v55 = vpop.f32.mrf.mxu3 }
 0x54a   : > { %v2097_v4 = vpop.f32.mrf.mxu3 }
 0x54b   : > { %v2115_v5 = vpack.c.bf16 %v2097_v4, %v2095_v55  ;;  %v6515_v4 = vld [vmem:[%s9475_s10 + $0x34] sm:$0xf] }
 0x54c   : > { %2922 = vmatmul.bf16.gmra.mxu0 %v5577_v3  ;;  %v6532_v3 = vld [vmem:[%s9475_s10 + $0xb4] sm:$0xf0] }
 0x54d   : > { %3053 = vmatpush.bf16.msrb.mxu1 %v2115_v5  ;;  %v5554_v5 = vld [vmem:[%s9475_s10 + $0x38] sm:$0xf0] }
 0x54e   : > { %v5557_v21 = vor.u32 %v6515_v4, %v5554_v5 }
 0x551   : > { %3054 = vmatpush.bf16.msrb.mxu1 %v2114_v9  ;;  %v7707_v9 = vpop.permute.xlu0 %2306 }
 0x555   : > { %3055 = vmatpush.bf16.msrb.mxu1 %v2113_v15  ;;  %v5617_v15 = vor.u32 %v6532_v3, %v5616_v56  ;;  %v7759_v56 = vpop.permute.xlu2 %2386 }
 0x559   : > { %3056 = vmatpush.bf16.msrb.mxu1 %v2112_v12  ;;  %v7711_v12 = vpop.permute.xlu1 %2311 }
 0x55c   : > { %2927 = vmatmul.bf16.gmra.mxu0 %v5585_v14  ;;  %v7713_v14 = vpop.permute.xlu0 %2391 }
 0x55d   : > { %3057 = vmatpush.bf16.msrb.mxu1 %v2111_v20 }
 0x561   : > { %3058 = vmatpush.bf16.msrb.mxu1 %v2110_v25  ;;  %v5624_v25 = vld [vmem:[%s9475_s10 + $0xc0] sm:$0xf] }
 0x564   : > { %v7735_v28 = vpop.permute.xlu0 %2376 }
 0x565   : > { %3059 = vmatpush.bf16.msrb.mxu1 %v2109_v62  ;;  %v6534_v62 = vld [vmem:[%s9475_s10 + $0xc4] sm:$0xf0] }
 0x566   : > { %v5625_v58 = vor.u32 %v6534_v62, %v5624_v25  ;;  %v6538_v25 = vld [vmem:[%s9475_s10 + $0xe4] sm:$0xf0]  ;;  %v6521_v62 = vld [vmem:[%s9475_s10 + $0x64] sm:$0xf] }
 0x569   : > { %v7655_v41 = vpop.f32.mrf.mxu0  ;;  %3060 = vmatpush.bf16.msrb.mxu1 %v2108_v18  ;;  %v5565_v18 = vor.u32 %v6517_v7, %v5562_v10  ;;  %v5578_v7 = vld [vmem:[%s9475_s10 + $0x68] sm:$0xf0] }
 0x56c   : > { %2932 = vmatmul.bf16.gmra.mxu0 %v5593_v29  ;;  %3061 = vmatmul.bf16.vlgmr.msrb.gmra.mxu1 %v5533_v38  ;;  %v7731_v29 = vpop.permute.xlu1 %2296 }
 0x571   : > { %v7657_v19 = vpop.f32.mrf.mxu0 }
 0x574   : > { %v7741_v16 = vpop.permute.xlu1 %2381 }
 0x579   : > { %v7671_v35 = vpop.f32.mrf.mxu0 }
 0x57c   : > { %2937 = vmatmul.bf16.gmra.mxu0 %v5601_v32  ;;  %3066 = vmatmul.bf16.gmra.mxu1 %v5541_v33  ;;  %v5632_v32 = vld [vmem:[%s9475_s10 + $0xd0] sm:$0xf]  ;;  %v7746_v33 = vpop.permute.xlu0 %2291  ;;  %v7761_v3 = vpop.permute.xlu1 %2366 }
 0x57d   : > { %v5633_v47 = vor.u32 %v6536_v40, %v5632_v32 }
 0x581   : > { %v7673_v36 = vpop.f32.mrf.mxu0 }
 0x584   : > { %v7763_v4 = vpop.permute.xlu0 %2276  ;;  %v7781_v10 = vpop.permute.xlu1 %2281 }
 0x589   : > { %v7687_v52 = vpop.f32.mrf.mxu0 }
 0x58c   : > { %2942 = vmatmul.bf16.gmra.mxu0 %v5609_v50  ;;  %3071 = vmatmul.bf16.gmra.mxu1 %v5549_v51  ;;  %v5573_v50 = vor.u32 %v6519_v44, %v5570_v34  ;;  %v7783_v32 = vpop.permute.xlu0 %2361  ;;  %v2267_v34 = vpop.permute.xlu1 %2266 }
 0x591   : > { %v7691_v55 = vpop.f32.mrf.mxu0 }
 0x594   : > { %v7807_v2 = vpop.permute.xlu1 %2351 }
 0x599   : > { %v7709_v0 = vpop.f32.mrf.mxu0 }
 0x59c   : > { %2947 = vmatmul.bf16.gmra.mxu0 %v5617_v15  ;;  %3076 = vmatmul.bf16.gmra.mxu1 %v5557_v21  ;;  %v5640_v15 = vld [vmem:[%s9475_s10 + $0xe0] sm:$0xf]  ;;  %v7770_v21 = vpop.permute.xlu2 %2301  ;;  %v7816_v48 = vpop.permute.xlu1 %2336 }
 0x5a1   : > { %v7715_v20 = vpop.f32.mrf.mxu0 }
 0x5a4   : > { %v7787_v44 = vpop.permute.xlu2 %2286  ;;  %v2252_v13 = vpop.permute.xlu1 %2251 }
 0x5a5   : > { %v2896_v23 = vadd.f32 %v7657_v19, %v2252_v13 }
 0x5a9   : > { %v7733_v38 = vpop.f32.mrf.mxu0 }
 0x5ac   : > { %2952 = vmatmul.bf16.gmra.mxu0 %v5625_v58  ;;  %3081 = vmatmul.bf16.gmra.mxu1 %v5565_v18  ;;  %v5641_v58 = vor.u32 %v6538_v25, %v5640_v15  ;;  %v5581_v18 = vor.u32 %v6521_v62, %v5578_v7  ;;  %v6540_v15 = vld [vmem:[%s9475_s10 + $0xf4] sm:$0xf0]  ;;  %v6523_v25 = vld [vmem:[%s9475_s10 + $0x74] sm:$0xf]  ;;  %v5586_v62 = vld [vmem:[%s9475_s10 + $0x78] sm:$0xf0]  ;;  %v7805_v45 = vpop.permute.xlu2 %2371 }
 0x5b1   : > { %v7739_v8 = vpop.f32.mrf.mxu0 }
 0x5b4   : > { %v7811_v6 = vpop.permute.xlu2 %2356 }
 0x5b9   : > { %v7757_v51 = vpop.f32.mrf.mxu0 }
 0x5bc   : > { %2957 = vmatmul.bf16.gmra.mxu0 %v5633_v47  ;;  %3086 = vmatmul.bf16.gmra.mxu1 %v5573_v50  ;;  %v7789_v47 = vpop.permute.xlu0 %2346  ;;  %v5648_v50 = vld [vmem:[%s9475_s10 + $0xf0] sm:$0xf]  ;;  %v2272_v1 = vpop.permute.xlu2 %2271 }
 0x5c1   : > { %v7765_v5 = vpop.f32.mrf.mxu0 }
 0x5c4   : > { %v2262_v24 = vpop.permute.xlu0 %2261 }
 0x5c9   : > { %v7785_v40 = vpop.f32.mrf.mxu0 }
 0x5cc   : > { %2962 = vmatmul.bf16.gmra.mxu0 %v5641_v58  ;;  %3091 = vmatmul.bf16.gmra.mxu1 %v5581_v18  ;;  %v5649_v58 = vor.u32 %v6540_v15, %v5648_v50  ;;  %v5589_v18 = vor.u32 %v6523_v25, %v5586_v62  ;;  %v6542_v50 = vld [vmem:[%s9475_s10 + $0x104] sm:$0xf0]  ;;  %v6525_v15 = vld [vmem:[%s9475_s10 + $0x84] sm:$0xf]  ;;  %v5594_v25 = vld [vmem:[%s9475_s10 + $0x88] sm:$0xf0]  ;;  %v2247_v62 = vpop.permute.xlu0 %2246 }
 0x5cd   : > { %v5597_v61 = vor.u32 %v6525_v15, %v5594_v25  ;;  %v2901_v25 = vadd.f32 %v7673_v36, %v2262_v24  ;;  %v5610_v24 = vld [vmem:[%s9475_s10 + $0xa8] sm:$0xf0] }
 0x5d1   : > { %v7803_v7 = vpop.f32.mrf.mxu0 }
 0x5d9   : > { %v7809_v46 = vpop.f32.mrf.mxu0 }
 0x5dc   : > { %2967 = vmatmul.bf16.gmra.mxu0 %v5649_v58  ;;  %3096 = vmatmul.bf16.gmra.mxu1 %v5589_v18  ;;  %v2894_v58 = vadd.f32 %v7655_v41, %v2247_v62  ;;  %v5657_v18 = vor.u32 %v6542_v50, %v5656_v27  ;;  %v5664_v41 = vld [vmem:[%s9475_s10 + $0x110] sm:$0xf]  ;;  %v6544_v27 = vld [vmem:[%s9475_s10 + $0x114] sm:$0xf0] }
 0x5e1   : > { %v7828_v54 = vpop.f32.mrf.mxu0 }
 0x5e9   : > { %v3062_v31 = vpop.f32.mrf.mxu1  ;;  %v7843_v13 = vpop.f32.mrf.mxu0 }
 0x5ea   : > { %v3063_v42 = vadd.f32 %v3062_v31, %v2894_v58  ;;  %v5602_v31 = vld [vmem:[%s9475_s10 + $0x98] sm:$0xf0] }
 0x5ec   : > { %2972 = vmatmul.bf16.gmra.mxu0 %v5657_v18  ;;  %3101 = vmatmul.bf16.gmra.mxu1 %v5597_v61  ;;  %v3222_v59 = vmax.f32 %v3063_v42, 0.0  ;;  %v6527_v61 = vld [vmem:[%s9475_s10 + $0x94] sm:$0xf] }
 0x5ed   : > { %v5605_v19 = vor.u32 %v6527_v61, %v5602_v31 }
 0x5f1   : > { %v3064_v37 = vpop.f32.mrf.mxu1  ;;  %v7849_v62 = vpop.f32.mrf.mxu0 }
 0x5f2   : > { %v3065_v49 = vadd.f32 %v3064_v37, %v2896_v23  ;;  %v2257_v23 = vpop.permute.xlu2 %2256 }
 0x5f3   : > { %v2899_v37 = vadd.f32 %v7671_v35, %v2257_v23  ;;  %v6529_v35 = vld [vmem:[%s9475_s10 + $0xa4] sm:$0xf] }
 0x5f4   : > { %v3223_v11 = vmax.f32 %v3065_v49, 0.0  ;;  %v5665_v49 = vor.u32 %v6544_v27, %v5664_v41  ;;  %v2904_v41 = vadd.f32 %v7687_v52, %v2267_v34  ;;  %v5613_v61 = vor.u32 %v6529_v35, %v5610_v24  ;;  %v6531_v52 = vld [vmem:[%s9475_s10 + $0xb4] sm:$0xf] }
 0x5f5   : > { %v2909_v34 = vadd.f32 %v7709_v0, %v7763_v4  ;;  %v6550_v0 = vld [vmem:[%s9475_s10 + $0x144] sm:$0xf0]  ;;  %v6533_v4 = vld [vmem:[%s9475_s10 + $0xc4] sm:$0xf] }
 0x5f6   : > { %v7845_v42 = vpack.c.bf16 %v3223_v11, %v3222_v59  ;;  %v5672_v59 = vld [vmem:[%s9475_s10 + $0x120] sm:$0xf]  ;;  %v6546_v11 = vld [vmem:[%s9475_s10 + $0x124] sm:$0xf0] }
 0x5f7   : > { %v5673_v27 = vor.u32 %v6546_v11, %v5672_v59 }
 0x5f9   : > { %v3067_v50 = vpop.f32.mrf.mxu1  ;;  %v7866_v23 = vpop.f32.mrf.mxu0 }
 0x5fa   : > { %v3068_v15 = vadd.f32 %v3067_v50, %v2899_v37 }
 0x5fc   : > { %2977 = vmatmul.bf16.gmra.mxu0 %v5665_v49  ;;  %3106 = vmatmul.bf16.gmra.mxu1 %v5605_v19  ;;  %v3224_v26 = vmax.f32 %v3068_v15, 0.0  ;;  %v2906_v49 = vadd.f32 %v7691_v55, %v2272_v1  ;;  %v5618_v1 = vld [vmem:[%s9475_s10 + $0xb8] sm:$0xf0] }
 0x5fd   : > { %v5621_v59 = vor.u32 %v6531_v52, %v5618_v1  ;;  %v2916_v52 = vadd.f32 %v7739_v8, %v7746_v33  ;;  %v5634_v8 = vld [vmem:[%s9475_s10 + $0xd8] sm:$0xf0] }
 0x601   : > { %v3069_v58 = vpop.f32.mrf.mxu1  ;;  %v7869_v15 = vpop.f32.mrf.mxu0 }
 0x602   : > { %v3070_v18 = vadd.f32 %v3069_v58, %v2901_v25 }
 0x604   : > { %v3225_v43 = vmax.f32 %v3070_v18, 0.0 }
 0x606   : > { %v7863_v36 = vpack.c.bf16 %v3225_v43, %v3224_v26  ;;  %v5680_v26 = vld [vmem:[%s9475_s10 + $0x130] sm:$0xf]  ;;  %v6548_v43 = vld [vmem:[%s9475_s10 + $0x134] sm:$0xf0] }
 0x607   : > { %v5681_v18 = vor.u32 %v6548_v43, %v5680_v26 }
 0x609   : > { %v3072_v31 = vpop.f32.mrf.mxu1  ;;  %v7887_v24 = vpop.f32.mrf.mxu0 }
 0x60a   : > { %v3073_v37 = vadd.f32 %v3072_v31, %v2904_v41  ;;  %v2911_v41 = vadd.f32 %v7715_v20, %v7781_v10  ;;  %v5626_v20 = vld [vmem:[%s9475_s10 + $0xc8] sm:$0xf0] }
 0x60c   : > { %2982 = vmatmul.bf16.gmra.mxu0 %v5673_v27  ;;  %3111 = vmatmul.bf16.gmra.mxu1 %v5613_v61  ;;  %v3226_v25 = vmax.f32 %v3073_v37, 0.0 }
 0x611   : > { %v3074_v19 = vpop.f32.mrf.mxu1 }
 0x612   : > { %v3075_v50 = vadd.f32 %v3074_v19, %v2906_v49  ;;  %v5688_v49 = vld [vmem:[%s9475_s10 + $0x140] sm:$0xf]  ;;  %v2914_v19 = vadd.f32 %v7733_v38, %v7787_v44  ;;  %v5696_v38 = vld [vmem:[%s9475_s10 + $0x150] sm:$0xf]  ;;  %v6552_v44 = vld [vmem:[%s9475_s10 + $0x154] sm:$0xf0] }
 0x614   : > { %v3227_v58 = vmax.f32 %v3075_v50, 0.0  ;;  %v7907_v50 = vpop.f32.mrf.mxu0 }
 0x616   : > { %v7883_v55 = vpack.c.bf16 %v3227_v58, %v3226_v25  ;;  %v5689_v25 = vor.u32 %v6550_v0, %v5688_v49  ;;  %v5629_v58 = vor.u32 %v6533_v4, %v5626_v20  ;;  %v2921_v49 = vadd.f32 %v7765_v5, %v7770_v21 }
 0x619   : > { %v3077_v11 = vpop.f32.mrf.mxu1 }
 0x61a   : > { %v3078_v35 = vadd.f32 %v3077_v11, %v2909_v34 }
 0x61c   : > { %2987 = vmatmul.bf16.gmra.mxu0 %v5681_v18  ;;  %3116 = vmatmul.bf16.gmra.mxu1 %v5621_v59  ;;  %v3228_v31 = vmax.f32 %v3078_v35, 0.0  ;;  %v7911_v34 = vpop.f32.mrf.mxu0  ;;  %v6535_v35 = vld [vmem:[%s9475_s10 + $0xd4] sm:$0xf] }
 0x621   : > { %v3079_v27 = vpop.f32.mrf.mxu1 }
 0x622   : > { %v3080_v61 = vadd.f32 %v3079_v27, %v2911_v41  ;;  %v5697_v41 = vor.u32 %v6552_v44, %v5696_v38  ;;  %v5637_v27 = vor.u32 %v6535_v35, %v5634_v8 }
 0x624   : > { %v3229_v37 = vmax.f32 %v3080_v61, 0.0 }
 0x626   : > { %v7903_v10 = vpack.c.bf16 %v3229_v37, %v3228_v31  ;;  %v7927_v31 = vpop.f32.mrf.mxu0  ;;  %v2919_v37 = vadd.f32 %v7757_v51, %v7731_v29  ;;  %v6537_v29 = vld [vmem:[%s9475_s10 + $0xe4] sm:$0xf]  ;;  %v5642_v51 = vld [vmem:[%s9475_s10 + $0xe8] sm:$0xf0] }
 0x629   : > { %v3082_v26 = vpop.f32.mrf.mxu1 }
 0x62a   : > { %v3083_v43 = vadd.f32 %v3082_v26, %v2914_v19  ;;  %v6554_v26 = vld [vmem:[%s9475_s10 + $0x164] sm:$0xf0] }
 0x62c   : > { %2992 = vmatmul.bf16.gmra.mxu0 %v5689_v25  ;;  %3121 = vmatmul.bf16.gmra.mxu1 %v5629_v58  ;;  %v3230_v59 = vmax.f32 %v3083_v43, 0.0  ;;  %v5704_v58 = vld [vmem:[%s9475_s10 + $0x160] sm:$0xf] }
 0x62d   : > { %v5705_v43 = vor.u32 %v6554_v26, %v5704_v58 }
 0x62e   : > { %v7945_v5 = vpop.f32.mrf.mxu0 }
 0x631   : > { %v3084_v1 = vpop.f32.mrf.mxu1 }
 0x632   : > { %v3085_v18 = vadd.f32 %v3084_v1, %v2916_v52  ;;  %v5645_v52 = vor.u32 %v6537_v29, %v5642_v51 }
 0x634   : > { %v3231_v11 = vmax.f32 %v3085_v18, 0.0  ;;  %v2924_v18 = vadd.f32 %v7785_v40, %v7707_v9  ;;  %v6539_v9 = vld [vmem:[%s9475_s10 + $0xf4] sm:$0xf] }
 0x636   : > { %v7925_v33 = vpack.c.bf16 %v3231_v11, %v3230_v59  ;;  %v2926_v59 = vadd.f32 %v7803_v7, %v7711_v12  ;;  %v7951_v11 = vpop.f32.mrf.mxu0  ;;  %v5650_v12 = vld [vmem:[%s9475_s10 + $0xf8] sm:$0xf0] }
 0x639   : > { %v3087_v61 = vpop.f32.mrf.mxu1 }
 0x63a   : > { %v3088_v0 = vadd.f32 %v3087_v61, %v2919_v37  ;;  %v6556_v61 = vld [vmem:[%s9475_s10 + $0x174] sm:$0xf0]  ;;  %v5653_v37 = vor.u32 %v6539_v9, %v5650_v12 }
 0x63c   : > { %2997 = vmatmul.bf16.gmra.mxu0 %v5697_v41  ;;  %3126 = vmatmul.bf16.gmra.mxu1 %v5637_v27  ;;  %v3232_v19 = vmax.f32 %v3088_v0, 0.0  ;;  %v5712_v27 = vld [vmem:[%s9475_s10 + $0x170] sm:$0xf] }
 0x63d   : > { %v5713_v7 = vor.u32 %v6556_v61, %v5712_v27 }
 0x63e   : > { %v7965_v0 = vpop.f32.mrf.mxu0 }
 0x641   : > { %v3089_v4 = vpop.f32.mrf.mxu1 }
 0x642   : > { %v3090_v20 = vadd.f32 %v3089_v4, %v2921_v49  ;;  %v2342_v4 = vpop.permute.xlu2 %2341 }
 0x644   : > { %v3233_v25 = vmax.f32 %v3090_v20, 0.0  ;;  %v2929_v20 = vadd.f32 %v7809_v46, %v7729_v22  ;;  %v6541_v46 = vld [vmem:[%s9475_s10 + $0x104] sm:$0xf] }
 0x646   : > { %v3291_v21 = vpack.c.bf16 %v3233_v25, %v3232_v19  ;;  %v2931_v19 = vadd.f32 %v7828_v54, %v7689_v53  ;;  %v7971_v29 = vpop.f32.mrf.mxu0  ;;  %v5658_v54 = vld [vmem:[%s9475_s10 + $0x108] sm:$0xf0] }
 0x649   : > { %v3092_v1 = vpop.f32.mrf.mxu1 }
 0x64a   : > { %v3093_v38 = vadd.f32 %v3092_v1, %v2924_v18  ;;  %v6558_v1 = vld [vmem:[%s9475_s10 + $0x184] sm:$0xf0]  ;;  %v2327_v22 = vpop.permute.xlu2 %2326 }
 0x64b   : > { %v2934_v18 = vadd.f32 %v7843_v13, %v2327_v22  ;;  %v5728_v13 = vld [vmem:[%s9475_s10 + $0x190] sm:$0xf] }
 0x64c   : > { %3002 = vmatmul.bf16.gmra.mxu0 %v5705_v43  ;;  %3131 = vmatmul.bf16.gmra.mxu1 %v5645_v52  ;;  %v3234_v8 = vmax.f32 %v3093_v38, 0.0  ;;  %v5720_v52 = vld [vmem:[%s9475_s10 + $0x180] sm:$0xf]  ;;  %v5661_v38 = vor.u32 %v6541_v46, %v5658_v54 }
 0x651   : > { %v3094_v44 = vpop.f32.mrf.mxu1 }
 0x652   : > { %v3095_v35 = vadd.f32 %v3094_v44, %v2926_v59  ;;  %v5721_v59 = vor.u32 %v6558_v1, %v5720_v52  ;;  %v2944_v1 = vadd.f32 %v7887_v24, %v7789_v47  ;;  %v5744_v47 = vld [vmem:[%s9475_s10 + $0x1b0] sm:$0xf] }
 0x654   : > { %v3235_v41 = vmax.f32 %v3095_v35, 0.0 }
 0x656   : > { %v3292_v40 = vpack.c.bf16 %v3235_v41, %v3234_v8  ;;  %v7986_v8 = vpop.f32.mrf.mxu0  ;;  %v2332_v41 = vpop.permute.xlu0 %2331 }
 0x657   : > { %v2936_v27 = vadd.f32 %v7849_v62, %v2332_v41  ;;  %v5666_v62 = vld [vmem:[%s9475_s10 + $0x118] sm:$0xf0] }
 0x659   : > { %v3097_v49 = vpop.f32.mrf.mxu1 }
 0x65a   : > { %v3098_v25 = vadd.f32 %v3097_v49, %v2929_v20  ;;  %v2939_v49 = vadd.f32 %v7866_v23, %v7816_v48 }
 0x65c   : > { %3007 = vmatmul.bf16.gmra.mxu0 %v5713_v7  ;;  %3136 = vmatmul.bf16.gmra.mxu1 %v5653_v37  ;;  %v3236_v51 = vmax.f32 %v3098_v25, 0.0  ;;  %v6543_v37 = vld [vmem:[%s9475_s10 + $0x114] sm:$0xf] }
 0x65e   : > { %v8006_v20 = vpop.f32.mrf.mxu0  ;;  %v8040_v24 = vpop.permute.xlu0 %2556 }
 0x661   : > { %v3099_v58 = vpop.f32.mrf.mxu1 }
 0x662   : > { %v3100_v26 = vadd.f32 %v3099_v58, %v2931_v19  ;;  %v5669_v19 = vor.u32 %v6543_v37, %v5666_v62 }
 0x664   : > { %v3237_v43 = vmax.f32 %v3100_v26, 0.0  ;;  %v2941_v26 = vadd.f32 %v7869_v15, %v2342_v4  ;;  %v5674_v15 = vld [vmem:[%s9475_s10 + $0x128] sm:$0xf0] }
 0x666   : > { %v3293_v53 = vpack.c.bf16 %v3237_v43, %v3236_v51  ;;  %v8012_v43 = vpop.f32.mrf.mxu0 }
 0x668   : > { %3414 = vmatpush.bf16.msra.mxu2 %v3293_v53 }
 0x669   : > { %v3102_v44 = vpop.f32.mrf.mxu1 }
 0x66a   : > { %v3103_v35 = vadd.f32 %v3102_v44, %v2934_v18  ;;  %v8033_v18 = vpop.permute.xlu2 %2481 }
 0x66c   : > { %3012 = vmatmul.bf16.gmra.mxu0 %v5721_v59  ;;  %3141 = vmatmul.bf16.gmra.mxu1 %v5661_v38  ;;  %v3238_v12 = vmax.f32 %v3103_v35, 0.0  ;;  %v2946_v59 = vadd.f32 %v7907_v50, %v7807_v2  ;;  %v5682_v2 = vld [vmem:[%s9475_s10 + $0x138] sm:$0xf0] }
 0x66d   : > { %3415 = vmatpush.bf16.msra.mxu2 %v3292_v40  ;;  %v6560_v40 = vld [vmem:[%s9475_s10 + $0x194] sm:$0xf0] }
 0x66e   : > { %v8031_v22 = vpop.f32.mrf.mxu0 }
 0x671   : > { %3416 = vmatpush.bf16.msra.mxu2 %v3291_v21  ;;  %v3104_v61 = vpop.f32.mrf.mxu1 }
 0x672   : > { %v3105_v9 = vadd.f32 %v3104_v61, %v2936_v27  ;;  %v6564_v27 = vld [vmem:[%s9475_s10 + $0x1b4] sm:$0xf0]  ;;  %v6547_v61 = vld [vmem:[%s9475_s10 + $0x134] sm:$0xf] }
 0x674   : > { %v3239_v7 = vmax.f32 %v3105_v9, 0.0 }
 0x675   : > { %3417 = vmatpush.bf16.msra.mxu2 %v7925_v33  ;;  %v5729_v33 = vor.u32 %v6560_v40, %v5728_v13  ;;  %v5745_v13 = vor.u32 %v6564_v27, %v5744_v47  ;;  %v5685_v40 = vor.u32 %v6547_v61, %v5682_v2  ;;  %v5760_v47 = vld [vmem:[%s9475_s10 + $0x1d0] sm:$0xf]  ;;  %v5698_v61 = vld [vmem:[%s9475_s10 + $0x158] sm:$0xf0] }
 0x676   : > { %v8002_v21 = vpack.c.bf16 %v3239_v7, %v3238_v12  ;;  %v8051_v50 = vpop.f32.mrf.mxu0  ;;  %v8055_v12 = vpop.permute.xlu2 %2466  ;;  %v2949_v7 = vadd.f32 %v7911_v34, %v7811_v6  ;;  %v5752_v6 = vld [vmem:[%s9475_s10 + $0x1c0] sm:$0xf]  ;;  %v6566_v34 = vld [vmem:[%s9475_s10 + $0x1c4] sm:$0xf0] }
 0x679   : > { %3418 = vmatpush.bf16.msra.mxu2 %v7903_v10  ;;  %v3107_v25 = vpop.f32.mrf.mxu1  ;;  %v5736_v10 = vld [vmem:[%s9475_s10 + $0x1a0] sm:$0xf] }
 0x67a   : > { %v3108_v58 = vadd.f32 %v3107_v25, %v2939_v49  ;;  %v8059_v49 = vpop.permute.xlu0 %2471 }
 0x67c   : > { %3017 = vmatmul.bf16.gmra.mxu0 %v5729_v33  ;;  %3146 = vmatmul.bf16.gmra.mxu1 %v5669_v19  ;;  %v3240_v23 = vmax.f32 %v3108_v58, 0.0  ;;  %v2951_v33 = vadd.f32 %v7927_v31, %v7783_v32  ;;  %v6549_v32 = vld [vmem:[%s9475_s10 + $0x144] sm:$0xf]  ;;  %v5690_v31 = vld [vmem:[%s9475_s10 + $0x148] sm:$0xf0] }
 0x67d   : > { %3419 = vmatpush.bf16.msra.mxu2 %v7883_v55  ;;  %v6562_v55 = vld [vmem:[%s9475_s10 + $0x1a4] sm:$0xf0] }
 0x67e   : > { %v5737_v46 = vor.u32 %v6562_v55, %v5736_v10  ;;  %v8063_v19 = vpop.f32.mrf.mxu0  ;;  %v8065_v25 = vpop.permute.xlu2 %2551  ;;  %v2954_v10 = vadd.f32 %v7945_v5, %v7761_v3  ;;  %v5753_v55 = vor.u32 %v6566_v34, %v5752_v6 }
 0x681   : > { %3420 = vmatpush.bf16.msra.mxu2 %v7863_v36  ;;  %v3109_v51 = vpop.f32.mrf.mxu1  ;;  %v6545_v36 = vld [vmem:[%s9475_s10 + $0x124] sm:$0xf] }
 0x682   : > { %v3110_v48 = vadd.f32 %v3109_v51, %v2941_v26  ;;  %v5677_v54 = vor.u32 %v6545_v36, %v5674_v15  ;;  %v5693_v36 = vor.u32 %v6549_v32, %v5690_v31  ;;  %v8085_v15 = vpop.permute.xlu0 %2456 }
 0x684   : > { %v3241_v52 = vmax.f32 %v3110_v48, 0.0 }
 0x685   : > { %3421 = vmatpush.bf16.msra.mxu2 %v7845_v42 }
 0x686   : > { %v8027_v4 = vpack.c.bf16 %v3241_v52, %v3240_v23  ;;  %v8081_v52 = vpop.permute.xlu1 %2476 }
 0x689   : > { %v3112_v42 = vpop.f32.mrf.mxu1 }
 0x68a   : > { %v3113_v53 = vadd.f32 %v3112_v42, %v2944_v1  ;;  %v8089_v42 = vpop.permute.xlu2 %2536  ;;  %v8095_v3 = vpop.permute.xlu0 %2541 }
 0x68c   : > { %3022 = vmatmul.bf16.gmra.mxu0 %v5737_v46  ;;  %3151 = vmatmul.bf16.gmra.mxu1 %v5677_v54  ;;  %v3242_v35 = vmax.f32 %v3113_v53, 0.0  ;;  %v8087_v46 = vpop.f32.mrf.mxu0  ;;  %v2956_v53 = vadd.f32 %v7951_v11, %v7805_v45  ;;  %v6568_v45 = vld [vmem:[%s9475_s10 + $0x1d4] sm:$0xf0]  ;;  %v6551_v11 = vld [vmem:[%s9475_s10 + $0x154] sm:$0xf] }
 0x691   : > { %v3114_v38 = vpop.f32.mrf.mxu1 }
 0x692   : > { %v3115_v44 = vadd.f32 %v3114_v38, %v2946_v59  ;;  %v8093_v59 = vpop.permute.xlu1 %2561  ;;  %v8102_v27 = vpop.permute.xlu2 %2451 }
 0x694   : > { %v3243_v41 = vmax.f32 %v3115_v44, 0.0  ;;  %v8097_v5 = vpop.f32.mrf.mxu0 }
 0x696   : > { %v8053_v9 = vpack.c.bf16 %v3243_v41, %v3242_v35 }
 0x699   : > { %v3117_v37 = vpop.f32.mrf.mxu1 }
 0x69a   : > { %v3118_v62 = vadd.f32 %v3117_v37, %v2949_v7  ;;  %v5761_v7 = vor.u32 %v6568_v45, %v5760_v47  ;;  %v8115_v37 = vpop.permute.xlu1 %2546  ;;  %v2966_v47 = vadd.f32 %v8006_v20, %v7713_v14  ;;  %v6555_v14 = vld [vmem:[%s9475_s10 + $0x174] sm:$0xf]  ;;  %v5714_v20 = vld [vmem:[%s9475_s10 + $0x178] sm:$0xf0] }
 0x69c   : > { %3027 = vmatmul.bf16.gmra.mxu0 %v5745_v13  ;;  %3156 = vmatmul.bf16.gmra.mxu1 %v5685_v40  ;;  %v3244_v51 = vmax.f32 %v3118_v62, 0.0  ;;  %v5701_v13 = vor.u32 %v6551_v11, %v5698_v61  ;;  %v8117_v62 = vpop.permute.xlu0 %2526 }
 0x6a1   : > { %v3119_v58 = vpop.f32.mrf.mxu1 }
 0x6a2   : > { %v3120_v26 = vadd.f32 %v3119_v58, %v2951_v33  ;;  %v2959_v33 = vadd.f32 %v7965_v0, %v7735_v28  ;;  %v8121_v58 = vpop.f32.mrf.mxu0  ;;  %v6570_v28 = vld [vmem:[%s9475_s10 + $0x1e4] sm:$0xf0]  ;;  %v6553_v0 = vld [vmem:[%s9475_s10 + $0x164] sm:$0xf] }
 0x6a4   : > { %v3245_v48 = vmax.f32 %v3120_v26, 0.0  ;;  %v8123_v26 = vpop.permute.xlu2 %2436 }
 0x6a6   : > { %v8079_v23 = vpack.c.bf16 %v3245_v48, %v3244_v51  ;;  %v2961_v51 = vadd.f32 %v7971_v29, %v7741_v16  ;;  %v5706_v16 = vld [vmem:[%s9475_s10 + $0x168] sm:$0xf0] }
 0x6a9   : > { %v3122_v1 = vpop.f32.mrf.mxu1 }
 0x6aa   : > { %v3123_v54 = vadd.f32 %v3122_v1, %v2954_v10  ;;  %v5768_v10 = vld [vmem:[%s9475_s10 + $0x1e0] sm:$0xf]  ;;  %v8143_v1 = vpop.f32.mrf.mxu0 }
 0x6ac   : > { %3032 = vmatmul.bf16.gmra.mxu0 %v5753_v55  ;;  %3161 = vmatmul.bf16.gmra.mxu1 %v5693_v36  ;;  %v3246_v35 = vmax.f32 %v3123_v54, 0.0  ;;  %v8130_v55 = vpop.permute.xlu1 %2461  ;;  %v8141_v36 = vpop.permute.xlu0 %2441  ;;  %v5769_v54 = vor.u32 %v6570_v28, %v5768_v10 }
 0x6b1   : > { %v3124_v38 = vpop.f32.mrf.mxu1 }
 0x6b2   : > { %v3125_v44 = vadd.f32 %v3124_v38, %v2956_v53  ;;  %v5709_v53 = vor.u32 %v6553_v0, %v5706_v16  ;;  %v8145_v38 = vpop.permute.xlu2 %2521  ;;  %v2969_v16 = vadd.f32 %v8012_v43, %v7696_v63  ;;  %v5722_v63 = vld [vmem:[%s9475_s10 + $0x188] sm:$0xf0] }
 0x6b4   : > { %v3247_v41 = vmax.f32 %v3125_v44, 0.0  ;;  %v8153_v11 = vpop.permute.xlu0 %2426 }
 0x6b6   : > { %v8113_v2 = vpack.c.bf16 %v3247_v41, %v3246_v35  ;;  %v2964_v35 = vadd.f32 %v7986_v8, %v7759_v56  ;;  %v8149_v41 = vpop.permute.xlu1 %2446  ;;  %v5776_v56 = vld [vmem:[%s9475_s10 + $0x1f0] sm:$0xf]  ;;  %v6572_v8 = vld [vmem:[%s9475_s10 + $0x1f4] sm:$0xf0] }
 0x6b9   : > { %v3127_v40 = vpop.f32.mrf.mxu1 }
 0x6ba   : > { %v3128_v48 = vadd.f32 %v3127_v40, %v2959_v33  ;;  %v8157_v40 = vpop.permute.xlu2 %2506 }
 0x6bc   : > { %3037 = vmatmul.bf16.gmra.mxu0 %v5761_v7  ;;  %3166 = vmatmul.bf16.gmra.mxu1 %v5701_v13  ;;  %v3248_v32 = vmax.f32 %v3128_v48, 0.0  ;;  %v8155_v7 = vpop.f32.mrf.mxu0  ;;  %v8173_v10 = vpop.permute.xlu0 %2511 }
 0x6c1   : > { %v3129_v6 = vpop.f32.mrf.mxu1 }
 0x6c2   : > { %v3130_v34 = vadd.f32 %v3129_v6, %v2961_v51  ;;  %v5777_v6 = vor.u32 %v6572_v8, %v5776_v56  ;;  %v2422_v0 = vpop.permute.xlu2 %2421 }
 0x6c4   : > { %v3249_v31 = vmax.f32 %v3130_v34, 0.0  ;;  %v5717_v34 = vor.u32 %v6555_v14, %v5714_v20  ;;  %v8175_v28 = vpop.f32.mrf.mxu0 }
 0x6c6   : > { %v3299_v29 = vpack.c.bf16 %v3249_v31, %v3248_v32  ;;  %v8171_v32 = vpop.permute.xlu1 %2531 }
 0x6c9   : > { %v3132_v44 = vpop.f32.mrf.mxu1 }
 0x6ca   : > { %v3133_v45 = vadd.f32 %v3132_v44, %v2964_v35 }
 0x6cc   : > { %3042 = vmatmul.bf16.gmra.mxu0 %v5769_v54  ;;  %3171 = vmatmul.bf16.gmra.mxu1 %v5709_v53  ;;  %v3250_v33 = vmax.f32 %v3133_v45, 0.0  ;;  %v2971_v54 = vadd.f32 %v8031_v22, %v7737_v30 }
 0x6d1   : > { %v3134_v61 = vpop.f32.mrf.mxu1 }
 0x6d2   : > { %v3135_v13 = vadd.f32 %v3134_v61, %v2966_v47  ;;  %v8181_v47 = vpop.permute.xlu1 %2516 }
 0x6d4   : > { %v3251_v51 = vmax.f32 %v3135_v13, 0.0  ;;  %v8183_v13 = vpop.permute.xlu0 %2496 }
 0x6d6   : > { %v3300_v48 = vpack.c.bf16 %v3251_v51, %v3250_v33  ;;  %v6557_v33 = vld [vmem:[%s9475_s10 + $0x184] sm:$0xf]  ;;  %v2407_v51 = vpop.permute.xlu2 %2406 }
 0x6d7   : > { %v2974_v30 = vadd.f32 %v8051_v50, %v2407_v51  ;;  %v5725_v22 = vor.u32 %v6557_v33, %v5722_v63  ;;  %v6559_v50 = vld [vmem:[%s9475_s10 + $0x194] sm:$0xf] }
 0x6d9   : > { %v3137_v31 = vpop.f32.mrf.mxu1 }
 0x6da   : > { %v3138_v53 = vadd.f32 %v3137_v31, %v2969_v16  ;;  %v2432_v14 = vpop.permute.xlu1 %2431 }
 0x6dc   : > { %3047 = vmatmul.bf16.gmra.mxu0 %v5777_v6  ;;  %3176 = vmatmul.bf16.gmra.mxu1 %v5717_v34  ;;  %v3252_v45 = vmax.f32 %v3138_v53, 0.0  ;;  %v2412_v20 = vpop.permute.xlu0 %2411  ;;  %v5730_v53 = vld [vmem:[%s9475_s10 + $0x198] sm:$0xf0] }
 0x6dd   : > { %v2976_v6 = vadd.f32 %v8063_v19, %v2412_v20 }
 0x6e1   : > { %v3139_v44 = vpop.f32.mrf.mxu1 }
 0x6e2   : > { %v3140_v35 = vadd.f32 %v3139_v44, %v2971_v54  ;;  %v2417_v44 = vpop.permute.xlu1 %2416 }
 0x6e3   : > { %v2979_v19 = vadd.f32 %v8087_v46, %v2417_v44  ;;  %v2991_v44 = vadd.f32 %v8175_v28, %v8141_v36  ;;  %v5754_v36 = vld [vmem:[%s9475_s10 + $0x1c8] sm:$0xf0] }
 0x6e4   : > { %v3253_v61 = vmax.f32 %v3140_v35, 0.0  ;;  %v2993_v35 = vpop.f32.mrf.mxu0 }
 0x6e6   : > { %v3301_v43 = vpack.c.bf16 %v3253_v61, %v3252_v45 }
 0x6e8   : > { %3443 = vmatpush.bf16.msra.mxu3 %v3301_v43 }
 0x6e9   : > { %v3142_v56 = vpop.f32.mrf.mxu1 }
 0x6ea   : > { %v3143_v8 = vadd.f32 %v3142_v56, %v2974_v30 }
 0x6ec   : > { %3181 = vmatmul.bf16.gmra.mxu1 %v5725_v22  ;;  %3444 = vmatpush.bf16.msra.mxu3 %v3300_v48  ;;  %v3254_v16 = vmax.f32 %v3143_v8, 0.0  ;;  %v8207_v33 = vpop.f32.mrf.mxu0 }
 0x6f0   : > { %3445 = vmatpush.bf16.msra.mxu3 %v3299_v29  ;;  %v5733_v29 = vor.u32 %v6559_v50, %v5730_v53 }
 0x6f1   : > { %v3144_v34 = vpop.f32.mrf.mxu1 }
 0x6f2   : > { %v3145_v31 = vadd.f32 %v3144_v34, %v2976_v6 }
 0x6f4   : > { %v3255_v54 = vmax.f32 %v3145_v31, 0.0  ;;  %3446 = vmatpush.bf16.msra.mxu3 %v8113_v2  ;;  %v2981_v2 = vadd.f32 %v8097_v5, %v2422_v0  ;;  %v8220_v56 = vpop.f32.mrf.mxu0 }
 0x6f6   : > { %v8200_v48 = vpack.c.bf16 %v3255_v54, %v3254_v16  ;;  %v6563_v16 = vld [vmem:[%s9475_s10 + $0x1b4] sm:$0xf]  ;;  %v2989_v54 = vadd.f32 %v8155_v7, %v8123_v26  ;;  %v6575_v26 = vld [vmem:[%s9477_s12 + $0xc] sm:$0xf0]  ;;  %v6565_v7 = vld [vmem:[%s9475_s10 + $0x1c4] sm:$0xf] }
 0x6f8   : > { %3447 = vmatpush.bf16.msra.mxu3 %v8079_v23  ;;  %v6561_v23 = vld [vmem:[%s9475_s10 + $0x1a4] sm:$0xf] }
 0x6f9   : > { %v3147_v45 = vpop.f32.mrf.mxu1 }
 0x6fa   : > { %v3148_v61 = vadd.f32 %v3147_v45, %v2979_v19 }
 0x6fc   : > { %3186 = vmatmul.bf16.gmra.mxu1 %v5733_v29  ;;  %3448 = vmatpush.bf16.msra.mxu3 %v8053_v9  ;;  %v3256_v51 = vmax.f32 %v3148_v61, 0.0  ;;  %v5738_v9 = vld [vmem:[%s9475_s10 + $0x1a8] sm:$0xf0]  ;;  %v8223_v31 = vpop.f32.mrf.mxu0 }
 0x6fd   : > { %v5741_v5 = vor.u32 %v6561_v23, %v5738_v9 }
 0x700   : > { %3449 = vmatpush.bf16.msra.mxu3 %v8027_v4  ;;  %v2984_v4 = vadd.f32 %v8121_v58, %v8153_v11  ;;  %v5746_v58 = vld [vmem:[%s9475_s10 + $0x1b8] sm:$0xf0] }
 0x701   : > { %v3149_v63 = vpop.f32.mrf.mxu1 }
 0x702   : > { %v3150_v43 = vadd.f32 %v3149_v63, %v2981_v2  ;;  %v5784_v2 = vld [vmem:[%s9477_s12] sm:$0xf] }
 0x703   : > { %v5785_v28 = vor.u32 %v6575_v26, %v5784_v2  ;;  %v5778_v2 = vld [vmem:[%s9475_s10 + $0x1f8] sm:$0xf0]  ;;  %v5832_v26 = vld [vmem:[%s9477_s12 + $0x60] sm:$0xf] }
 0x704   : > { %v3257_v30 = vmax.f32 %v3150_v43, 0.0  ;;  %3450 = vmatpush.bf16.msra.mxu3 %v8002_v21  ;;  %v2986_v21 = vadd.f32 %v8143_v1, %v2432_v14  ;;  %v5749_v1 = vor.u32 %v6563_v16, %v5746_v58  ;;  %v3003_v53 = vpop.f32.mrf.mxu0  ;;  %v2994_v43 = vadd.f32 %v2993_v35, %v8149_v41  ;;  %v6567_v41 = vld [vmem:[%s9475_s10 + $0x1d4] sm:$0xf]  ;;  %v5762_v35 = vld [vmem:[%s9475_s10 + $0x1d8] sm:$0xf0] }
 0x705   : > { %3422 = vmatmul.bf16.vlgmr.msra.gmra.mxu2 %v5785_v28  ;;  %v6569_v16 = vld [vmem:[%s9475_s10 + $0x1e4] sm:$0xf]  ;;  %v5770_v58 = vld [vmem:[%s9475_s10 + $0x1e8] sm:$0xf0] }
 0x706   : > { %v8216_v46 = vpack.c.bf16 %v3257_v30, %v3256_v51  ;;  %v5757_v51 = vor.u32 %v6565_v7, %v5754_v36  ;;  %v6587_v7 = vld [vmem:[%s9477_s12 + $0x6c] sm:$0xf0] }
 0x707   : > { %v5833_v36 = vor.u32 %v6587_v7, %v5832_v26 }
 0x709   : > { %v3152_v0 = vpop.f32.mrf.mxu1 }
 0x70a   : > { %v3153_v22 = vadd.f32 %v3152_v0, %v2984_v4  ;;  %v5800_v0 = vld [vmem:[%s9477_s12 + $0x20] sm:$0xf] }
 0x70c   : > { %3191 = vmatmul.bf16.gmra.mxu1 %v5741_v5  ;;  %v3258_v6 = vmax.f32 %v3153_v22, 0.0  ;;  %v3005_v30 = vpop.f32.mrf.mxu0  ;;  %v6579_v22 = vld [vmem:[%s9477_s12 + $0x2c] sm:$0xf0] }
 0x711   : > { %v3154_v8 = vpop.f32.mrf.mxu1 }
 0x712   : > { %v3155_v20 = vadd.f32 %v3154_v8, %v2986_v21  ;;  %v5801_v21 = vor.u32 %v6579_v22, %v5800_v0  ;;  %v5765_v8 = vor.u32 %v6567_v41, %v5762_v35  ;;  %v3006_v22 = vadd.f32 %v3005_v30, %v8059_v49 }
 0x714   : > { %v3259_v34 = vmax.f32 %v3155_v20, 0.0  ;;  %v3008_v5 = vpop.f32.mrf.mxu0 }
 0x715   : > { %3427 = vmatmul.bf16.gmra.mxu2 %v5801_v21  ;;  %v3009_v0 = vadd.f32 %v3008_v5, %v8081_v52  ;;  %v2999_v52 = vadd.f32 %v8220_v56, %v8085_v15  ;;  %v2492_v56 = vpop.permute.xlu2 %2491 }
 0x716   : > { %v8231_v11 = vpack.c.bf16 %v3259_v34, %v3258_v6 }
 0x719   : > { %v3157_v14 = vpop.f32.mrf.mxu1 }
 0x71a   : > { %v3158_v50 = vadd.f32 %v3157_v14, %v2989_v54  ;;  %v5816_v54 = vld [vmem:[%s9477_s12 + $0x40] sm:$0xf] }
 0x71c   : > { %3196 = vmatmul.bf16.gmra.mxu1 %v5749_v1  ;;  %v3260_v45 = vmax.f32 %v3158_v50, 0.0  ;;  %v3010_v6 = vpop.f32.mrf.mxu0  ;;  %v6583_v1 = vld [vmem:[%s9477_s12 + $0x4c] sm:$0xf0] }
 0x71d   : > { %v5817_v50 = vor.u32 %v6583_v1, %v5816_v54  ;;  %v3011_v41 = vadd.f32 %v3010_v6, %v8033_v18  ;;  %v3001_v54 = vadd.f32 %v8223_v31, %v8130_v55  ;;  %v2996_v6 = vadd.f32 %v8207_v33, %v8102_v27 }
 0x721   : > { %v3159_v19 = vpop.f32.mrf.mxu1 }
 0x722   : > { %v3160_v29 = vadd.f32 %v3159_v19, %v2991_v44  ;;  %v5773_v44 = vor.u32 %v6569_v16, %v5770_v58 }
 0x724   : > { %v3261_v61 = vmax.f32 %v3160_v29, 0.0  ;;  %v3013_v14 = vpop.f32.mrf.mxu0 }
 0x725   : > { %3432 = vmatmul.bf16.gmra.mxu2 %v5817_v50 }
 0x726   : > { %v8249_v63 = vpack.c.bf16 %v3261_v61, %v3260_v45  ;;  %v6571_v61 = vld [vmem:[%s9475_s10 + $0x1f4] sm:$0xf] }
 0x727   : > { %v5781_v28 = vor.u32 %v6571_v61, %v5778_v2 }
 0x729   : > { %v3162_v23 = vpop.f32.mrf.mxu1 }
 0x72a   : > { %v8252_v9 = vadd.f32 %v3162_v23, %v2994_v43  ;;  %v2502_v23 = vpop.permute.xlu1 %2501 }
 0x72c   : > { %3201 = vmatmul.bf16.gmra.mxu1 %v5757_v51  ;;  %v3015_v29 = vpop.f32.mrf.mxu0 }
 0x731   : > { %v3164_v4 = vpop.f32.mrf.mxu1 }
 0x732   : > { %v2487_v18 = vpop.permute.xlu1 %2486  ;;  %v3165_v55 = vadd.f32 %v3164_v4, %v2996_v6  ;;  %v9560_v6 = vld [vmem:[#allocation21_spill] sm:$0xff] }
 0x734   : > { %v3018_v51 = vpop.f32.mrf.mxu0 }
 0x735   : > { %3437 = vmatmul.bf16.gmra.mxu2 %v5833_v36  ;;  %v3263_v36 = vmax.f32 %v3165_v55, 0.0 }
 0x739   : > { %v3167_v20 = vpop.f32.mrf.mxu1 }
 0x73c   : > { %3206 = vmatmul.bf16.gmra.mxu1 %v5765_v8  ;;  %v3004_v8 = vadd.f32 %v3003_v53, %v8055_v12  ;;  %v3020_v61 = vpop.f32.mrf.mxu0  ;;  %v3014_v12 = vadd.f32 %v3013_v14, %v2487_v18  ;;  %v3168_v53 = vadd.f32 %v3167_v20, %v2999_v52 }
 0x73e   : > { %v3264_v7 = vmax.f32 %v3168_v53, 0.0  ;;  %v9561_v53 = vld [vmem:[#allocation20_spill] sm:$0xff] }
 0x741   : > { %v3169_v34 = vpop.f32.mrf.mxu1 }
 0x742   : > { %v3170_v5 = vadd.f32 %v3169_v34, %v3001_v54 }
 0x744   : > { %v3265_v31 = vmax.f32 %v3170_v5, 0.0  ;;  %v3023_v34 = vpop.f32.mrf.mxu0 }
 0x746   : > { %v3307_v15 = vpack.c.bf16 %v3265_v31, %v3264_v7  ;;  %v9563_v7 = vld [vmem:[#allocation18_spill] sm:$0xff] }
 0x749   : > { %v3172_v19 = vpop.f32.mrf.mxu1 }
 0x74a   : > { %v3173_v1 = vadd.f32 %v3172_v19, %v3004_v8  ;;  %v5792_v8 = vld [vmem:[%s9477_s12 + $0x8] sm:$0xf] }
 0x74c   : > { %3211 = vmatmul.bf16.gmra.mxu1 %v5773_v44 }
 0x751   : > { %v3174_v45 = vpop.f32.mrf.mxu1 }
 0x752   : > { %v3175_v16 = vadd.f32 %v3174_v45, %v3006_v22  ;;  %v3266_v45 = vmax.f32 %v3173_v1, 0.0  ;;  %v3019_v22 = vadd.f32 %v3018_v51, %v8183_v13  ;;  %v6576_v13 = vld [vmem:[%s9477_s12 + $0x14] sm:$0xf0] }
 0x754   : > { %v3267_v49 = vmax.f32 %v3175_v16, 0.0 }
 0x756   : > { %v3308_v26 = vpack.c.bf16 %v3267_v49, %v3266_v45 }
 0x759   : > { %v3177_v43 = vpop.f32.mrf.mxu1 }
 0x75a   : > { %v3178_v35 = vadd.f32 %v3177_v43, %v3009_v0  ;;  %v3262_v43 = vmax.f32 %v8252_v9, 0.0  ;;  %v3534_v9 = vld [vmem:[%s9483_s18] sm:$0x3] }
 0x75b   : > { %v3550_v16 = vsel %vm3548_vm3, %v3534_v9, 0  ;;  %v5824_v9 = vld [vmem:[%s9477_s12 + $0x48] sm:$0xf] }
 0x75c   : > { %3216 = vmatmul.bf16.gmra.mxu1 %v5781_v28  ;;  %v3268_v50 = vmax.f32 %v3178_v35, 0.0  ;;  %v3016_v28 = vadd.f32 %v3015_v29, %v2492_v56  ;;  %v3306_v20 = vpack.c.bf16 %v3263_v36, %v3262_v43  ;;  %v3021_v29 = vadd.f32 %v3020_v61, %v2502_v23  ;;  %v5802_v43 = vld [vmem:[%s9477_s12 + $0x30] sm:$0xf0] }
 0x761   : > { %v3179_v21 = vpop.f32.mrf.mxu1 }
 0x762   : > { %v3180_v58 = vadd.f32 %v3179_v21, %v3011_v41  ;;  %v3025_v41 = vpop.f32.mrf.mxu0 }
 0x763   : > { %v3026_v52 = vadd.f32 %v3025_v41, %v8173_v10  ;;  %v6573_v10 = vld [vmem:[%s9477_s12 + $0x4] sm:$0xf] }
 0x764   : > { %v3269_v44 = vmax.f32 %v3180_v58, 0.0  ;;  %v5793_v58 = vor.u32 %v6576_v13, %v5792_v8  ;;  %v6581_v41 = vld [vmem:[%s9477_s12 + $0x44] sm:$0xf] }
 0x766   : > { %v3309_v30 = vpack.c.bf16 %v3269_v44, %v3268_v50 }
 0x768   : > { %3472 = vmatpush.bf16.msrb.mxu2 %v3309_v30 }
 0x769   : > { %v3182_v2 = vpop.f32.mrf.mxu1 }
 0x76a   : > { %v3183_v19 = vadd.f32 %v3182_v2, %v3014_v12  ;;  %v9562_v2 = vld [vmem:[#allocation19_spill] sm:$0xff] }
 0x76c   : > { %3473 = vmatpush.bf16.msrb.mxu2 %v3308_v26  ;;  %v3270_v14 = vmax.f32 %v3183_v19, 0.0 }
 0x770   : > { %3474 = vmatpush.bf16.msrb.mxu2 %v3307_v15 }
 0x771   : > { %v3184_v27 = vpop.f32.mrf.mxu1 }
 0x772   : > { %v3185_v33 = vadd.f32 %v3184_v27, %v3016_v28 }
 0x774   : > { %v3271_v0 = vmax.f32 %v3185_v33, 0.0  ;;  %3475 = vmatpush.bf16.msrb.mxu2 %v3306_v20  ;;  %v5808_v33 = vld [vmem:[%s9477_s12 + $0x28] sm:$0xf] }
 0x776   : > { %v8301_v4 = vpack.c.bf16 %v3271_v0, %v3270_v14 }
 0x778   : > { %3476 = vmatpush.bf16.msrb.mxu2 %v8249_v63 }
 0x779   : > { %v3187_v35 = vpop.f32.mrf.mxu1 }
 0x77a   : > { %v3188_v21 = vadd.f32 %v3187_v35, %v3019_v22  ;;  %v5818_v35 = vld [vmem:[%s9477_s12 + $0x50] sm:$0xf0] }
 0x77c   : > { %3477 = vmatpush.bf16.msrb.mxu2 %v8231_v11  ;;  %v3028_v11 = vpop.f32.mrf.mxu0  ;;  %v3272_v54 = vmax.f32 %v3188_v21, 0.0  ;;  %v5821_v21 = vor.u32 %v6581_v41, %v5818_v35  ;;  %v9571_v41 = vld [vmem:[#allocation10_spill] sm:$0xff] }
 0x780   : > { %3478 = vmatpush.bf16.msrb.mxu2 %v8216_v46  ;;  %v3024_v46 = vadd.f32 %v3023_v34, %v8157_v40 }
 0x781   : > { %v3189_v63 = vpop.f32.mrf.mxu1 }
 0x782   : > { %v3190_v51 = vadd.f32 %v3189_v63, %v3021_v29  ;;  %v6584_v29 = vld [vmem:[%s9477_s12 + $0x54] sm:$0xf0] }
 0x783   : > { %v5825_v8 = vor.u32 %v6584_v29, %v5824_v9 }
 0x784   : > { %v3273_v1 = vmax.f32 %v3190_v51, 0.0  ;;  %3479 = vmatpush.bf16.msrb.mxu2 %v8200_v48  ;;  %v3030_v61 = vpop.f32.mrf.mxu0 }
 0x785   : > { %v3031_v45 = vadd.f32 %v3030_v61, %v8145_v38  ;;  %v6577_v38 = vld [vmem:[%s9477_s12 + $0x24] sm:$0xf] }
 0x786   : > { %v8317_v23 = vpack.c.bf16 %v3273_v1, %v3272_v54  ;;  %v5805_v27 = vor.u32 %v6577_v38, %v5802_v43  ;;  %v5840_v1 = vld [vmem:[%s9477_s12 + $0x68] sm:$0xf]  ;;  %v9567_v43 = vld [vmem:[#allocation14_spill] sm:$0xff] }
 0x787   : > { %3480 = vmatmul.bf16.vlgmr.msrb.gmra.mxu2 %v5793_v58  ;;  %v5834_v58 = vld [vmem:[%s9477_s12 + $0x70] sm:$0xf0] }
 0x788   : > { %3559 = vmatpush.bf16.msra.mxu2 %v3550_v16 }
 0x789   : > { %v3192_v50 = vpop.f32.mrf.mxu1 }
 0x78a   : > { %v3193_v44 = vadd.f32 %v3192_v50, %v3024_v46  ;;  %v6588_v46 = vld [vmem:[%s9477_s12 + $0x74] sm:$0xf0] }
 0x78b   : > { %v5841_v50 = vor.u32 %v6588_v46, %v5840_v1  ;;  %v5852_v46 = vld [vmem:[%s9478_s13] sm:$0xf] }
 0x78c   : > { %3714 = vmatpush.bf16.msrb.mxu2 %v7576_v57  ;;  %v3274_v48 = vmax.f32 %v3193_v44, 0.0  ;;  %v3033_v40 = vpop.f32.mrf.mxu0  ;;  %v3029_v57 = vadd.f32 %v3028_v11, %v8181_v47  ;;  %v6585_v11 = vld [vmem:[%s9477_s12 + $0x64] sm:$0xf] }
 0x78d   : > { %v3034_v15 = vadd.f32 %v3033_v40, %v8117_v62  ;;  %v6580_v62 = vld [vmem:[%s9477_s12 + $0x34] sm:$0xf0]  ;;  %v5837_v54 = vor.u32 %v6585_v11, %v5834_v58 }
 0x78e   : > { %v5809_v20 = vor.u32 %v6580_v62, %v5808_v33  ;;  %v3423_v33 = vpop.f32.mrf.mxu2  ;;  %v9569_v62 = vld [vmem:[#allocation12_spill] sm:$0xff] }
 0x790   : > { %3715 = vmatpush.bf16.msrb.mxu2 %v7572_v39 }
 0x791   : > { %v3194_v5 = vpop.f32.mrf.mxu1 }
 0x792   : > { %v3195_v49 = vadd.f32 %v3194_v5, %v3026_v52 }
 0x794   : > { %3716 = vmatpush.bf16.msrb.mxu2 %v7568_v17  ;;  %v3275_v30 = vmax.f32 %v3195_v49, 0.0  ;;  %v5786_v17 = vld [vmem:[%s9477_s12 + $0x10] sm:$0xf0]  ;;  %v3035_v47 = vpop.f32.mrf.mxu0 }
 0x796   : > { %v8325_v18 = vpack.c.bf16 %v3275_v30, %v3274_v48 }
 0x797   : > { %3485 = vmatmul.bf16.gmra.mxu2 %v5809_v20  ;;  %v9570_v20 = vld [vmem:[#allocation11_spill] sm:$0xff] }
 0x798   : > { %3717 = vmatpush.bf16.msrb.mxu2 %v7564_v60  ;;  %v5789_v60 = vor.u32 %v6573_v10, %v5786_v17 }
 0x799   : > { %v3197_v12 = vpop.f32.mrf.mxu1 }
 0x79a   : > { %v3198_v39 = vadd.f32 %v3197_v12, %v3029_v57  ;;  %3451 = vmatmul.bf16.vlgmr.msra.gmra.mxu3 %v5789_v60 }
 0x79c   : > { %3718 = vmatpush.bf16.msrb.mxu2 %v9560_v6  ;;  %v3276_v19 = vmax.f32 %v3198_v39, 0.0  ;;  %v3038_v28 = vpop.f32.mrf.mxu0 }
 0x7a0   : > { %3719 = vmatpush.bf16.msrb.mxu2 %v9561_v53 }
 0x7a1   : > { %v3199_v55 = vpop.f32.mrf.mxu1 }
 0x7a2   : > { %v3200_v31 = vadd.f32 %v3199_v55, %v3031_v45  ;;  %v3039_v45 = vadd.f32 %v3038_v28, %v8089_v42  ;;  %v6574_v42 = vld [vmem:[%s9477_s12 + $0xc] sm:$0xf]  ;;  %v9565_v28 = vld [vmem:[#allocation16_spill] sm:$0xff] }
 0x7a4   : > { %3720 = vmatpush.bf16.msrb.mxu2 %v9562_v2  ;;  %v3277_v26 = vmax.f32 %v3200_v31, 0.0  ;;  %v3040_v0 = vpop.f32.mrf.mxu0 }
 0x7a5   : > { %v3041_v10 = vadd.f32 %v3040_v0, %v8095_v3  ;;  %v6582_v0 = vld [vmem:[%s9477_s12 + $0x4c] sm:$0xf] }
 0x7a6   : > { %v8339_v36 = vpack.c.bf16 %v3277_v26, %v3276_v19 }
 0x7a7   : > { %3490 = vmatmul.bf16.gmra.mxu2 %v5825_v8 }
 0x7a8   : > { %3721 = vmatpush.bf16.msrb.mxu2 %v9563_v7 }
 0x7a9   : > { %v3202_v56 = vpop.f32.mrf.mxu1 }
 0x7aa   : > { %v8342_v34 = vadd.f32 %v3202_v56, %v3034_v15  ;;  %3456 = vmatmul.bf16.gmra.mxu3 %v5805_v27 }
 0x7ac   : > { %v3043_v13 = vpop.f32.mrf.mxu0  ;;  %v3278_v56 = vmax.f32 %v8342_v34, 0.0  ;;  %v9564_v34 = vld [vmem:[#allocation17_spill] sm:$0xff] }
 0x7ad   : > { %v3044_v6 = vadd.f32 %v3043_v13, %v8115_v37  ;;  %v6586_v13 = vld [vmem:[%s9477_s12 + $0x6c] sm:$0xf] }
 0x7b1   : > { %v3204_v14 = vpop.f32.mrf.mxu1 }
 0x7b4   : > { %v3045_v51 = vpop.f32.mrf.mxu0 }
 0x7b5   : > { %v3046_v48 = vadd.f32 %v3045_v51, %v8065_v25  ;;  %v3036_v25 = vadd.f32 %v3035_v47, %v8171_v32  ;;  %v5794_v32 = vld [vmem:[%s9477_s12 + $0x18] sm:$0xf0] }
 0x7b6   : > { %v5797_v47 = vor.u32 %v6574_v42, %v5794_v32 }
 0x7b7   : > { %3495 = vmatmul.bf16.gmra.mxu2 %v5841_v50  ;;  %v3205_v19 = vadd.f32 %v3204_v14, %v3036_v25  ;;  %v3425_v14 = vpop.f32.mrf.mxu2  ;;  %v6590_v50 = vld [vmem:[%s9478_s13 + $0x4] sm:$0xf0] }
 0x7b9   : > { %v3207_v22 = vpop.f32.mrf.mxu1  ;;  %v3279_v15 = vmax.f32 %v3205_v19, 0.0 }
 0x7ba   : > { %3461 = vmatmul.bf16.gmra.mxu3 %v5821_v21  ;;  %v3208_v31 = vadd.f32 %v3207_v22, %v3039_v45  ;;  %v5826_v22 = vld [vmem:[%s9477_s12 + $0x58] sm:$0xf0]  ;;  %v6596_v45 = vld [vmem:[%s9478_s13 + $0x34] sm:$0xf0] }
 0x7bb   : > { %v3314_v38 = vpack.c.bf16 %v3279_v15, %v3278_v56  ;;  %v5829_v9 = vor.u32 %v6582_v0, %v5826_v22 }
 0x7bc   : > { %v3048_v61 = vpop.f32.mrf.mxu0  ;;  %v3280_v7 = vmax.f32 %v3208_v31, 0.0 }
 0x7bd   : > { %v3049_v49 = vadd.f32 %v3048_v61, %v8040_v24 }
 0x7bf   : > { %v3428_v29 = vpop.f32.mrf.mxu2 }
 0x7c1   : > { %v3209_v63 = vpop.f32.mrf.mxu1 }
 0x7c2   : > { %v3210_v2 = vadd.f32 %v3209_v63, %v3041_v10  ;;  %v5842_v63 = vld [vmem:[%s9477_s12 + $0x78] sm:$0xf0]  ;;  %v6594_v10 = vld [vmem:[%s9478_s13 + $0x24] sm:$0xf0] }
 0x7c3   : > { %v5845_v58 = vor.u32 %v6586_v13, %v5842_v63 }
 0x7c4   : > { %v3050_v5 = vpop.f32.mrf.mxu0  ;;  %v3281_v26 = vmax.f32 %v3210_v2, 0.0 }
 0x7c5   : > { %v3051_v30 = vadd.f32 %v3050_v5, %v8093_v59 }
 0x7c6   : > { %v3315_v3 = vpack.c.bf16 %v3281_v26, %v3280_v7 }
 0x7c7   : > { %v3430_v11 = vpop.f32.mrf.mxu2 }
 0x7c9   : > { %v3212_v16 = vpop.f32.mrf.mxu1 }
 0x7ca   : > { %3466 = vmatmul.bf16.gmra.mxu3 %v5837_v54  ;;  %v3213_v17 = vadd.f32 %v3212_v16, %v3044_v6 }
 0x7cc   : > { %v3282_v59 = vmax.f32 %v3213_v17, 0.0 }
 0x7cf   : > { %v3433_v1 = vpop.f32.mrf.mxu2 }
 0x7d1   : > { %v3214_v44 = vpop.f32.mrf.mxu1 }
 0x7d2   : > { %v3215_v12 = vadd.f32 %v3214_v44, %v3046_v48  ;;  %v5860_v48 = vld [vmem:[%s9478_s13 + $0x10] sm:$0xf] }
 0x7d4   : > { %v3283_v55 = vmax.f32 %v3215_v12, 0.0 }
 0x7d6   : > { %v3316_v37 = vpack.c.bf16 %v3283_v55, %v3282_v59 }
 0x7d7   : > { %v3435_v5 = vpop.f32.mrf.mxu2 }
 0x7d9   : > { %v3217_v52 = vpop.f32.mrf.mxu1 }
 0x7da   : > { %v3218_v40 = vadd.f32 %v3217_v52, %v3049_v49  ;;  %v5853_v52 = vor.u32 %v6590_v50, %v5852_v46  ;;  %v6589_v46 = vld [vmem:[%s9478_s13 + $0x4] sm:$0xf]  ;;  %v5854_v50 = vld [vmem:[%s9478_s13 + $0x8] sm:$0xf0] }
 0x7dc   : > { %v3284_v53 = vmax.f32 %v3218_v40, 0.0 }
 0x7df   : > { %v3438_v40 = vpop.f32.mrf.mxu2 }
 0x7e1   : > { %v3219_v57 = vpop.f32.mrf.mxu1 }
 0x7e2   : > { %v3220_v39 = vadd.f32 %v3219_v57, %v3051_v30  ;;  %v6592_v30 = vld [vmem:[%s9478_s13 + $0x14] sm:$0xf0] }
 0x7e3   : > { %v5861_v12 = vor.u32 %v6592_v30, %v5860_v48  ;;  %v5862_v48 = vld [vmem:[%s9478_s13 + $0x18] sm:$0xf0] }
 0x7e4   : > { %v3285_v60 = vmax.f32 %v3220_v39, 0.0  ;;  %v5868_v39 = vld [vmem:[%s9478_s13 + $0x20] sm:$0xf] }
 0x7e5   : > { %v5869_v17 = vor.u32 %v6594_v10, %v5868_v39  ;;  %v6595_v39 = vld [vmem:[%s9478_s13 + $0x34] sm:$0xf]  ;;  %v5878_v10 = vld [vmem:[%s9478_s13 + $0x38] sm:$0xf0] }
 0x7e6   : > { %v3317_v24 = vpack.c.bf16 %v3285_v60, %v3284_v53  ;;  %v5876_v60 = vld [vmem:[%s9478_s13 + $0x30] sm:$0xf] }
 0x7e7   : > { %v3440_v53 = vpop.f32.mrf.mxu2  ;;  %v5877_v2 = vor.u32 %v6596_v45, %v5876_v60 }
 0x7e8   : > { %3501 = vmatpush.bf16.msrb.mxu3 %v3317_v24 }
 0x7ec   : > { %3502 = vmatpush.bf16.msrb.mxu3 %v3316_v37 }
 0x7f0   : > { %3503 = vmatpush.bf16.msrb.mxu3 %v3315_v3 }
 0x7f4   : > { %3504 = vmatpush.bf16.msrb.mxu3 %v3314_v38 }
 0x7f8   : > { %3505 = vmatpush.bf16.msrb.mxu3 %v8339_v36  ;;  %v9566_v36 = vld [vmem:[#allocation15_spill] sm:$0xff] }
 0x7fc   : > { %3506 = vmatpush.bf16.msrb.mxu3 %v8325_v18  ;;  %v5810_v18 = vld [vmem:[%s9477_s12 + $0x38] sm:$0xf0] }
 0x800   : > { %3507 = vmatpush.bf16.msrb.mxu3 %v8317_v23  ;;  %v6578_v23 = vld [vmem:[%s9477_s12 + $0x2c] sm:$0xf] }
 0x801   : > { %v5813_v27 = vor.u32 %v6578_v23, %v5810_v18 }
 0x804   : > { %3508 = vmatpush.bf16.msrb.mxu3 %v8301_v4  ;;  %v9568_v4 = vld [vmem:[#allocation13_spill] sm:$0xff] }
 0x807   : > { %3509 = vmatmul.bf16.vlgmr.msrb.gmra.mxu3 %v5797_v47 }
 0x808   : > { %3685 = vmatpush.bf16.msra.mxu3 %v9564_v34 }
 0x80a   : > { %v3481_v55 = vpop.f32.mrf.mxu2 }
 0x80c   : > { %3686 = vmatpush.bf16.msra.mxu3 %v9565_v28 }
 0x810   : > { %3687 = vmatpush.bf16.msra.mxu3 %v9566_v36 }
 0x812   : > { %v3483_v24 = vpop.f32.mrf.mxu2 }
 0x814   : > { %3688 = vmatpush.bf16.msra.mxu3 %v9567_v43 }
 0x817   : > { %3514 = vmatmul.bf16.gmra.mxu3 %v5813_v27 }
 0x818   : > { %3689 = vmatpush.bf16.msra.mxu3 %v9568_v4 }
 0x81a   : > { %v3486_v59 = vpop.f32.mrf.mxu2 }
 0x81c   : > { %3690 = vmatpush.bf16.msra.mxu3 %v9569_v62 }
 0x81d   : > { %v3452_v35 = vpop.f32.mrf.mxu3 }
 0x81e   : > { %v3453_v21 = vadd.f32 %v3452_v35, %v3423_v33  ;;  %v5901_v35 = vld [vmem:[%s9484_s19 + $0x8] sm:$0xf0] }
 0x820   : > { %3691 = vmatpush.bf16.msra.mxu3 %v9570_v20  ;;  %v3482_v26 = vadd.f32 %v3481_v55, %v3453_v21 }
 0x822   : > { %v3488_v38 = vpop.f32.mrf.mxu2 }
 0x824   : > { %3692 = vmatpush.bf16.msra.mxu3 %v9571_v41  ;;  %v6600_v41 = vld [vmem:[%s9484_s19 + $0x4] sm:$0xf] }
 0x825   : > { %v3454_v8 = vpop.f32.mrf.mxu3 }
 0x826   : > { %v3455_v19 = vadd.f32 %v3454_v8, %v3425_v14 }
 0x827   : > { %3519 = vmatmul.bf16.gmra.mxu3 %v5829_v9  ;;  %v5904_v9 = vor.u32 %v6600_v41, %v5901_v35  ;;  %v3643_v35 = vpop.permute.xlu1 %3642 }
 0x828   : > { %v3484_v37 = vadd.f32 %v3483_v24, %v3455_v19 }
 0x82a   : > { %v3491_v47 = vpop.f32.mrf.mxu2 }
 0x82d   : > { %v3457_v51 = vpop.f32.mrf.mxu3 }
 0x82e   : > { %v3458_v16 = vadd.f32 %v3457_v51, %v3428_v29 }
 0x830   : > { %v3487_v34 = vadd.f32 %v3486_v59, %v3458_v16 }
 0x832   : > { %v3493_v27 = vpop.f32.mrf.mxu2 }
 0x835   : > { %v3459_v54 = vpop.f32.mrf.mxu3 }
 0x836   : > { %v3460_v32 = vadd.f32 %v3459_v54, %v3430_v11 }
 0x837   : > { %3524 = vmatmul.bf16.gmra.mxu3 %v5845_v58 }
 0x838   : > { %v3489_v28 = vadd.f32 %v3488_v38, %v3460_v32 }
 0x83a   : > { %v3496_v21 = vpop.f32.mrf.mxu2 }
 0x83d   : > { %v3462_v44 = vpop.f32.mrf.mxu3 }
 0x83e   : > { %v3463_v61 = vadd.f32 %v3462_v44, %v3433_v1  ;;  %v5857_v44 = vor.u32 %v6589_v46, %v5854_v50 }
 0x840   : > { %v3492_v62 = vadd.f32 %v3491_v47, %v3463_v61  ;;  %v9572_v61 = vld [vmem:[#allocation9_spill] sm:$0xff] }
 0x842   : > { %v3498_v63 = vpop.f32.mrf.mxu2 }
 0x845   : > { %v3464_v49 = vpop.f32.mrf.mxu3 }
 0x846   : > { %v3465_v4 = vadd.f32 %v3464_v49, %v3435_v5  ;;  %v9574_v5 = vld [vmem:[#allocation6_spill] sm:$0xff]  ;;  %v6591_v49 = vld [vmem:[%s9478_s13 + $0x14] sm:$0xf] }
 0x847   : > { %3693 = vmatmul.bf16.vlgmr.msra.gmra.mxu3 %v5853_v52  ;;  %v9573_v52 = vld [vmem:[#allocation8_spill] sm:$0xff]  ;;  %v5865_v30 = vor.u32 %v6591_v49, %v5862_v48  ;;  %v3950_v48 = vld [vmem:[%s9481_s16 + $0x28] sm:$0xff] }
 0x848   : > { %v3494_v20 = vadd.f32 %v3493_v27, %v3465_v4  ;;  %v3951_v49 = vld [vmem:[%s9481_s16 + $0x30] sm:$0xff] }
 0x84d   : > { %v3467_v57 = vpop.f32.mrf.mxu3 }
 0x84e   : > { %v3468_v6 = vadd.f32 %v3467_v57, %v3438_v40  ;;  %v9575_v40 = vld [vmem:[#allocation4_spill] sm:$0xff]  ;;  %v6593_v57 = vld [vmem:[%s9478_s13 + $0x24] sm:$0xf] }
 0x850   : > { %v3497_v51 = vadd.f32 %v3496_v21, %v3468_v6  ;;  %v5870_v6 = vld [vmem:[%s9478_s13 + $0x28] sm:$0xf0] }
 0x855   : > { %v3469_v25 = vpop.f32.mrf.mxu3 }
 0x856   : > { %v3470_v13 = vadd.f32 %v3469_v25, %v3440_v53  ;;  %v3638_v25 = vpop.permute.xlu0 %3637 }
 0x857   : > { %3698 = vmatmul.bf16.gmra.mxu3 %v5861_v12  ;;  %v5873_v12 = vor.u32 %v6593_v57, %v5870_v6  ;;  %v3945_v6 = vld [vmem:[%s9481_s16] sm:$0xff] }
 0x858   : > { %v3499_v16 = vadd.f32 %v3498_v63, %v3470_v13 }
 0x85e   : > { %v3633_v19 = vpop.permute.xlu0 %3632 }
 0x867   : > { %3703 = vmatmul.bf16.gmra.mxu3 %v5869_v17  ;;  %v5881_v17 = vor.u32 %v6595_v39, %v5878_v10 }
 0x877   : > { %3708 = vmatmul.bf16.gmra.mxu3 %v5877_v2 }
 0x88a   : > { %v3510_v31 = vpop.f32.mrf.mxu3 }
 0x88b   : > { %v3511_v15 = vadd.f32 %v3510_v31, %v3482_v26 }
 0x892   : > { %v3512_v7 = vpop.f32.mrf.mxu3 }
 0x893   : > { %v3513_v3 = vadd.f32 %v3512_v7, %v3484_v37  ;;  %v3608_v7 = vpop.permute.xlu0 %3607 }
 0x895   : > { %v3530_v56 = vpack.c.bf16 %v3513_v3, %v3511_v15 }
 0x897   : > { %5846 = vmatmul.msk.bf16.vlgmr.msra.gmra.mxu2 %vm3535_vm4, %v3530_v56 }
 0x898   : > { %3912 = vmatpush.bf16.msra.mxu2 %v5904_v9 }
 0x89a   : > { %v3515_v42 = vpop.f32.mrf.mxu3 }
 0x89b   : > { %v3516_v23 = vadd.f32 %v3515_v42, %v3487_v34 }
 0x8a2   : > { %v3517_v36 = vpop.f32.mrf.mxu3 }
 0x8a3   : > { %v3518_v18 = vadd.f32 %v3517_v36, %v3489_v28  ;;  %v3628_v36 = vpop.permute.xlu2 %3627 }
 0x8a5   : > { %v3531_v43 = vpack.c.bf16 %v3518_v18, %v3516_v23 }
 0x8a7   : > { %5847 = vmatmul.msk.bf16.gmra.mxu2 %vm3535_vm4, %v3531_v43 }
 0x8aa   : > { %v3520_v33 = vpop.f32.mrf.mxu3 }
 0x8ab   : > { %v3521_v0 = vadd.f32 %v3520_v33, %v3492_v62  ;;  %v3623_v33 = vpop.permute.xlu2 %3622 }
 0x8b2   : > { %v3522_v14 = vpop.f32.mrf.mxu3 }
 0x8b3   : > { %v3523_v22 = vadd.f32 %v3522_v14, %v3494_v20 }
 0x8b5   : > { %v3532_v29 = vpack.c.bf16 %v3523_v22, %v3521_v0 }
 0x8b7   : > { %5848 = vmatmul.msk.bf16.gmra.mxu2 %vm3535_vm4, %v3532_v29 }
 0x8ba   : > { %v3525_v8 = vpop.f32.mrf.mxu3 }
 0x8bb   : > { %v3526_v58 = vadd.f32 %v3525_v8, %v3497_v51  ;;  %v3618_v51 = vpop.permute.xlu1 %3617 }
 0x8c2   : > { %v3527_v11 = vpop.f32.mrf.mxu3 }
 0x8c3   : > { %v3528_v54 = vadd.f32 %v3527_v11, %v3499_v16 }
 0x8c5   : > { %v3533_v1 = vpack.c.bf16 %v3528_v54, %v3526_v58  ;;  %v3613_v58 = vpop.permute.xlu1 %3612 }
 0x8c7   : > { %5849 = vmatmul.msk.bf16.gmra.mxu2 %vm3535_vm4, %v3533_v1 }
 0x8ca   : > { %v3694_v31 = vpop.f32.mrf.mxu3 }
 0x8cb   : > { %v3695_v15 = vadd.f32 %v3694_v31, %v3608_v7 }
 0x8d2   : > { %v3696_v26 = vpop.f32.mrf.mxu3 }
 0x8d3   : > { %v3697_v54 = vadd.f32 %v3696_v26, %v3613_v58  ;;  %v3952_v26 = vld [vmem:[%s9481_s16 + $0x38] sm:$0xff] }
 0x8d7   : > { %3722 = vmatmul.bf16.vlgmr.msrb.gmra.mxu2 %v5857_v44 }
 0x8d8   : > { %4058 = vmatpush.bf16.msrb.mxu2 %v9572_v61 }
 0x8da   : > { %v3699_v38 = vpop.f32.mrf.mxu3 }
 0x8db   : > { %v3700_v16 = vadd.f32 %v3699_v38, %v3618_v51  ;;  %v6601_v38 = vld [vmem:[%s9484_s19 + $0x4] sm:$0xf0] }
 0x8dc   : > { %4059 = vmatpush.bf16.msrb.mxu2 %v9573_v52 }
 0x8e0   : > { %4060 = vmatpush.bf16.msrb.mxu2 %v9574_v5 }
 0x8e2   : > { %v3701_v32 = vpop.f32.mrf.mxu3 }
 0x8e3   : > { %v3702_v4 = vadd.f32 %v3701_v32, %v3623_v33 }
 0x8e4   : > { %4061 = vmatpush.bf16.msrb.mxu2 %v9575_v40 }
 0x8e7   : > { %3727 = vmatmul.bf16.gmra.mxu2 %v5865_v30 }
 0x8ea   : > { %v3704_v34 = vpop.f32.mrf.mxu3 }
 0x8eb   : > { %v3705_v23 = vadd.f32 %v3704_v34, %v3628_v36  ;;  %v9576_v34 = vld [vmem:[#allocation7_spill] sm:$0xff] }
 0x8ec   : > { %v9578_v36 = vld [vmem:[#allocation3_spill] sm:$0xff] }
 0x8f2   : > { %v3706_v18 = vpop.f32.mrf.mxu3 }
 0x8f3   : > { %v3707_v9 = vadd.f32 %v3706_v18, %v3633_v19  ;;  %v9579_v18 = vld [vmem:[#allocation2_spill] sm:$0xff] }
 0x8f7   : > { %3732 = vmatmul.bf16.gmra.mxu2 %v5873_v12 }
 0x8fa   : > { %v3709_v14 = vpop.f32.mrf.mxu3 }
 0x8fb   : > { %v3710_v0 = vadd.f32 %v3709_v14, %v3638_v25 }
 0x902   : > { %v3711_v21 = vpop.f32.mrf.mxu3 }
 0x903   : > { %v3712_v29 = vadd.f32 %v3711_v21, %v3643_v35  ;;  %v6602_v35 = vld [vmem:[%s9480_s15] sm:$0xff]  ;;  %v6603_v21 = vld [vmem:[%s9480_s15 + $0x8] sm:$0xff] }
 0x907   : > { %3737 = vmatmul.bf16.gmra.mxu2 %v5881_v17 }
 0x91a   : > { %v8492_v53 = vpop.f32.mrf.mxu2 }
 0x91b   : > { %3581 = vst.msk [vmem:[%s725_s2] sm:$0xff] %vm1286_vm1, %v8492_v53 }
 0x922   : > { %v8496_v60 = vpop.f32.mrf.mxu2 }
 0x923   : > { %3582 = vst.msk [vmem:[%s725_s2 + $0x8] sm:$0xff] %vm1286_vm1, %v8496_v60 }
 0x92a   : > { %v8500_v45 = vpop.f32.mrf.mxu2 }
 0x92b   : > { %3583 = vst.msk [vmem:[%s725_s2 + $0x10] sm:$0xff] %vm1286_vm1, %v8500_v45 }
 0x932   : > { %v8504_v2 = vpop.f32.mrf.mxu2 }
 0x933   : > { %3584 = vst.msk [vmem:[%s725_s2 + $0x18] sm:$0xff] %vm1286_vm1, %v8504_v2 }
 0x93a   : > { %v3571_v55 = vpop.f32.mrf.mxu2 }
 0x93b   : > { %3585 = vst.msk [vmem:[%s725_s2 + $0x20] sm:$0xff] %vm1286_vm1, %v3571_v55 }
 0x942   : > { %v3573_v24 = vpop.f32.mrf.mxu2 }
 0x943   : > { %3586 = vst.msk [vmem:[%s725_s2 + $0x28] sm:$0xff] %vm1286_vm1, %v3573_v24 }
 0x94a   : > { %v8510_v59 = vpop.f32.mrf.mxu2 }
 0x94b   : > { %3587 = vst.msk [vmem:[%s725_s2 + $0x30] sm:$0xff] %vm1286_vm1, %v8510_v59 }
 0x952   : > { %v3578_v37 = vpop.f32.mrf.mxu2 }
 0x953   : > { %3588 = vst.msk [vmem:[%s725_s2 + $0x38] sm:$0xff] %vm1286_vm1, %v3578_v37 }
 0x95a   : > { %v3723_v3 = vpop.f32.mrf.mxu2 }
 0x95b   : > { %v3724_v56 = vadd.f32 %v3723_v3, %v3695_v15 }
 0x962   : > { %v3725_v42 = vpop.f32.mrf.mxu2 }
 0x963   : > { %v3726_v1 = vadd.f32 %v3725_v42, %v3697_v54 }
 0x96a   : > { %v3728_v47 = vpop.f32.mrf.mxu2 }
 0x96b   : > { %v3729_v11 = vadd.f32 %v3728_v47, %v3700_v16  ;;  %v6597_v47 = vld [vmem:[%s9482_s17] sm:$0xff] }
 0x972   : > { %v3730_v28 = vpop.f32.mrf.mxu2 }
 0x973   : > { %v3731_v20 = vadd.f32 %v3730_v28, %v3702_v4  ;;  %v9577_v28 = vld [vmem:[#allocation5_spill] sm:$0xff] }
 0x97a   : > { %v3733_v43 = vpop.f32.mrf.mxu2 }
 0x97b   : > { %v3734_v27 = vadd.f32 %v3733_v43, %v3705_v23  ;;  %v6598_v23 = vld [vmem:[%s9482_s17 + $0x8] sm:$0xff]  ;;  %v8577_v43 = vld [vmem:[%s9482_s17 + $0x10] sm:$0xff] }
 0x97d   : > { %3759 = vrot.lane.b32.xlu1 %v3734_v27, %s6760_s6 }
 0x982   : > { %v3735_v62 = vpop.f32.mrf.mxu2 }
 0x983   : > { %v3736_v13 = vadd.f32 %v3735_v62, %v3707_v9  ;;  %v6604_v9 = vld [vmem:[%s9480_s15 + $0x10] sm:$0xff] }
 0x985   : > { %3757 = vrot.lane.b32.xlu1 %v3731_v20, %s6760_s6 }
 0x98a   : > { %v3738_v22 = vpop.f32.mrf.mxu2 }
 0x98b   : > { %v3739_v41 = vadd.f32 %v3738_v22, %v3710_v0 }
 0x98d   : > { %3763 = vrot.lane.b32.xlu2 %v3739_v41, %s6760_s6 }
 0x992   : > { %v3740_v8 = vpop.f32.mrf.mxu2 }
 0x993   : > { %v3741_v63 = vadd.f32 %v3740_v8, %v3712_v29  ;;  %v6605_v29 = vld [vmem:[%s9480_s15 + $0x18] sm:$0xff] }
 0x995   : > { %3765 = vrot.lane.b32.xlu0 %v3741_v63, %s6760_s6  ;;  %3761 = vrot.lane.b32.xlu2 %v3736_v13, %s6760_s6 }
 0x99d   : > { %3755 = vrot.lane.b32.xlu0 %v3729_v11, %s6760_s6  ;;  %3751 = vrot.lane.b32.xlu2 %v3724_v56, %s6760_s6  ;;  %v5899_v56 = vld [vmem:[%s9484_s19] sm:$0xf] }
 0x99e   : > { %v5900_v42 = vor.u32 %v6601_v38, %v5899_v56  ;;  %v6658_v56 = vld [vmem:[%s9485_s20 + $0x19c] sm:$0xf0] }
 0x9a5   : > { %3753 = vrot.lane.b32.xlu0 %v3726_v1, %s6760_s6 }
 0x9e7   : > { %v3764_v46 = vpop.permute.xlu2 %3763 }
 0x9e8   : > { %v3781_v40 = vadd.f32 %v3764_v46, %v8510_v59 }
 0x9ef   : > { %v3762_v50 = vpop.permute.xlu2 %3761  ;;  %v3760_v44 = vpop.permute.xlu1 %3759 }
 0x9f0   : > { %v3780_v61 = vadd.f32 %v3762_v50, %v3573_v24  ;;  %v3779_v52 = vadd.f32 %v3760_v44, %v3571_v55 }
 0x9f2   : > { %v3785_v5 = vpack.c.bf16 %v3780_v61, %v3779_v52 }
 0x9f4   : > { %3816 = vrot.lane.b32.xlu2 %v3785_v5, %s6760_s6 }
 0x9f7   : > { %v3758_v39 = vpop.permute.xlu1 %3757  ;;  %v3752_v25 = vpop.permute.xlu2 %3751 }
 0x9f8   : > { %v3778_v17 = vadd.f32 %v3758_v39, %v8504_v2  ;;  %v3775_v59 = vadd.f32 %v3752_v25, %v8492_v53  ;;  %v3949_v2 = vld [vmem:[%s9481_s16 + $0x20] sm:$0xff]  ;;  %v3946_v53 = vld [vmem:[%s9481_s16 + $0x8] sm:$0xff] }
 0x9fc   : > { %3985 = vperm.xlu2 %6750, %v3951_v49  }
 0xa04   : > { %3980 = vperm.xlu2 %6750, %v3950_v48  }
 0xa07   : > { %v3766_v30 = vpop.permute.xlu0 %3765 }
 0xa08   : > { %v3782_v57 = vadd.f32 %v3766_v30, %v3578_v37 }
 0xa0a   : > { %v3786_v12 = vpack.c.bf16 %v3782_v57, %v3781_v40 }
 0xa0c   : > { %3818 = vrot.lane.b32.xlu1 %v3786_v12, %s6760_s6  ;;  %3955 = vperm.xlu2 %6750, %v3945_v6  }
 0xa0f   : > { %v3756_v10 = vpop.permute.xlu0 %3755 }
 0xa10   : > { %v3777_v55 = vadd.f32 %v3756_v10, %v8500_v45  ;;  %v3947_v45 = vld [vmem:[%s9481_s16 + $0x10] sm:$0xff] }
 0xa12   : > { %v3784_v24 = vpack.c.bf16 %v3778_v17, %v3777_v55  ;;  %v6419_v17 = vld [vmem:[%s9485_s20 + $0x3c0] sm:$0xf] }
 0xa13   : > { %v6730_v55 = vld [vmem:[%s9485_s20 + $0x3dc] sm:$0xf0] }
 0xa14   : > { %3814 = vrot.lane.b32.xlu0 %v3784_v24, %s6760_s6  ;;  %v6420_v25 = vor.u32 %v6730_v55, %v6419_v17 }
 0xa17   : > { %v3754_v31 = vpop.permute.xlu0 %3753 }
 0xa18   : > { %v3776_v19 = vadd.f32 %v3754_v31, %v8496_v60  ;;  %v3948_v60 = vld [vmem:[%s9481_s16 + $0x18] sm:$0xff]  ;;  %v6387_v31 = vld [vmem:[%s9485_s20 + $0x380] sm:$0xf] }
 0xa1a   : > { %v3783_v37 = vpack.c.bf16 %v3776_v19, %v3775_v59  ;;  %v6722_v59 = vld [vmem:[%s9485_s20 + $0x39c] sm:$0xf0] }
 0xa1b   : > { %v6163_v19 = vld [vmem:[%s9485_s20 + $0x1c0] sm:$0xf] }
 0xa1c   : > { %3990 = vperm.xlu0 %6748, %v3952_v26   ;;  %3812 = vrot.lane.b32.xlu1 %v3783_v37, %s6760_s6  ;;  %v6388_v37 = vor.u32 %v6722_v59, %v6387_v31 }
 0xa24   : > { %3965 = vperm.xlu0 %6748, %v3947_v45   ;;  %3975 = vperm.xlu1 %6749, %v3949_v2   ;;  %v6666_v45 = vld [vmem:[%s9485_s20 + $0x1dc] sm:$0xf0] }
 0xa2c   : > { %3960 = vperm.xlu0 %6748, %v3946_v53   ;;  %3970 = vperm.xlu1 %6749, %v3948_v60   ;;  %v6164_v60 = vor.u32 %v6666_v45, %v6163_v19 }
 0xa2e   : > { %4893 = vmatpush.bf16.msra.mxu1 %v6164_v60  ;;  %v6003_v60 = vld [vmem:[%s9485_s20 + $0x80] sm:$0xf] }
 0xa4e   : > { %v3817_v15 = vpop.permute.xlu2 %3816 }
 0xa56   : > { %v3986_v26 = vpop.permute.xlu2 %3985 }
 0xa7e   : > { %v3819_v7 = vpop.permute.xlu1 %3818 }
 0xa7f   : > { %3837 = vmatpush.bf16.msrb.mxu3 %v3819_v7  ;;  %v6355_v7 = vld [vmem:[%s9485_s20 + $0x340] sm:$0xf] }
 0xa83   : > { %3838 = vmatpush.bf16.msrb.mxu3 %v3817_v15  ;;  %v6714_v15 = vld [vmem:[%s9485_s20 + $0x35c] sm:$0xf0] }
 0xa86   : > { %v3815_v3 = vpop.permute.xlu0 %3814 }
 0xa87   : > { %3839 = vmatpush.bf16.msrb.mxu3 %v3815_v3  ;;  %v6131_v3 = vld [vmem:[%s9485_s20 + $0x180] sm:$0xf] }
 0xa8e   : > { %v3813_v32 = vpop.permute.xlu1 %3812  ;;  %v3991_v24 = vpop.permute.xlu0 %3990 }
 0xa8f   : > { %3840 = vmatpush.bf16.msrb.mxu3 %v3813_v32  ;;  %v6132_v32 = vor.u32 %v6658_v56, %v6131_v3 }
 0xa91   : > { %4894 = vmatpush.bf16.msra.mxu1 %v6132_v32  ;;  %v6674_v32 = vld [vmem:[%s9485_s20 + $0x21c] sm:$0xf0] }
 0xa92   : > { %5894 = vmatmul.msk.bf16.vlgmr.msrb.gmra.mxu3 %vm1286_vm1, %v6597_v47  ;;  %v6323_v47 = vld [vmem:[%s9485_s20 + $0x300] sm:$0xf] }
 0xa93   : > { %3888 = vmatpush.bf16.msra.mxu3 %v5900_v42  ;;  %v6356_v42 = vor.u32 %v6714_v15, %v6355_v7  ;;  %v6165_v15 = vld [vmem:[%s9485_s20 + $0x1e0] sm:$0xf0] }
 0xa96   : > { %v3976_v38 = vpop.permute.xlu1 %3975 }
 0xa97   : > { %4029 = vmatpush.bf16.msrb.mxu3 %v9576_v34  ;;  %v6706_v34 = vld [vmem:[%s9485_s20 + $0x31c] sm:$0xf0] }
 0xa9b   : > { %4030 = vmatpush.bf16.msrb.mxu3 %v9577_v28  ;;  %v6099_v28 = vld [vmem:[%s9485_s20 + $0x140] sm:$0xf] }
 0xa9f   : > { %4031 = vmatpush.bf16.msrb.mxu3 %v9578_v36  ;;  %v6650_v36 = vld [vmem:[%s9485_s20 + $0x15c] sm:$0xf0] }
 0xaa2   : > { %5895 = vmatmul.msk.bf16.gmra.mxu3 %vm1286_vm1, %v6598_v23  ;;  %v3966_v23 = vpop.permute.xlu0 %3965 }
 0xaa3   : > { %4032 = vmatpush.bf16.msrb.mxu3 %v9579_v18  ;;  %v6324_v18 = vor.u32 %v6706_v34, %v6323_v47 }
 0xaaa   : > { %v3961_v19 = vpop.permute.xlu0 %3960 }
 0xab2   : > { %5896 = vmatmul.msk.bf16.gmra.mxu3 %vm1286_vm1, %v8577_v43 }
 0xb15   : > { %v3842_v27 = vpop.f32.mrf.mxu3 }
 0xb1d   : > { %v3844_v33 = vpop.f32.mrf.mxu3 }
 0xb1e   : > { %v3857_v4 = vpack.c.bf16 %v3844_v33, %v3842_v27  ;;  %v6100_v27 = vor.u32 %v6650_v36, %v6099_v28  ;;  %v6718_v28 = vld [vmem:[%s9485_s20 + $0x384] sm:$0xf] }
 0xb1f   : > { %v6389_v36 = vld [vmem:[%s9485_s20 + $0x3a0] sm:$0xf0] }
 0xb20   : > { %5905 = vmatmul.msk.bf16.vlgmr.msra.gmra.mxu3 %vm1962_vm2, %v3857_v4  ;;  %5908 = vmatmul.msk.bf16.vlgmr.msra.gmra.mxu2 %vm1962_vm2, %v3857_v4 }
 0xb21   : > { %4907 = vmatpush.bf16.msra.mxu2 %v6420_v25  ;;  %4895 = vmatpush.bf16.msra.mxu1 %v6100_v27  ;;  %v6634_v25 = vld [vmem:[%s9485_s20 + $0xdc] sm:$0xf0]  ;;  %v6654_v27 = vld [vmem:[%s9485_s20 + $0x184] sm:$0xf] }
 0xb25   : > { %v3847_v62 = vpop.f32.mrf.mxu3  ;;  %4908 = vmatpush.bf16.msra.mxu2 %v6388_v37 }
 0xb29   : > { %4909 = vmatpush.bf16.msra.mxu2 %v6356_v42  ;;  %v6195_v42 = vld [vmem:[%s9485_s20 + $0x200] sm:$0xf] }
 0xb2d   : > { %v3849_v20 = vpop.f32.mrf.mxu3  ;;  %4910 = vmatpush.bf16.msra.mxu2 %v6324_v18 }
 0xb2e   : > { %v3858_v14 = vpack.c.bf16 %v3849_v20, %v3847_v62  ;;  %v6291_v62 = vld [vmem:[%s9485_s20 + $0x2c0] sm:$0xf] }
 0xb2f   : > { %v6698_v20 = vld [vmem:[%s9485_s20 + $0x2dc] sm:$0xf0] }
 0xb30   : > { %5906 = vmatmul.msk.bf16.gmra.mxu3 %vm1962_vm2, %v3858_v14  ;;  %5909 = vmatmul.msk.bf16.gmra.mxu2 %vm1962_vm2, %v3858_v14  ;;  %v3981_v14 = vpop.permute.xlu2 %3980 }
 0xb35   : > { %v3852_v0 = vpop.f32.mrf.mxu3 }
 0xb3d   : > { %v3854_v22 = vpop.f32.mrf.mxu3 }
 0xb3e   : > { %v3859_v41 = vpack.c.bf16 %v3854_v22, %v3852_v0 }
 0xb40   : > { %5907 = vmatmul.msk.bf16.gmra.mxu3 %vm1962_vm2, %v3859_v41  ;;  %5910 = vmatmul.msk.bf16.gmra.mxu2 %vm1962_vm2, %v3859_v41 }
 0xb50   : > { %5927 = vmatmul.msk.bf16.vlgmr.msrb.gmra.mxu3 %vm1286_vm1, %v6602_v35  ;;  %5931 = vmatmul.msk.bf16.vlgmr.msrb.gmra.mxu2 %vm1286_vm1, %v6602_v35 }
 0xb60   : > { %5928 = vmatmul.msk.bf16.gmra.mxu3 %vm1286_vm1, %v6603_v21  ;;  %5932 = vmatmul.msk.bf16.gmra.mxu2 %vm1286_vm1, %v6603_v21 }
 0xb70   : > { %5929 = vmatmul.msk.bf16.gmra.mxu3 %vm1286_vm1, %v6604_v9  ;;  %5933 = vmatmul.msk.bf16.gmra.mxu2 %vm1286_vm1, %v6604_v9 }
 0xb80   : > { %5930 = vmatmul.msk.bf16.gmra.mxu3 %vm1286_vm1, %v6605_v29  ;;  %5934 = vmatmul.msk.bf16.gmra.mxu2 %vm1286_vm1, %v6605_v29  ;;  %v6067_v29 = vld [vmem:[%s9485_s20 + $0x100] sm:$0xf] }
 0xba3   : > { %v3890_v8 = vpop.f32.mrf.mxu3  ;;  %v3914_v13 = vpop.f32.mrf.mxu2 }
 0xba4   : > { %3929 = vst [vmem:[%s730_s5] sm:$0xff] %v3890_v8  ;;  %v6642_v8 = vld [vmem:[%s9485_s20 + $0x11c] sm:$0xf0] }
 0xba5   : > { %3930 = vst [vmem:[%s730_s5 + $0x8] sm:$0xff] %v3914_v13 }
 0xbab   : > { %v3892_v63 = vpop.f32.mrf.mxu3  ;;  %v3916_v51 = vpop.f32.mrf.mxu2 }
 0xbac   : > { %3931 = vst [vmem:[%s730_s5 + $0x10] sm:$0xff] %v3892_v63 }
 0xbad   : > { %3932 = vst [vmem:[%s730_s5 + $0x18] sm:$0xff] %v3916_v51  ;;  %v6292_v51 = vor.u32 %v6698_v20, %v6291_v62  ;;  %v6133_v62 = vld [vmem:[%s9485_s20 + $0x1a0] sm:$0xf0]  ;;  %v6196_v20 = vor.u32 %v6674_v32, %v6195_v42 }
 0xbae   : > { %v6261_v32 = vld [vmem:[%s9485_s20 + $0x2a0] sm:$0xf0] }
 0xbaf   : > { %4911 = vmatpush.bf16.msra.mxu2 %v6292_v51  ;;  %v6101_v51 = vld [vmem:[%s9485_s20 + $0x160] sm:$0xf0] }
 0xbb3   : > { %v3895_v16 = vpop.f32.mrf.mxu3  ;;  %v3919_v11 = vpop.f32.mrf.mxu2 }
 0xbb4   : > { %3933 = vst [vmem:[%s730_s5 + $0x20] sm:$0xff] %v3895_v16  ;;  %v6068_v16 = vor.u32 %v6642_v8, %v6067_v29  ;;  %v6136_v29 = vor.u32 %v6654_v27, %v6133_v62  ;;  %v6646_v8 = vld [vmem:[%s9485_s20 + $0x144] sm:$0xf] }
 0xbb5   : > { %3934 = vst [vmem:[%s730_s5 + $0x28] sm:$0xff] %v3919_v11  ;;  %v6259_v11 = vld [vmem:[%s9485_s20 + $0x280] sm:$0xf]  ;;  %v6614_v27 = vld [vmem:[%s9485_s20 + $0x44] sm:$0xf] }
 0xbb6   : > { %4896 = vmatpush.bf16.msra.mxu1 %v6068_v16  ;;  %v5939_v16 = vld [vmem:[%s9485_s20] sm:$0xf] }
 0xbbb   : > { %v3897_v58 = vpop.f32.mrf.mxu3  ;;  %v3921_v54 = vpop.f32.mrf.mxu2 }
 0xbbc   : > { %3935 = vst [vmem:[%s730_s5 + $0x30] sm:$0xff] %v3897_v58  ;;  %v6690_v58 = vld [vmem:[%s9485_s20 + $0x29c] sm:$0xf0] }
 0xbbd   : > { %3936 = vst [vmem:[%s730_s5 + $0x38] sm:$0xff] %v3921_v54  ;;  %v3971_v54 = vpop.permute.xlu1 %3970 }
 0xbc3   : > { %v8612_v1 = vpop.f32.mrf.mxu3  ;;  %v8614_v46 = vpop.f32.mrf.mxu2 }
 0xbcb   : > { %v8616_v50 = vpop.f32.mrf.mxu3  ;;  %v8618_v44 = vpop.f32.mrf.mxu2 }
 0xbd3   : > { %v8620_v61 = vpop.f32.mrf.mxu3  ;;  %v8622_v52 = vpop.f32.mrf.mxu2 }
 0xbdb   : > { %v8624_v5 = vpop.f32.mrf.mxu3  ;;  %v8626_v49 = vpop.f32.mrf.mxu2 }
 0xbdc   : > { %v4037_v45 = vadd.f32 %v8624_v5, %v3961_v19  ;;  %v6421_v5 = vld [vmem:[%s9485_s20 + $0x3e0] sm:$0xf0] }
 0xbe3   : > { %v8628_v48 = vpop.f32.mrf.mxu3  ;;  %v8630_v30 = vpop.f32.mrf.mxu2 }
 0xbe4   : > { %v4069_v37 = vadd.f32 %v8630_v30, %v3966_v23 }
 0xbeb   : > { %v8632_v40 = vpop.f32.mrf.mxu3  ;;  %v8634_v57 = vpop.f32.mrf.mxu2 }
 0xbec   : > { %v4042_v17 = vadd.f32 %v8632_v40, %v3971_v54  ;;  %v4071_v55 = vadd.f32 %v8634_v57, %v3971_v54  ;;  %v6227_v40 = vld [vmem:[%s9485_s20 + $0x240] sm:$0xf]  ;;  %v6171_v54 = vld [vmem:[%s9485_s20 + $0x1c8] sm:$0xf] }
 0xbed   : > { %v6682_v57 = vld [vmem:[%s9485_s20 + $0x25c] sm:$0xf0] }
 0xbee   : > { %v4086_v7 = vpack.c.bf16 %v4071_v55, %v4069_v37  ;;  %v6228_v3 = vor.u32 %v6682_v57, %v6227_v40  ;;  %v6139_v40 = vld [vmem:[%s9485_s20 + $0x188] sm:$0xf]  ;;  %v6293_v37 = vld [vmem:[%s9485_s20 + $0x2e0] sm:$0xf0] }
 0xbef   : > { %v6659_v57 = vld [vmem:[%s9485_s20 + $0x1a4] sm:$0xf0] }
 0xbf3   : > { %v4044_v6 = vpop.f32.mrf.mxu3  ;;  %v4073_v12 = vpop.f32.mrf.mxu2 }
 0xbfb   : > { %v4046_v39 = vpop.f32.mrf.mxu3  ;;  %v4075_v10 = vpop.f32.mrf.mxu2 }
 0xbfc   : > { %v4047_v21 = vadd.f32 %v4046_v39, %v3981_v14  ;;  %v4076_v9 = vadd.f32 %v4075_v10, %v3981_v14  ;;  %v4045_v39 = vadd.f32 %v4044_v6, %v3976_v38  ;;  %v4074_v10 = vadd.f32 %v4073_v12, %v3976_v38  ;;  %v3956_v38 = vpop.permute.xlu2 %3955  ;;  %v5971_v14 = vld [vmem:[%s9485_s20 + $0x40] sm:$0xf] }
 0xbfd   : > { %v6260_v6 = vor.u32 %v6690_v58, %v6259_v11  ;;  %v4035_v47 = vadd.f32 %v8620_v61, %v3956_v38  ;;  %v4064_v34 = vadd.f32 %v8622_v52, %v3956_v38  ;;  %v6427_v61 = vld [vmem:[%s9485_s20 + $0x3c8] sm:$0xf]  ;;  %v6610_v11 = vld [vmem:[%s9485_s20 + $0x1c] sm:$0xf0]  ;;  %v6686_v38 = vld [vmem:[%s9485_s20 + $0x284] sm:$0xf] }
 0xbfe   : > { %v4087_v31 = vpack.c.bf16 %v4047_v21, %v4045_v39  ;;  %v4088_v59 = vpack.c.bf16 %v4076_v9, %v4074_v10  ;;  %v6731_v52 = vld [vmem:[%s9485_s20 + $0x3e4] sm:$0xf0]  ;;  %v6392_v9 = vor.u32 %v6718_v28, %v6389_v36  ;;  %v5940_v58 = vor.u32 %v6610_v11, %v5939_v16  ;;  %v6702_v10 = vld [vmem:[%s9485_s20 + $0x304] sm:$0xf]  ;;  %v6141_v16 = vld [vmem:[%s9485_s20 + $0x1a8] sm:$0xf0] }
 0xbff   : > { %4912 = vmatpush.bf16.msra.mxu2 %v6260_v6  ;;  %v6428_v21 = vor.u32 %v6731_v52, %v6427_v61  ;;  %v6667_v39 = vld [vmem:[%s9485_s20 + $0x1e4] sm:$0xf0]  ;;  %v6264_v28 = vor.u32 %v6686_v38, %v6261_v32  ;;  %v6678_v36 = vld [vmem:[%s9485_s20 + $0x244] sm:$0xf]  ;;  %v6631_v38 = vld [vmem:[%s9485_s20 + $0xcc] sm:$0xf] }
 0xc00   : > { %v6715_v6 = vld [vmem:[%s9485_s20 + $0x364] sm:$0xf0]  ;;  %v5973_v61 = vld [vmem:[%s9485_s20 + $0x60] sm:$0xf0]  ;;  %v6045_v32 = vld [vmem:[%s9485_s20 + $0xe8] sm:$0xf0] }
 0xc01   : > { %v5976_v62 = vor.u32 %v6614_v27, %v5973_v61  ;;  %v6011_v61 = vld [vmem:[%s9485_s20 + $0x88] sm:$0xf] }
 0xc03   : > { %v4049_v2 = vpop.f32.mrf.mxu3  ;;  %v4078_v53 = vpop.f32.mrf.mxu2  ;;  %4913 = vmatpush.bf16.msra.mxu2 %v6228_v3 }
 0xc04   : > { %v4050_v0 = vadd.f32 %v4049_v2, %v3986_v26  ;;  %v4079_v22 = vadd.f32 %v4078_v53, %v3986_v26  ;;  %v4040_v26 = vadd.f32 %v8628_v48, %v3966_v23  ;;  %v4066_v2 = vadd.f32 %v8626_v49, %v3961_v19  ;;  %v6726_v53 = vld [vmem:[%s9485_s20 + $0x3c4] sm:$0xf]  ;;  %v6626_v48 = vld [vmem:[%s9485_s20 + $0x9c] sm:$0xf0] }
 0xc05   : > { %v6662_v49 = vld [vmem:[%s9485_s20 + $0x1c4] sm:$0xf]  ;;  %v6004_v56 = vor.u32 %v6626_v48, %v6003_v60  ;;  %v6424_v23 = vor.u32 %v6726_v53, %v6421_v5  ;;  %v6140_v19 = vor.u32 %v6659_v57, %v6139_v40  ;;  %v6331_v48 = vld [vmem:[%s9485_s20 + $0x308] sm:$0xf]  ;;  %v6301_v57 = vld [vmem:[%s9485_s20 + $0x2e8] sm:$0xf0] }
 0xc06   : > { %v4085_v30 = vpack.c.bf16 %v4042_v17, %v4040_v26  ;;  %v6168_v18 = vor.u32 %v6662_v49, %v6165_v15  ;;  %v6325_v17 = vld [vmem:[%s9485_s20 + $0x320] sm:$0xf0]  ;;  %v6107_v5 = vld [vmem:[%s9485_s20 + $0x148] sm:$0xf] }
 0xc07   : > { %4914 = vmatpush.bf16.msra.mxu2 %v6196_v20  ;;  %v6694_v26 = vld [vmem:[%s9485_s20 + $0x2c4] sm:$0xf]  ;;  %v6651_v49 = vld [vmem:[%s9485_s20 + $0x164] sm:$0xf0]  ;;  %v6727_v20 = vld [vmem:[%s9485_s20 + $0x3cc] sm:$0xf] }
 0xc08   : > { %v6630_v60 = vld [vmem:[%s9485_s20 + $0xc4] sm:$0xf]  ;;  %v6108_v15 = vor.u32 %v6651_v49, %v6107_v5  ;;  %v6687_v5 = vld [vmem:[%s9485_s20 + $0x28c] sm:$0xf] }
 0xc09   : > { %v6269_v49 = vld [vmem:[%s9485_s20 + $0x2a8] sm:$0xf0] }
 0xc0b   : > { %v4051_v33 = vpop.f32.mrf.mxu3  ;;  %v4080_v4 = vpop.f32.mrf.mxu2  ;;  %4963 = vmatpush.bf16.msrb.mxu2 %v6428_v21 }
 0xc0c   : > { %v4052_v41 = vadd.f32 %v4051_v33, %v3991_v24  ;;  %v4081_v35 = vadd.f32 %v4080_v4, %v3991_v24  ;;  %v6035_v24 = vld [vmem:[%s9485_s20 + $0xc0] sm:$0xf]  ;;  %v4083_v33 = vpack.c.bf16 %v4037_v45, %v4035_v47  ;;  %v4084_v4 = vpack.c.bf16 %v4066_v2, %v4064_v34  ;;  %v6622_v47 = vld [vmem:[%s9485_s20 + $0x84] sm:$0xf] }
 0xc0d   : > { %v6036_v12 = vor.u32 %v6634_v25, %v6035_v24  ;;  %v6104_v25 = vor.u32 %v6646_v8, %v6101_v51  ;;  %v6328_v2 = vor.u32 %v6702_v10, %v6325_v17  ;;  %v6005_v34 = vld [vmem:[%s9485_s20 + $0xa0] sm:$0xf0]  ;;  %v6719_v8 = vld [vmem:[%s9485_s20 + $0x38c] sm:$0xf] }
 0xc0e   : > { %v4089_v13 = vpack.c.bf16 %v4052_v41, %v4050_v0  ;;  %v4090_v63 = vpack.c.bf16 %v4081_v35, %v4079_v22  ;;  %v6618_v0 = vld [vmem:[%s9485_s20 + $0x5c] sm:$0xf0]  ;;  %v6710_v41 = vld [vmem:[%s9485_s20 + $0x344] sm:$0xf]  ;;  %v6655_v51 = vld [vmem:[%s9485_s20 + $0x18c] sm:$0xf] }
 0xc0f   : > { %4897 = vmatpush.bf16.msra.mxu1 %v6036_v12  ;;  %v5972_v22 = vor.u32 %v6618_v0, %v5971_v14  ;;  %v6357_v35 = vld [vmem:[%s9485_s20 + $0x360] sm:$0xf0]  ;;  %v6647_v10 = vld [vmem:[%s9485_s20 + $0x14c] sm:$0xf] }
 0xc10   : > { %4095 = vmatpush.bf16.msra.mxu3 %v4089_v13  ;;  %4109 = vmatpush.bf16.msrb.mxu0 %v4090_v63  ;;  %v6395_v13 = vld [vmem:[%s9485_s20 + $0x388] sm:$0xf]  ;;  %v6360_v24 = vor.u32 %v6710_v41, %v6357_v35  ;;  %v6069_v12 = vld [vmem:[%s9485_s20 + $0x120] sm:$0xf0]  ;;  %v6663_v41 = vld [vmem:[%s9485_s20 + $0x1cc] sm:$0xf] }
 0xc11   : > { %v6723_v63 = vld [vmem:[%s9485_s20 + $0x3a4] sm:$0xf0]  ;;  %v6606_v14 = vld [vmem:[%s9485_s20 + $0x4] sm:$0xf]  ;;  %v6173_v35 = vld [vmem:[%s9485_s20 + $0x1e8] sm:$0xf0] }
 0xc12   : > { %v6396_v55 = vor.u32 %v6723_v63, %v6395_v13  ;;  %v5941_v0 = vld [vmem:[%s9485_s20 + $0x20] sm:$0xf0]  ;;  %v6176_v13 = vor.u32 %v6663_v41, %v6173_v35  ;;  %v6397_v63 = vld [vmem:[%s9485_s20 + $0x3a8] sm:$0xf0] }
 0xc13   : > { %4898 = vmatpush.bf16.msra.mxu1 %v6004_v56  ;;  %v6296_v56 = vor.u32 %v6694_v26, %v6293_v37  ;;  %v6400_v11 = vor.u32 %v6719_v8, %v6397_v63  ;;  %v6109_v17 = vld [vmem:[%s9485_s20 + $0x168] sm:$0xf0]  ;;  %v6075_v26 = vld [vmem:[%s9485_s20 + $0x108] sm:$0xf] }
 0xc14   : > { %4096 = vmatpush.bf16.msra.mxu3 %v4087_v31  ;;  %4110 = vmatpush.bf16.msrb.mxu0 %v4088_v59  ;;  %v6638_v31 = vld [vmem:[%s9485_s20 + $0x104] sm:$0xf]  ;;  %v6363_v59 = vld [vmem:[%s9485_s20 + $0x348] sm:$0xf]  ;;  %v6205_v35 = vld [vmem:[%s9485_s20 + $0x228] sm:$0xf0] }
 0xc15   : > { %4964 = vmatpush.bf16.msrb.mxu2 %v6396_v55  ;;  %v6364_v45 = vor.u32 %v6715_v6, %v6363_v59  ;;  %v6072_v53 = vor.u32 %v6638_v31, %v6069_v12  ;;  %v6299_v59 = vld [vmem:[%s9485_s20 + $0x2c8] sm:$0xf]  ;;  %v6695_v12 = vld [vmem:[%s9485_s20 + $0x2cc] sm:$0xf] }
 0xc16   : > { %v6699_v6 = vld [vmem:[%s9485_s20 + $0x2e4] sm:$0xf0]  ;;  %v6615_v8 = vld [vmem:[%s9485_s20 + $0x4c] sm:$0xf] }
 0xc17   : > { %4899 = vmatpush.bf16.msra.mxu1 %v5972_v22  ;;  %v6429_v22 = vld [vmem:[%s9485_s20 + $0x3e8] sm:$0xf0]  ;;  %v6300_v40 = vor.u32 %v6699_v6, %v6299_v59  ;;  %v6643_v37 = vld [vmem:[%s9485_s20 + $0x124] sm:$0xf0] }
 0xc18   : > { %4097 = vmatpush.bf16.msra.mxu3 %v4085_v30  ;;  %4111 = vmatpush.bf16.msrb.mxu0 %v4086_v7  ;;  %v6707_v30 = vld [vmem:[%s9485_s20 + $0x324] sm:$0xf0]  ;;  %v6037_v7 = vld [vmem:[%s9485_s20 + $0xe0] sm:$0xf0] }
 0xc19   : > { %4965 = vmatpush.bf16.msrb.mxu2 %v6364_v45  ;;  %v6332_v3 = vor.u32 %v6707_v30, %v6331_v48  ;;  %v6040_v42 = vor.u32 %v6630_v60, %v6037_v7  ;;  %v6639_v45 = vld [vmem:[%s9485_s20 + $0x10c] sm:$0xf]  ;;  %v6267_v60 = vld [vmem:[%s9485_s20 + $0x288] sm:$0xf] }
 0xc1a   : > { %v6691_v48 = vld [vmem:[%s9485_s20 + $0x2a4] sm:$0xf0] }
 0xc1b   : > { %4900 = vmatpush.bf16.msra.mxu1 %v5940_v58  ;;  %v6711_v58 = vld [vmem:[%s9485_s20 + $0x34c] sm:$0xf]  ;;  %v6268_v7 = vor.u32 %v6691_v48, %v6267_v60  ;;  %v6181_v60 = vld [vmem:[%s9485_s20 + $0x1f0] sm:$0xf0] }
 0xc1c   : > { %4098 = vmatpush.bf16.msra.mxu3 %v4083_v33  ;;  %4112 = vmatpush.bf16.msrb.mxu0 %v4084_v4  ;;  %v6670_v33 = vld [vmem:[%s9485_s20 + $0x204] sm:$0xf] }
 0xc1d   : > { %4966 = vmatpush.bf16.msrb.mxu2 %v6332_v3  ;;  %v6197_v4 = vld [vmem:[%s9485_s20 + $0x220] sm:$0xf0]  ;;  %v6043_v3 = vld [vmem:[%s9485_s20 + $0xc8] sm:$0xf] }
 0xc1e   : > { %v6200_v21 = vor.u32 %v6670_v33, %v6197_v4  ;;  %v6623_v33 = vld [vmem:[%s9485_s20 + $0x8c] sm:$0xf] }
 0xc1f   : > { %5935 = vmatmul.msk.bf16.vlgmr.msra.gmra.mxu3 %vm1286_vm1, %v8577_v43  ;;  %5936 = vmatmul.msk.bf16.vlgmr.msrb.gmra.mxu0 %vm1286_vm1, %v8577_v43  ;;  %v6172_v43 = vor.u32 %v6667_v39, %v6171_v54  ;;  %v6144_v54 = vor.u32 %v6655_v51, %v6141_v16  ;;  %v6365_v39 = vld [vmem:[%s9485_s20 + $0x368] sm:$0xf0]  ;;  %v5947_v16 = vld [vmem:[%s9485_s20 + $0x8] sm:$0xf] }
 0xc20   : > { %4935 = vmatpush.bf16.msra.mxu0 %v6424_v23  ;;  %4921 = vmatpush.bf16.msrb.mxu3 %v6168_v18  ;;  %v6008_v23 = vor.u32 %v6622_v47, %v6005_v34  ;;  %v6229_v18 = vld [vmem:[%s9485_s20 + $0x260] sm:$0xf0]  ;;  %v6368_v55 = vor.u32 %v6711_v58, %v6365_v39  ;;  %v6048_v47 = vor.u32 %v6631_v38, %v6045_v32  ;;  %v6235_v34 = vld [vmem:[%s9485_s20 + $0x248] sm:$0xf]  ;;  %v5949_v39 = vld [vmem:[%s9485_s20 + $0x28] sm:$0xf0] }
 0xc21   : > { %4949 = vmatpush.bf16.msrb.mxu1 %v6172_v43  ;;  %v6232_v52 = vor.u32 %v6678_v36, %v6229_v18  ;;  %v6112_v43 = vor.u32 %v6647_v10, %v6109_v17  ;;  %4967 = vmatpush.bf16.msrb.mxu2 %v6300_v40  ;;  %v6679_v36 = vld [vmem:[%s9485_s20 + $0x24c] sm:$0xf]  ;;  %v6373_v38 = vld [vmem:[%s9485_s20 + $0x370] sm:$0xf0] }
 0xc22   : > { %v6237_v18 = vld [vmem:[%s9485_s20 + $0x268] sm:$0xf0] }
 0xc23   : > { %v6240_v27 = vor.u32 %v6679_v36, %v6237_v18  ;;  %v6339_v18 = vld [vmem:[%s9485_s20 + $0x310] sm:$0xf] }
 0xc24   : > { %4936 = vmatpush.bf16.msra.mxu0 %v6392_v9  ;;  %4922 = vmatpush.bf16.msrb.mxu3 %v6136_v29  ;;  %v5944_v9 = vor.u32 %v6606_v14, %v5941_v0  ;;  %v6432_v29 = vor.u32 %v6727_v20, %v6429_v22  ;;  %v6203_v14 = vld [vmem:[%s9485_s20 + $0x208] sm:$0xf]  ;;  %v6671_v22 = vld [vmem:[%s9485_s20 + $0x20c] sm:$0xf] }
 0xc25   : > { %4950 = vmatpush.bf16.msrb.mxu1 %v6140_v19  ;;  %v6304_v19 = vor.u32 %v6695_v12, %v6301_v57  ;;  %4968 = vmatpush.bf16.msrb.mxu2 %v6268_v7  ;;  %v6675_v0 = vld [vmem:[%s9485_s20 + $0x224] sm:$0xf0] }
 0xc26   : > { %v6204_v41 = vor.u32 %v6675_v0, %v6203_v14  ;;  %v6648_v14 = vld [vmem:[%s9485_s20 + $0x154] sm:$0xf] }
 0xc27   : > { %v6117_v0 = vld [vmem:[%s9485_s20 + $0x170] sm:$0xf0] }
 0xc28   : > { %4937 = vmatpush.bf16.msra.mxu0 %v6360_v24  ;;  %4923 = vmatpush.bf16.msrb.mxu3 %v6104_v25  ;;  %v6703_v24 = vld [vmem:[%s9485_s20 + $0x30c] sm:$0xf] }
 0xc29   : > { %4951 = vmatpush.bf16.msrb.mxu1 %v6108_v15  ;;  %v6333_v25 = vld [vmem:[%s9485_s20 + $0x328] sm:$0xf0]  ;;  %v6272_v15 = vor.u32 %v6687_v5, %v6269_v49  ;;  %v6371_v5 = vld [vmem:[%s9485_s20 + $0x350] sm:$0xf] }
 0xc2a   : > { %v6336_v31 = vor.u32 %v6703_v24, %v6333_v25  ;;  %v6732_v24 = vld [vmem:[%s9485_s20 + $0x3ec] sm:$0xf0]  ;;  %v6728_v25 = vld [vmem:[%s9485_s20 + $0x3d4] sm:$0xf] }
 0xc2c   : > { %4938 = vmatpush.bf16.msra.mxu0 %v6328_v2  ;;  %4924 = vmatpush.bf16.msrb.mxu3 %v6072_v53  ;;  %v6076_v2 = vor.u32 %v6643_v37, %v6075_v26  ;;  %v6077_v53 = vld [vmem:[%s9485_s20 + $0x128] sm:$0xf0]  ;;  %v6724_v37 = vld [vmem:[%s9485_s20 + $0x3ac] sm:$0xf0] }
 0xc2d   : > { %v6080_v30 = vor.u32 %v6639_v45, %v6077_v53  ;;  %v6720_v45 = vld [vmem:[%s9485_s20 + $0x394] sm:$0xf] }
 0xc2e   : > { %4952 = vmatpush.bf16.msrb.mxu1 %v6076_v2  ;;  %v6668_v2 = vld [vmem:[%s9485_s20 + $0x1ec] sm:$0xf0]  ;;  %v6664_v53 = vld [vmem:[%s9485_s20 + $0x1d4] sm:$0xf] }
 0xc2f   : > { %v6184_v32 = vor.u32 %v6664_v53, %v6181_v60  ;;  %v6628_v53 = vld [vmem:[%s9485_s20 + $0xac] sm:$0xf0]  ;;  %v6624_v60 = vld [vmem:[%s9485_s20 + $0x94] sm:$0xf] }
 0xc30   : > { %4939 = vmatpush.bf16.msra.mxu0 %v6296_v56  ;;  %4925 = vmatpush.bf16.msrb.mxu3 %v6040_v42  ;;  %v6635_v56 = vld [vmem:[%s9485_s20 + $0xe4] sm:$0xf0] }
 0xc31   : > { %v6044_v42 = vor.u32 %v6635_v56, %v6043_v3  ;;  %v6716_v3 = vld [vmem:[%s9485_s20 + $0x36c] sm:$0xf0]  ;;  %v6712_v56 = vld [vmem:[%s9485_s20 + $0x354] sm:$0xf] }
 0xc32   : > { %v6372_v36 = vor.u32 %v6716_v3, %v6371_v5  ;;  %v6211_v5 = vld [vmem:[%s9485_s20 + $0x210] sm:$0xf]  ;;  %v6213_v3 = vld [vmem:[%s9485_s20 + $0x230] sm:$0xf0] }
 0xc33   : > { %4953 = vmatpush.bf16.msrb.mxu1 %v6044_v42 }
 0xc34   : > { %4940 = vmatpush.bf16.msra.mxu0 %v6264_v28  ;;  %4926 = vmatpush.bf16.msrb.mxu3 %v6008_v23  ;;  %v6683_v28 = vld [vmem:[%s9485_s20 + $0x264] sm:$0xf0] }
 0xc35   : > { %v6236_v23 = vor.u32 %v6683_v28, %v6235_v34  ;;  %v6656_v34 = vld [vmem:[%s9485_s20 + $0x194] sm:$0xf] }
 0xc36   : > { %v6149_v28 = vld [vmem:[%s9485_s20 + $0x1b0] sm:$0xf0] }
 0xc37   : > { %4969 = vmatpush.bf16.msrb.mxu2 %v6236_v23  ;;  %v6376_v23 = vor.u32 %v6712_v56, %v6373_v38  ;;  %v6443_v56 = vld [vmem:[%s9485_s20 + $0x3d8] sm:$0xf] }
 0xc38   : > { %4941 = vmatpush.bf16.msra.mxu0 %v6232_v52  ;;  %4927 = vmatpush.bf16.msrb.mxu3 %v5976_v62  ;;  %v6627_v52 = vld [vmem:[%s9485_s20 + $0xa4] sm:$0xf0]  ;;  %v6013_v62 = vld [vmem:[%s9485_s20 + $0xa8] sm:$0xf0]  ;;  %v6733_v38 = vld [vmem:[%s9485_s20 + $0x3f4] sm:$0xf0] }
 0xc39   : > { %v6012_v4 = vor.u32 %v6627_v52, %v6011_v61  ;;  %v6016_v20 = vor.u32 %v6623_v33, %v6013_v62  ;;  %v6704_v61 = vld [vmem:[%s9485_s20 + $0x314] sm:$0xf]  ;;  %v6115_v62 = vld [vmem:[%s9485_s20 + $0x150] sm:$0xf] }
 0xc3a   : > { %v6341_v52 = vld [vmem:[%s9485_s20 + $0x330] sm:$0xf0] }
 0xc3b   : > { %4954 = vmatpush.bf16.msrb.mxu1 %v6012_v4  ;;  %4970 = vmatpush.bf16.msrb.mxu2 %v6204_v41  ;;  %v6152_v4 = vor.u32 %v6656_v34, %v6149_v28  ;;  %v6344_v41 = vor.u32 %v6704_v61, %v6341_v52  ;;  %v5987_v34 = vld [vmem:[%s9485_s20 + $0x50] sm:$0xf]  ;;  %v6444_v61 = vor.u32 %v6733_v38, %v6443_v56  ;;  %v6091_v56 = vld [vmem:[%s9485_s20 + $0x118] sm:$0xf] }
 0xc3c   : > { %4942 = vmatpush.bf16.msra.mxu0 %v6200_v21  ;;  %4928 = vmatpush.bf16.msrb.mxu3 %v5944_v9  ;;  %v6208_v21 = vor.u32 %v6671_v22, %v6205_v35  ;;  %v5979_v9 = vld [vmem:[%s9485_s20 + $0x48] sm:$0xf]  ;;  %v6307_v35 = vld [vmem:[%s9485_s20 + $0x2d0] sm:$0xf]  ;;  %v6645_v38 = vld [vmem:[%s9485_s20 + $0x134] sm:$0xf0] }
 0xc3d   : > { %v6620_v28 = vld [vmem:[%s9485_s20 + $0x6c] sm:$0xf0] }
 0xc40   : > { %4991 = vmatpush.bf16.msrb.mxu0 %v6432_v29  ;;  %4977 = vmatpush.bf16.msra.mxu3 %v6176_v13  ;;  %v6619_v29 = vld [vmem:[%s9485_s20 + $0x64] sm:$0xf0]  ;;  %v5981_v13 = vld [vmem:[%s9485_s20 + $0x68] sm:$0xf0] }
 0xc41   : > { %v5980_v63 = vor.u32 %v6619_v29, %v5979_v9  ;;  %v5984_v51 = vor.u32 %v6615_v8, %v5981_v13  ;;  %v6696_v9 = vld [vmem:[%s9485_s20 + $0x2d4] sm:$0xf]  ;;  %v6120_v13 = vor.u32 %v6648_v14, %v6117_v0  ;;  %v6413_v0 = vld [vmem:[%s9485_s20 + $0x3b8] sm:$0xf0] }
 0xc42   : > { %v6309_v29 = vld [vmem:[%s9485_s20 + $0x2f0] sm:$0xf0] }
 0xc43   : > { %4955 = vmatpush.bf16.msrb.mxu1 %v5980_v63  ;;  %v6083_v63 = vld [vmem:[%s9485_s20 + $0x110] sm:$0xf] }
 0xc44   : > { %4992 = vmatpush.bf16.msrb.mxu0 %v6400_v11  ;;  %4978 = vmatpush.bf16.msra.mxu3 %v6144_v54  ;;  %v6611_v11 = vld [vmem:[%s9485_s20 + $0x24] sm:$0xf0]  ;;  %v6607_v54 = vld [vmem:[%s9485_s20 + $0xc] sm:$0xf] }
 0xc45   : > { %v5948_v58 = vor.u32 %v6611_v11, %v5947_v16  ;;  %v5952_v10 = vor.u32 %v6607_v54, %v5949_v39  ;;  %v6640_v16 = vld [vmem:[%s9485_s20 + $0x114] sm:$0xf]  ;;  %v6312_v54 = vor.u32 %v6696_v9, %v6309_v29  ;;  %v6275_v39 = vld [vmem:[%s9485_s20 + $0x290] sm:$0xf]  ;;  %v6187_v9 = vld [vmem:[%s9485_s20 + $0x1d8] sm:$0xf] }
 0xc46   : > { %v6085_v11 = vld [vmem:[%s9485_s20 + $0x130] sm:$0xf0]  ;;  %v6669_v29 = vld [vmem:[%s9485_s20 + $0x1f4] sm:$0xf0] }
 0xc47   : > { %4956 = vmatpush.bf16.msrb.mxu1 %v5948_v58 }
 0xc48   : > { %4993 = vmatpush.bf16.msrb.mxu0 %v6368_v55  ;;  %4979 = vmatpush.bf16.msra.mxu3 %v6112_v43  ;;  %v6435_v43 = vld [vmem:[%s9485_s20 + $0x3d0] sm:$0xf] }
 0xc49   : > { %v6436_v40 = vor.u32 %v6732_v24, %v6435_v43  ;;  %v6088_v24 = vor.u32 %v6640_v16, %v6085_v11  ;;  %v6379_v16 = vld [vmem:[%s9485_s20 + $0x358] sm:$0xf] }
 0xc4c   : > { %4994 = vmatpush.bf16.msrb.mxu0 %v6336_v31  ;;  %4980 = vmatpush.bf16.msra.mxu3 %v6080_v30  ;;  %v6437_v31 = vld [vmem:[%s9485_s20 + $0x3f0] sm:$0xf0] }
 0xc4d   : > { %v6440_v57 = vor.u32 %v6728_v25, %v6437_v31  ;;  %v6051_v25 = vld [vmem:[%s9485_s20 + $0xd0] sm:$0xf] }
 0xc4e   : > { %v6636_v31 = vld [vmem:[%s9485_s20 + $0xec] sm:$0xf0] }
 0xc50   : > { %4995 = vmatpush.bf16.msrb.mxu0 %v6304_v19  ;;  %4981 = vmatpush.bf16.msra.mxu3 %v6048_v47  ;;  %v6403_v19 = vld [vmem:[%s9485_s20 + $0x390] sm:$0xf] }
 0xc51   : > { %v6404_v30 = vor.u32 %v6724_v37, %v6403_v19  ;;  %v6684_v19 = vld [vmem:[%s9485_s20 + $0x26c] sm:$0xf0]  ;;  %v6680_v37 = vld [vmem:[%s9485_s20 + $0x254] sm:$0xf] }
 0xc54   : > { %4996 = vmatpush.bf16.msrb.mxu0 %v6272_v15  ;;  %4982 = vmatpush.bf16.msra.mxu3 %v6016_v20  ;;  %v6652_v20 = vld [vmem:[%s9485_s20 + $0x16c] sm:$0xf0] }
 0xc55   : > { %v6116_v8 = vor.u32 %v6652_v20, %v6115_v62  ;;  %v6721_v62 = vld [vmem:[%s9485_s20 + $0x39c] sm:$0xf]  ;;  %v5988_v20 = vor.u32 %v6620_v28, %v5987_v34  ;;  %v6283_v34 = vld [vmem:[%s9485_s20 + $0x298] sm:$0xf] }
 0xc56   : > { %v6693_v28 = vld [vmem:[%s9485_s20 + $0x2b4] sm:$0xf0] }
 0xc58   : > { %4997 = vmatpush.bf16.msrb.mxu0 %v6240_v27  ;;  %4983 = vmatpush.bf16.msra.mxu3 %v5984_v51  ;;  %v6708_v27 = vld [vmem:[%s9485_s20 + $0x32c] sm:$0xf0] }
 0xc59   : > { %v6340_v22 = vor.u32 %v6708_v27, %v6339_v18  ;;  %v6644_v51 = vld [vmem:[%s9485_s20 + $0x12c] sm:$0xf0] }
 0xc5a   : > { %v6084_v43 = vor.u32 %v6644_v51, %v6083_v63  ;;  %v6416_v51 = vor.u32 %v6721_v62, %v6413_v0  ;;  %v6284_v62 = vor.u32 %v6693_v28, %v6283_v34  ;;  %v6685_v0 = vld [vmem:[%s9485_s20 + $0x274] sm:$0xf0] }
 0xc5c   : > { %4998 = vmatpush.bf16.msrb.mxu0 %v6208_v21  ;;  %4984 = vmatpush.bf16.msra.mxu3 %v5952_v10  ;;  %v6700_v21 = vld [vmem:[%s9485_s20 + $0x2ec] sm:$0xf0] }
 0xc5d   : > { %v6308_v58 = vor.u32 %v6700_v21, %v6307_v35  ;;  %v6692_v10 = vld [vmem:[%s9485_s20 + $0x2ac] sm:$0xf0]  ;;  %v6608_v35 = vld [vmem:[%s9485_s20 + $0x14] sm:$0xf] }
 0xc5e   : > { %v5957_v21 = vld [vmem:[%s9485_s20 + $0x30] sm:$0xf0] }
 0xc9c   : > { %v4114_v17 = vpop.f32.mrf.mxu0 }
 0xc9d   : > { %v4120_v6 = vadd.f32 %v4114_v17, %v8614_v46  ;;  %v6405_v46 = vld [vmem:[%s9485_s20 + $0x3b0] sm:$0xf0] }
 0xc9e   : > { %v6408_v7 = vor.u32 %v6720_v45, %v6405_v46  ;;  %v6688_v17 = vld [vmem:[%s9485_s20 + $0x294] sm:$0xf]  ;;  %v6052_v46 = vor.u32 %v6636_v31, %v6051_v25  ;;  %v6657_v25 = vld [vmem:[%s9485_s20 + $0x19c] sm:$0xf] }
 0xc9f   : > { %v6245_v45 = vld [vmem:[%s9485_s20 + $0x270] sm:$0xf0]  ;;  %v6157_v31 = vld [vmem:[%s9485_s20 + $0x1b8] sm:$0xf0] }
 0xca2   : > { %v4100_v55 = vpop.f32.mrf.mxu3 }
 0xca3   : > { %v4119_v49 = vadd.f32 %v4100_v55, %v8612_v1  ;;  %v6147_v1 = vld [vmem:[%s9485_s20 + $0x190] sm:$0xf]  ;;  %v6277_v55 = vld [vmem:[%s9485_s20 + $0x2b0] sm:$0xf0] }
 0xca4   : > { %v4116_v59 = vpop.f32.mrf.mxu0 }
 0xca5   : > { %v4122_v12 = vadd.f32 %v4116_v59, %v8618_v44  ;;  %v6179_v44 = vld [vmem:[%s9485_s20 + $0x1d0] sm:$0xf]  ;;  %v6632_v59 = vld [vmem:[%s9485_s20 + $0xd4] sm:$0xf] }
 0xca6   : > { %v6180_v42 = vor.u32 %v6668_v2, %v6179_v44  ;;  %v6019_v2 = vld [vmem:[%s9485_s20 + $0x90] sm:$0xf] }
 0xca7   : > { %v9049_v26 = vpack.c.bf16 %v4122_v12, %v4120_v6  ;;  %v6053_v6 = vld [vmem:[%s9485_s20 + $0xf0] sm:$0xf0]  ;;  %v6276_v12 = vor.u32 %v6692_v10, %v6275_v39  ;;  %v6713_v39 = vld [vmem:[%s9485_s20 + $0x35c] sm:$0xf] }
 0xca8   : > { %v6056_v44 = vor.u32 %v6632_v59, %v6053_v6  ;;  %v6381_v10 = vld [vmem:[%s9485_s20 + $0x378] sm:$0xf0] }
 0xca9   : > { %4915 = vmatmul.bf16.vlgmr.msra.gmra.mxu2 %v9049_v26  ;;  %4943 = vmatmul.bf16.vlgmr.msra.gmra.mxu0 %v9049_v26  ;;  %v6384_v6 = vor.u32 %v6713_v39, %v6381_v10 }
 0xcaa   : > { %5019 = vmatpush.bf16.msra.mxu2 %v6436_v40  ;;  %5047 = vmatpush.bf16.msra.mxu0 %v6440_v57  ;;  %v4102_v48 = vpop.f32.mrf.mxu3  ;;  %v6280_v40 = vor.u32 %v6688_v17, %v6277_v55  ;;  %v6243_v57 = vld [vmem:[%s9485_s20 + $0x250] sm:$0xf]  ;;  %v6188_v17 = vor.u32 %v6669_v29, %v6187_v9  ;;  %v6027_v9 = vld [vmem:[%s9485_s20 + $0x98] sm:$0xf] }
 0xcab   : > { %v4121_v15 = vadd.f32 %v4102_v48, %v8616_v50  ;;  %v6660_v50 = vld [vmem:[%s9485_s20 + $0x1ac] sm:$0xf0]  ;;  %v6021_v48 = vld [vmem:[%s9485_s20 + $0xb0] sm:$0xf0]  ;;  %v6629_v29 = vld [vmem:[%s9485_s20 + $0xb4] sm:$0xf0] }
 0xcac   : > { %v6148_v33 = vor.u32 %v6660_v50, %v6147_v1  ;;  %v6729_v1 = vld [vmem:[%s9485_s20 + $0x3dc] sm:$0xf]  ;;  %v6028_v39 = vor.u32 %v6629_v29, %v6027_v9 }
 0xcad   : > { %v9091_v47 = vpack.c.bf16 %v4121_v15, %v4119_v49  ;;  %v6676_v49 = vld [vmem:[%s9485_s20 + $0x22c] sm:$0xf0]  ;;  %v6672_v15 = vld [vmem:[%s9485_s20 + $0x214] sm:$0xf]  ;;  %v6445_v50 = vld [vmem:[%s9485_s20 + $0x3f8] sm:$0xf0] }
 0xcae   : > { %5020 = vmatpush.bf16.msra.mxu2 %v6404_v30  ;;  %5048 = vmatpush.bf16.msra.mxu0 %v6408_v7  ;;  %v6244_v30 = vor.u32 %v6684_v19, %v6243_v57  ;;  %v6248_v7 = vor.u32 %v6680_v37, %v6245_v45  ;;  %v6212_v18 = vor.u32 %v6676_v49, %v6211_v5  ;;  %v6705_v57 = vld [vmem:[%s9485_s20 + $0x31c] sm:$0xf] }
 0xcaf   : > { %4901 = vmatmul.bf16.vlgmr.msra.gmra.mxu1 %v9091_v47  ;;  %4929 = vmatmul.bf16.vlgmr.msrb.gmra.mxu3 %v9091_v47  ;;  %v6216_v27 = vor.u32 %v6672_v15, %v6213_v3  ;;  %v6448_v52 = vor.u32 %v6729_v1, %v6445_v50  ;;  %v6349_v19 = vld [vmem:[%s9485_s20 + $0x338] sm:$0xf0]  ;;  %v6160_v45 = vor.u32 %v6657_v25, %v6157_v31 }
 0xcb0   : > { %5005 = vmatpush.bf16.msra.mxu1 %v6180_v42  ;;  %5033 = vmatpush.bf16.msrb.mxu3 %v6184_v32  ;;  %v6020_v42 = vor.u32 %v6628_v53, %v6019_v2  ;;  %v6024_v32 = vor.u32 %v6624_v60, %v6021_v48  ;;  %v6649_v2 = vld [vmem:[%s9485_s20 + $0x15c] sm:$0xf]  ;;  %v6352_v48 = vor.u32 %v6705_v57, %v6349_v19 }
 0xcb1   : > { %v6125_v53 = vld [vmem:[%s9485_s20 + $0x178] sm:$0xf0] }
 0xcb2   : > { %5021 = vmatpush.bf16.msra.mxu2 %v6372_v36  ;;  %5049 = vmatpush.bf16.msra.mxu0 %v6376_v23  ;;  %v6616_v36 = vld [vmem:[%s9485_s20 + $0x54] sm:$0xf]  ;;  %v6697_v5 = vld [vmem:[%s9485_s20 + $0x2dc] sm:$0xf]  ;;  %v6128_v3 = vor.u32 %v6649_v2, %v6125_v53 }
 0xcb3   : > { %v5989_v23 = vld [vmem:[%s9485_s20 + $0x70] sm:$0xf0]  ;;  %v6317_v49 = vld [vmem:[%s9485_s20 + $0x2f8] sm:$0xf0] }
 0xcb4   : > { %5006 = vmatpush.bf16.msra.mxu1 %v6148_v33  ;;  %5034 = vmatpush.bf16.msrb.mxu3 %v6152_v4  ;;  %v6411_v33 = vld [vmem:[%s9485_s20 + $0x398] sm:$0xf]  ;;  %v5992_v14 = vor.u32 %v6616_v36, %v5989_v23  ;;  %v6320_v50 = vor.u32 %v6697_v5, %v6317_v49  ;;  %v6689_v36 = vld [vmem:[%s9485_s20 + $0x29c] sm:$0xf] }
 0xcb5   : > { %v6725_v4 = vld [vmem:[%s9485_s20 + $0x3b4] sm:$0xf0]  ;;  %v6285_v23 = vld [vmem:[%s9485_s20 + $0x2b8] sm:$0xf0] }
 0xcb6   : > { %5022 = vmatpush.bf16.msra.mxu2 %v6340_v22  ;;  %5050 = vmatpush.bf16.msra.mxu0 %v6344_v41  ;;  %v5955_v22 = vld [vmem:[%s9485_s20 + $0x10] sm:$0xf]  ;;  %v6412_v63 = vor.u32 %v6725_v4, %v6411_v33  ;;  %v6633_v33 = vld [vmem:[%s9485_s20 + $0xdc] sm:$0xf] }
 0xcb7   : > { %v6612_v41 = vld [vmem:[%s9485_s20 + $0x2c] sm:$0xf0]  ;;  %v6061_v4 = vld [vmem:[%s9485_s20 + $0xf8] sm:$0xf0] }
 0xcb8   : > { %5007 = vmatpush.bf16.msra.mxu1 %v6116_v8  ;;  %5035 = vmatpush.bf16.msrb.mxu3 %v6120_v13  ;;  %v6665_v8 = vld [vmem:[%s9485_s20 + $0x1dc] sm:$0xf]  ;;  %v5956_v11 = vor.u32 %v6612_v41, %v5955_v22 }
 0xcb9   : > { %4971 = vmatmul.bf16.vlgmr.msrb.gmra.mxu2 %v9049_v26  ;;  %4999 = vmatmul.bf16.vlgmr.msrb.gmra.mxu0 %v9049_v26  ;;  %v6189_v13 = vld [vmem:[%s9485_s20 + $0x1f8] sm:$0xf0] }
 0xcba   : > { %5023 = vmatpush.bf16.msra.mxu2 %v6308_v58  ;;  %5051 = vmatpush.bf16.msra.mxu0 %v6312_v54  ;;  %v5960_v58 = vor.u32 %v6608_v35, %v5957_v21  ;;  %v6717_v54 = vld [vmem:[%s9485_s20 + $0x374] sm:$0xf0]  ;;  %v6192_v55 = vor.u32 %v6665_v8, %v6189_v13  ;;  %v6681_v22 = vld [vmem:[%s9485_s20 + $0x25c] sm:$0xf]  ;;  %v6064_v21 = vor.u32 %v6633_v33, %v6061_v4 }
 0xcbb   : > { %v6380_v59 = vor.u32 %v6717_v54, %v6379_v16  ;;  %v6253_v41 = vld [vmem:[%s9485_s20 + $0x278] sm:$0xf0]  ;;  %v6219_v16 = vld [vmem:[%s9485_s20 + $0x218] sm:$0xf] }
 0xcbc   : > { %5008 = vmatpush.bf16.msra.mxu1 %v6084_v43  ;;  %5036 = vmatpush.bf16.msrb.mxu3 %v6088_v24  ;;  %v6155_v43 = vld [vmem:[%s9485_s20 + $0x198] sm:$0xf]  ;;  %v6625_v8 = vld [vmem:[%s9485_s20 + $0x9c] sm:$0xf] }
 0xcbd   : > { %v6661_v24 = vld [vmem:[%s9485_s20 + $0x1b4] sm:$0xf0]  ;;  %v6029_v13 = vld [vmem:[%s9485_s20 + $0xb8] sm:$0xf0] }
 0xcbe   : > { %5024 = vmatpush.bf16.msra.mxu2 %v6276_v12  ;;  %5052 = vmatpush.bf16.msra.mxu0 %v6280_v40  ;;  %v6347_v12 = vld [vmem:[%s9485_s20 + $0x318] sm:$0xf]  ;;  %v6156_v37 = vor.u32 %v6661_v24, %v6155_v43  ;;  %v6221_v54 = vld [vmem:[%s9485_s20 + $0x238] sm:$0xf0]  ;;  %v6032_v10 = vor.u32 %v6625_v8, %v6029_v13 }
 0xcbf   : > { %4957 = vmatmul.bf16.vlgmr.msrb.gmra.mxu1 %v9091_v47  ;;  %4985 = vmatmul.bf16.vlgmr.msra.gmra.mxu3 %v9091_v47  ;;  %v6709_v40 = vld [vmem:[%s9485_s20 + $0x334] sm:$0xf0]  ;;  %v6617_v43 = vld [vmem:[%s9485_s20 + $0x5c] sm:$0xf] }
 0xcc0   : > { %5009 = vmatpush.bf16.msra.mxu1 %v6052_v46  ;;  %5037 = vmatpush.bf16.msrb.mxu3 %v6056_v44  ;;  %v6123_v46 = vld [vmem:[%s9485_s20 + $0x158] sm:$0xf]  ;;  %v6348_v60 = vor.u32 %v6709_v40, %v6347_v12  ;;  %v5997_v24 = vld [vmem:[%s9485_s20 + $0x78] sm:$0xf0] }
 0xcc1   : > { %v6653_v44 = vld [vmem:[%s9485_s20 + $0x174] sm:$0xf0]  ;;  %v6609_v57 = vld [vmem:[%s9485_s20 + $0x1c] sm:$0xf] }
 0xcc2   : > { %5025 = vmatpush.bf16.msra.mxu2 %v6244_v30  ;;  %5053 = vmatpush.bf16.msra.mxu0 %v6248_v7  ;;  %v6315_v30 = vld [vmem:[%s9485_s20 + $0x2d8] sm:$0xf]  ;;  %v6124_v15 = vor.u32 %v6653_v44, %v6123_v46  ;;  %v5965_v19 = vld [vmem:[%s9485_s20 + $0x38] sm:$0xf0] }
 0xcc3   : > { %v6701_v7 = vld [vmem:[%s9485_s20 + $0x2f4] sm:$0xf0] }
 0xcc4   : > { %5010 = vmatpush.bf16.msra.mxu1 %v6020_v42  ;;  %5038 = vmatpush.bf16.msrb.mxu3 %v6024_v32  ;;  %v6641_v42 = vld [vmem:[%s9485_s20 + $0x11c] sm:$0xf]  ;;  %v6316_v1 = vor.u32 %v6701_v7, %v6315_v30  ;;  %v5963_v12 = vld [vmem:[%s9485_s20 + $0x18] sm:$0xf] }
 0xcc5   : > { %v6093_v32 = vld [vmem:[%s9485_s20 + $0x138] sm:$0xf0]  ;;  %v6613_v40 = vld [vmem:[%s9485_s20 + $0x34] sm:$0xf0] }
 0xcc6   : > { %5026 = vmatpush.bf16.msra.mxu2 %v6212_v18  ;;  %5054 = vmatpush.bf16.msra.mxu0 %v6216_v27  ;;  %v6092_v18 = vor.u32 %v6645_v38, %v6091_v56  ;;  %v6096_v27 = vor.u32 %v6641_v42, %v6093_v32 }
 0xcc8   : > { %5011 = vmatpush.bf16.msra.mxu1 %v5988_v20  ;;  %5039 = vmatpush.bf16.msrb.mxu3 %v5992_v14  ;;  %v6288_v20 = vor.u32 %v6689_v36, %v6285_v23  ;;  %v6251_v14 = vld [vmem:[%s9485_s20 + $0x258] sm:$0xf] }
 0xcc9   : > { %5027 = vmatmul.bf16.vlgmr.msra.gmra.mxu2 %v9049_v26  ;;  %5055 = vmatmul.bf16.vlgmr.msra.gmra.mxu0 %v9049_v26 }
 0xcca   : > { %5075 = vmatpush.bf16.msrb.mxu2 %v6444_v61  ;;  %5103 = vmatpush.bf16.msrb.mxu0 %v6448_v52  ;;  %v6059_v61 = vld [vmem:[%s9485_s20 + $0xd8] sm:$0xf] }
 0xccb   : > { %v6637_v52 = vld [vmem:[%s9485_s20 + $0xf4] sm:$0xf0] }
 0xccc   : > { %5012 = vmatpush.bf16.msra.mxu1 %v5956_v11  ;;  %5040 = vmatpush.bf16.msrb.mxu3 %v5960_v58  ;;  %v6060_v35 = vor.u32 %v6637_v52, %v6059_v61  ;;  %v6677_v11 = vld [vmem:[%s9485_s20 + $0x234] sm:$0xf0]  ;;  %v6673_v58 = vld [vmem:[%s9485_s20 + $0x21c] sm:$0xf] }
 0xccd   : > { %v6220_v25 = vor.u32 %v6677_v11, %v6219_v16  ;;  %v6224_v31 = vor.u32 %v6673_v58, %v6221_v54 }
 0xcce   : > { %5076 = vmatpush.bf16.msrb.mxu2 %v6412_v63  ;;  %5104 = vmatpush.bf16.msrb.mxu0 %v6416_v51  ;;  %v6252_v63 = vor.u32 %v6685_v0, %v6251_v14  ;;  %v6256_v51 = vor.u32 %v6681_v22, %v6253_v41 }
 0xccf   : > { %5013 = vmatmul.bf16.vlgmr.msra.gmra.mxu1 %v9091_v47  ;;  %5041 = vmatmul.bf16.vlgmr.msrb.gmra.mxu3 %v9091_v47 }
 0xcd0   : > { %5061 = vmatpush.bf16.msrb.mxu1 %v6188_v17  ;;  %5089 = vmatpush.bf16.msra.mxu3 %v6192_v55  ;;  %v5995_v17 = vld [vmem:[%s9485_s20 + $0x58] sm:$0xf] }
 0xcd1   : > { %v6621_v55 = vld [vmem:[%s9485_s20 + $0x74] sm:$0xf0] }
 0xcd2   : > { %5077 = vmatpush.bf16.msrb.mxu2 %v6380_v59  ;;  %5105 = vmatpush.bf16.msrb.mxu0 %v6384_v6  ;;  %v5996_v59 = vor.u32 %v6621_v55, %v5995_v17  ;;  %v6000_v6 = vor.u32 %v6617_v43, %v5997_v24 }
 0xcd4   : > { %5062 = vmatpush.bf16.msrb.mxu1 %v6156_v37  ;;  %5090 = vmatpush.bf16.msra.mxu3 %v6160_v45  ;;  %v5964_v37 = vor.u32 %v6613_v40, %v5963_v12  ;;  %v5968_v45 = vor.u32 %v6609_v57, %v5965_v19 }
 0xcd6   : > { %5078 = vmatpush.bf16.msrb.mxu2 %v6348_v60  ;;  %5106 = vmatpush.bf16.msrb.mxu0 %v6352_v48 }
 0xcd8   : > { %5063 = vmatpush.bf16.msrb.mxu1 %v6124_v15  ;;  %5091 = vmatpush.bf16.msra.mxu3 %v6128_v3 }
 0xcda   : > { %5079 = vmatpush.bf16.msrb.mxu2 %v6316_v1  ;;  %5107 = vmatpush.bf16.msrb.mxu0 %v6320_v50 }
 0xcdc   : > { %5064 = vmatpush.bf16.msrb.mxu1 %v6092_v18  ;;  %5092 = vmatpush.bf16.msra.mxu3 %v6096_v27 }
 0xcde   : > { %5080 = vmatpush.bf16.msrb.mxu2 %v6284_v62  ;;  %5108 = vmatpush.bf16.msrb.mxu0 %v6288_v20 }
 0xce0   : > { %5065 = vmatpush.bf16.msrb.mxu1 %v6060_v35  ;;  %5093 = vmatpush.bf16.msra.mxu3 %v6064_v21 }
 0xce2   : > { %5081 = vmatpush.bf16.msrb.mxu2 %v6252_v63  ;;  %5109 = vmatpush.bf16.msrb.mxu0 %v6256_v51 }
 0xce4   : > { %5066 = vmatpush.bf16.msrb.mxu1 %v6028_v39  ;;  %5094 = vmatpush.bf16.msra.mxu3 %v6032_v10 }
 0xce6   : > { %5082 = vmatpush.bf16.msrb.mxu2 %v6220_v25  ;;  %5110 = vmatpush.bf16.msrb.mxu0 %v6224_v31 }
 0xce8   : > { %5067 = vmatpush.bf16.msrb.mxu1 %v5996_v59  ;;  %5095 = vmatpush.bf16.msra.mxu3 %v6000_v6 }
 0xce9   : > { %5083 = vmatmul.bf16.vlgmr.msrb.gmra.mxu2 %v9049_v26  ;;  %5111 = vmatmul.bf16.vlgmr.msrb.gmra.mxu0 %v9049_v26 }
 0xcec   : > { %5068 = vmatpush.bf16.msrb.mxu1 %v5964_v37  ;;  %5096 = vmatpush.bf16.msra.mxu3 %v5968_v45 }
 0xcef   : > { %5069 = vmatmul.bf16.vlgmr.msrb.gmra.mxu1 %v9091_v47  ;;  %5097 = vmatmul.bf16.vlgmr.msra.gmra.mxu3 %v9091_v47 }
 0xd26   : > { %v4944_v46 = vpop.f32.mrf.mxu0 }
 0xd2c   : > { %v4902_v44 = vpop.f32.mrf.mxu1  ;;  %v4916_v2 = vpop.f32.mrf.mxu2 }
 0xd2d   : > { %v4917_v26 = vadd.f32 %v4916_v2, %v4902_v44 }
 0xd2e   : > { %v4946_v60 = vpop.f32.mrf.mxu0 }
 0xd2f   : > { %5117 = vst [vmem:[%s9444_s28] sm:$0xff] %v4917_v26 }
 0xd32   : > { %v4930_v53 = vpop.f32.mrf.mxu3 }
 0xd33   : > { %v4945_v48 = vadd.f32 %v4944_v46, %v4930_v53 }
 0xd34   : > { %v4904_v47 = vpop.f32.mrf.mxu1  ;;  %v4918_v30 = vpop.f32.mrf.mxu2 }
 0xd35   : > { %5118 = vst [vmem:[%s9444_s28 + $0x8] sm:$0xff] %v4945_v48  ;;  %v4919_v7 = vadd.f32 %v4918_v30, %v4904_v47 }
 0xd36   : > { %v5000_v56 = vpop.f32.mrf.mxu0 }
 0xd37   : > { %5125 = vst [vmem:[%s9444_s28 + $0x40] sm:$0xff] %v4919_v7 }
 0xd3a   : > { %v4932_v5 = vpop.f32.mrf.mxu3 }
 0xd3b   : > { %v4947_v49 = vadd.f32 %v4946_v60, %v4932_v5 }
 0xd3c   : > { %v4958_v15 = vpop.f32.mrf.mxu1  ;;  %v4972_v3 = vpop.f32.mrf.mxu2 }
 0xd3d   : > { %5126 = vst [vmem:[%s9444_s28 + $0x48] sm:$0xff] %v4947_v49  ;;  %v4973_v38 = vadd.f32 %v4972_v3, %v4958_v15 }
 0xd3e   : > { %v5002_v28 = vpop.f32.mrf.mxu0 }
 0xd3f   : > { %5119 = vst [vmem:[%s9444_s28 + $0x10] sm:$0xff] %v4973_v38 }
 0xd42   : > { %v4986_v42 = vpop.f32.mrf.mxu3 }
 0xd43   : > { %v5001_v32 = vadd.f32 %v5000_v56, %v4986_v42 }
 0xd44   : > { %v4960_v1 = vpop.f32.mrf.mxu1  ;;  %v4974_v50 = vpop.f32.mrf.mxu2 }
 0xd45   : > { %5120 = vst [vmem:[%s9444_s28 + $0x18] sm:$0xff] %v5001_v32  ;;  %v4975_v34 = vadd.f32 %v4974_v50, %v4960_v1 }
 0xd46   : > { %v5056_v52 = vpop.f32.mrf.mxu0 }
 0xd47   : > { %5127 = vst [vmem:[%s9444_s28 + $0x50] sm:$0xff] %v4975_v34 }
 0xd4a   : > { %v4988_v36 = vpop.f32.mrf.mxu3 }
 0xd4b   : > { %v5003_v23 = vadd.f32 %v5002_v28, %v4988_v36 }
 0xd4c   : > { %v5028_v18 = vpop.f32.mrf.mxu2  ;;  %v5014_v27 = vpop.f32.mrf.mxu1 }
 0xd4d   : > { %5128 = vst [vmem:[%s9444_s28 + $0x58] sm:$0xff] %v5003_v23  ;;  %v5029_v61 = vadd.f32 %v5028_v18, %v5014_v27 }
 0xd4e   : > { %v5058_v0 = vpop.f32.mrf.mxu0 }
 0xd4f   : > { %5121 = vst [vmem:[%s9444_s28 + $0x20] sm:$0xff] %v5029_v61 }
 0xd52   : > { %v5042_v33 = vpop.f32.mrf.mxu3 }
 0xd53   : > { %v5057_v4 = vadd.f32 %v5056_v52, %v5042_v33 }
 0xd54   : > { %v5030_v62 = vpop.f32.mrf.mxu2  ;;  %v5016_v20 = vpop.f32.mrf.mxu1 }
 0xd55   : > { %5122 = vst [vmem:[%s9444_s28 + $0x28] sm:$0xff] %v5057_v4  ;;  %v5031_v14 = vadd.f32 %v5030_v62, %v5016_v20 }
 0xd57   : > { %5129 = vst [vmem:[%s9444_s28 + $0x60] sm:$0xff] %v5031_v14 }
 0xd5a   : > { %v5044_v22 = vpop.f32.mrf.mxu3 }
 0xd5b   : > { %v5059_v41 = vadd.f32 %v5058_v0, %v5044_v22 }
 0xd5d   : > { %5130 = vst [vmem:[%s9444_s28 + $0x68] sm:$0xff] %v5059_v41 }
 0xd66   : > { %v5112_v29 = vpop.f32.mrf.mxu0 }
 0xd6c   : > { %v5070_v35 = vpop.f32.mrf.mxu1  ;;  %v5084_v21 = vpop.f32.mrf.mxu2 }
 0xd6d   : > { %v5085_v9 = vadd.f32 %v5084_v21, %v5070_v35 }
 0xd6e   : > { %v5114_v11 = vpop.f32.mrf.mxu0 }
 0xd6f   : > { %5123 = vst [vmem:[%s9444_s28 + $0x30] sm:$0xff] %v5085_v9 }
 0xd72   : > { %v5098_v8 = vpop.f32.mrf.mxu3 }
 0xd73   : > { %v5113_v13 = vadd.f32 %v5112_v29, %v5098_v8 }
 0xd74   : > { %v5072_v63 = vpop.f32.mrf.mxu1  ;;  %v5086_v51 = vpop.f32.mrf.mxu2 }
 0xd75   : > { %5124 = vst [vmem:[%s9444_s28 + $0x38] sm:$0xff] %v5113_v13  ;;  %v5087_v16 = vadd.f32 %v5086_v51, %v5072_v63 }
 0xd77   : > { %5131 = vst [vmem:[%s9444_s28 + $0x70] sm:$0xff] %v5087_v16 }
 0xd7a   : > { %v5100_v58 = vpop.f32.mrf.mxu3 }
 0xd7b   : > { %v5115_v54 = vadd.f32 %v5114_v11, %v5100_v58 }
 0xd7d   : > { %5132 = vst [vmem:[%s9444_s28 + $0x78] sm:$0xff] %v5115_v54 }
 0xd7e PF: > { %s34_s4 = sadd.s32 1, %s6757_s4  }
 0xd7f   : > { %p31_p4 = scmp.ge.s32.totalorder %s34_s4, 4  }
 0xd81   :  { %33 = sbr.rel (!%p31_p4) target bundleno = 11 (0xb), region = 158 }

</bundles_post_ra>
